<compile_context>
chip_gen: v5e
topology: v5e:2x2
jax: 0.10.0
libtpu: 0.0.40
codegen_flags: <defaults>
</compile_context>

<pallas_src>
import functools

import jax
import jax.numpy as jnp
import numpy as np
from jax.experimental import pallas as pl
from jax.experimental.pallas import tpu as pltpu


def resblock_kernel(x_ref, w1_ref, b1_ref, w2_ref, b2_ref, out_ref,
                    slab_ref, col_ref, *, H, W, P, C):
    # x_ref   : (1, H*W, C)   f32    input block (one batch element)
    # w1_ref  : (CP, CP)      bf16   tap-folded 3x3 weights, rows = (tap, cin)
    # b1_ref  : (1, CP)       f32
    # w2_ref  : (CP, CP)      bf16   1x1 weights, (cin, cout)
    # b2_ref  : (1, CP)       f32
    # out_ref : (1, H*W, CP)  f32    lane-dense output block
    # slab_ref: (P + H*W + P, C) f32 zero-haloed relu(x) slab (narrow)
    # col_ref : (H*W, CP)     f32    im2col staging / residual staging
    HW = H * W
    CP = out_ref.shape[2]

    # --- relu1 + zero-halo slab fill: zero only the two halo bands, the centre
    # rows are a full overwrite (no whole-slab re-zeroing per step).
    slab_ref[pl.ds(0, P), :] = jnp.zeros((P, C), jnp.float32)
    slab_ref[pl.ds(P + HW, P), :] = jnp.zeros((P, C), jnp.float32)
    slab_ref[pl.ds(P, HW), :] = jnp.maximum(x_ref[0].astype(jnp.float32), 0.0)

    # --- build the im2col slab: lane group t holds the tap-t shifted copy of
    # relu(x); invalid dx=+-1 border columns are zeroed while building.
    col = jax.lax.broadcasted_iota(jnp.int32, (HW, 1), 0) % W   # x-coordinate
    col_ref[...] = jnp.zeros_like(col_ref)
    for kh in range(3):
        for kw in range(3):
            t = kh * 3 + kw
            start = P + (kh - 1) * W + (kw - 1)          # static sublane offset
            tap = slab_ref[pl.ds(start, HW), :]          # (HW, C) f32
            if kw == 0:
                tap = jnp.where(col > 0, tap, 0.0)       # output x == 0 invalid
            elif kw == 2:
                tap = jnp.where(col < W - 1, tap, 0.0)   # output x == W-1 invalid
            col_ref[pl.ds(0, HW), pl.ds(t * C, C)] = tap

    # --- conv1: a single bf16 MXU matmul against the tap-folded weights.
    a = col_ref[...].astype(jnp.bfloat16)
    acc = jnp.dot(a, w1_ref[...], preferred_element_type=jnp.float32)
    acc = acc + b1_ref[...]
    h = jnp.maximum(acc, 0.0).astype(jnp.bfloat16)       # relu2

    # --- residual staging: reuse col_ref for the channel-padded identity
    # (pre-relu x from x_ref, NOT the relu'd slab).
    col_ref[...] = jnp.zeros_like(col_ref)
    col_ref[pl.ds(0, HW), pl.ds(0, C)] = x_ref[0].astype(jnp.float32)

    # --- conv2 (1x1 == channel matmul) + bias + residual + final relu (f32).
    out = jnp.dot(h, w2_ref[...], preferred_element_type=jnp.float32)
    out = out + b2_ref[...]
    out = out + col_ref[...]
    out_ref[0] = jnp.maximum(out, 0.0).astype(out_ref.dtype)


def resblock_forward(x_nchw, w1, b1, w2, b2):
    """x_nchw: (N, C, H, W). w1: (Cb, C, 3, 3) OIHW, w2: (Cb, Cb, 1, 1) OIHW."""
    N, C, H, W = x_nchw.shape
    Cb = w1.shape[0]
    assert Cb == C, "residual add requires bottleneck_ratio == 1"
    # TODO(synk): fall back to per-tap matmuls (or K-tiling) when 9*C > 128.
    assert 9 * C <= 128, "tap folding requires 9*C <= 128"

    CP = 128                                   # lane-dense padded channel count
    HW = H * W

    # NCHW -> (N, H*W, C): channels last, spatial flattened.  No channel or
    # spatial padding here — the kernel pads in VMEM, so input HBM traffic
    # stays 1x.  TODO(synk): keep the surrounding model NHWC to drop this
    # transpose/slice pre/post-processing entirely.
    x = jnp.transpose(x_nchw, (0, 2, 3, 1)).reshape(N, HW, C).astype(jnp.float32)

    # conv1 weights folded over taps: row = (kh*3 + kw)*C + cin, col = cout.
    w1k = jnp.transpose(w1, (2, 3, 1, 0)).reshape(9 * C, Cb).astype(jnp.float32)
    w1f = jnp.zeros((CP, CP), jnp.float32).at[:9 * C, :Cb].set(w1k)
    w1f = w1f.astype(jnp.bfloat16)
    # conv2 (1x1): (cin, cout), channel padded.
    w2k = jnp.transpose(w2.reshape(Cb, Cb), (1, 0)).astype(jnp.float32)
    w2f = jnp.zeros((CP, CP), jnp.float32).at[:Cb, :Cb].set(w2k)
    w2f = w2f.astype(jnp.bfloat16)
    b1p = jnp.zeros((1, CP), jnp.float32).at[0, :Cb].set(b1.astype(jnp.float32))
    b2p = jnp.zeros((1, CP), jnp.float32).at[0, :Cb].set(b2.astype(jnp.float32))

    P = ((W + 1 + 7) // 8) * 8                 # 8-aligned halo rows (>= W+1)

    kernel = functools.partial(resblock_kernel, H=H, W=W, P=P, C=C)

    out = pl.pallas_call(
        kernel,
        out_shape=jax.ShapeDtypeStruct((N, HW, CP), jnp.float32),
        grid_spec=pltpu.PrefetchScalarGridSpec(
            num_scalar_prefetch=0,
            grid=(N,),
            in_specs=[
                pl.BlockSpec((1, HW, C), lambda b: (b, 0, 0)),
                pl.BlockSpec((CP, CP), lambda b: (0, 0)),
                pl.BlockSpec((1, CP), lambda b: (0, 0)),
                pl.BlockSpec((CP, CP), lambda b: (0, 0)),
                pl.BlockSpec((1, CP), lambda b: (0, 0)),
            ],
            out_specs=pl.BlockSpec((1, HW, CP), lambda b: (b, 0, 0)),
            scratch_shapes=[
                pltpu.VMEM((P + HW + P, C), jnp.float32),   # relu(x) halo slab
                pltpu.VMEM((HW, CP), jnp.float32),          # im2col / residual
            ],
        ),
        compiler_params=pltpu.CompilerParams(
            dimension_semantics=("parallel",),
            vmem_limit_bytes=32 * 1024 * 1024),
    )(x, w1f, b1p, w2f, b2p)

    out = out[:, :, :Cb].reshape(N, H, W, Cb)
    return jnp.transpose(out, (0, 3, 1, 2)).astype(x_nchw.dtype)   # back to NCHW


def resblock_ref(x, w1, b1, w2, b2):
    """Pure-JAX reference (NCHW), mirroring the PyTorch forward (SAME-pad conv1)."""
    out = jax.nn.relu(x)
    out = jax.lax.conv_general_dilated(
        out, w1, (1, 1), ((1, 1), (1, 1)),
        dimension_numbers=("NCHW", "OIHW", "NCHW"))
    out = out + b1.reshape(1, -1, 1, 1)
    out = jax.nn.relu(out)
    out = jax.lax.conv_general_dilated(
        out, w2, (1, 1), "VALID",
        dimension_numbers=("NCHW", "OIHW", "NCHW"))
    out = out + b2.reshape(1, -1, 1, 1)
    out = out + x
    return jax.nn.relu(out)


if __name__ == "__main__":
    N, C, H, W = 2, 4, 16, 16
    Cb = C  # bottleneck_ratio = 1

    key = jax.random.PRNGKey(0)
    kx, k1, kb1, k2, kb2 = jax.random.split(key, 5)
    x = jax.random.normal(kx, (N, C, H, W), dtype=jnp.float32)
    w1 = 0.1 * jax.random.normal(k1, (Cb, C, 3, 3), dtype=jnp.float32)
    b1 = 0.1 * jax.random.normal(kb1, (Cb,), dtype=jnp.float32)
    w2 = 0.1 * jax.random.normal(k2, (Cb, Cb, 1, 1), dtype=jnp.float32)
    b2 = 0.1 * jax.random.normal(kb2, (Cb,), dtype=jnp.float32)

    out = jax.block_until_ready(resblock_forward(x, w1, b1, w2, b2))
    ref = jax.block_until_ready(resblock_ref(x, w1, b1, w2, b2))

    assert out.shape == (N, C, H, W)
    # bf16 MXU inputs with f32 accumulation -> loosened tolerance (review note).
    assert np.allclose(np.asarray(out), np.asarray(ref), atol=2e-2), "mismatch vs reference"

    print("KERNEL_OK")
</pallas_src>

<mosaic_0001>
module attributes {stable_mosaic.version = 11 : i64} {
  func.func @resblock_kernel(%arg0: i32, %arg1: memref<1x256x4xf32, #tpu.memory_space<vmem>>, %arg2: memref<128x128xbf16, #tpu.memory_space<vmem>>, %arg3: memref<1x128xf32, #tpu.memory_space<vmem>>, %arg4: memref<128x128xbf16, #tpu.memory_space<vmem>>, %arg5: memref<1x128xf32, #tpu.memory_space<vmem>>, %arg6: memref<1x256x128xf32, #tpu.memory_space<vmem>>, %arg7: memref<304x4xf32, #tpu.memory_space<vmem>>, %arg8: memref<256x128xf32, #tpu.memory_space<vmem>>) attributes {dimension_semantics = [#tpu.dimension_semantics<parallel>], iteration_bounds = array<i64: 2>, scalar_prefetch = 0 : i64, scratch_operands = 2 : i64, tpu.core_type = #tpu.core_type<tc>, window_params = [{transform_indices = @transform_0, window_bounds = array<i64: 1, 256, 4>}, {pipeline_mode = #tpu.pipeline_mode<synchronous>, transform_indices = @transform_1, window_bounds = array<i64: 128, 128>}, {pipeline_mode = #tpu.pipeline_mode<synchronous>, transform_indices = @transform_2, window_bounds = array<i64: 1, 128>}, {pipeline_mode = #tpu.pipeline_mode<synchronous>, transform_indices = @transform_3, window_bounds = array<i64: 128, 128>}, {pipeline_mode = #tpu.pipeline_mode<synchronous>, transform_indices = @transform_4, window_bounds = array<i64: 1, 128>}, {transform_indices = @transform_5, window_bounds = array<i64: 1, 256, 128>}]} {
    %cst = arith.constant 0.000000e+00 : f32
    %0 = vector.broadcast %cst : f32 to vector<24x4xf32>
    %c0 = arith.constant 0 : index
    %c0_0 = arith.constant 0 : index
    %1 = vector.load %arg7[%c0, %c0_0] : memref<304x4xf32, #tpu.memory_space<vmem>>, vector<24x4xf32>
    tpu.vector_store %arg7[%c0, %c0_0], %0 {strides = array<i32>} : memref<304x4xf32, #tpu.memory_space<vmem>>, vector<24x4xf32>,
    %cst_1 = arith.constant 0.000000e+00 : f32
    %2 = vector.broadcast %cst_1 : f32 to vector<24x4xf32>
    %c280 = arith.constant 280 : index
    %c0_2 = arith.constant 0 : index
    %3 = vector.load %arg7[%c280, %c0_2] : memref<304x4xf32, #tpu.memory_space<vmem>>, vector<24x4xf32>
    tpu.vector_store %arg7[%c280, %c0_2], %2 {strides = array<i32>} : memref<304x4xf32, #tpu.memory_space<vmem>>, vector<24x4xf32>,
    %c0_3 = arith.constant 0 : index
    %c0_4 = arith.constant 0 : index
    %c0_5 = arith.constant 0 : index
    %4 = vector.load %arg1[%c0_3, %c0_4, %c0_5] : memref<1x256x4xf32, #tpu.memory_space<vmem>>, vector<1x256x4xf32>
    %5 = vector.shape_cast %4 : vector<1x256x4xf32> to vector<256x4xf32>
    %cst_6 = arith.constant 0.000000e+00 : f32
    %6 = vector.broadcast %cst_6 : f32 to vector<256x4xf32>
    %7 = arith.maximumf %5, %6 : vector<256x4xf32>
    %c24 = arith.constant 24 : index
    %c0_7 = arith.constant 0 : index
    %8 = vector.load %arg7[%c24, %c0_7] : memref<304x4xf32, #tpu.memory_space<vmem>>, vector<256x4xf32>
    tpu.vector_store %arg7[%c24, %c0_7], %7 {strides = array<i32>} : memref<304x4xf32, #tpu.memory_space<vmem>>, vector<256x4xf32>,
    %9 = tpu.iota {dimensions = array<i32: 0>} : vector<256x1xi32>
    %c16_i32 = arith.constant 16 : i32
    %c0_i32 = arith.constant 0 : i32
    %10 = arith.cmpi eq, %c16_i32, %c0_i32 : i32
    %c1_i32 = arith.constant 1 : i32
    %11 = arith.select %10, %c1_i32, %c16_i32 : i32
    %12 = vector.broadcast %11 : i32 to vector<256x1xi32>
    %13 = arith.remsi %9, %12 : vector<256x1xi32>
    %c0_i32_8 = arith.constant 0 : i32
    %14 = vector.broadcast %c0_i32_8 : i32 to vector<256x1xi32>
    %15 = arith.cmpi ne, %13, %14 : vector<256x1xi32>
    %c0_i32_9 = arith.constant 0 : i32
    %16 = vector.broadcast %c0_i32_9 : i32 to vector<256x1xi32>
    %17 = arith.cmpi slt, %13, %16 : vector<256x1xi32>
    %c0_i32_10 = arith.constant 0 : i32
    %18 = arith.cmpi slt, %11, %c0_i32_10 : i32
    %19 = vector.broadcast %18 : i1 to vector<256x1xi1>
    %20 = vector.broadcast %19 : vector<256x1xi1> to vector<256x1xi1>
    %21 = arith.xori %17, %20 : vector<256x1xi1>
    %22 = arith.andi %21, %15 : vector<256x1xi1>
    %23 = vector.broadcast %11 : i32 to vector<256x1xi32>
    %24 = arith.addi %13, %23 : vector<256x1xi32>
    %25 = arith.select %22, %24, %13 : vector<256x1xi1>, vector<256x1xi32>
    %cst_11 = arith.constant 0.000000e+00 : f32
    %26 = vector.broadcast %cst_11 : f32 to vector<256x128xf32>
    %c0_12 = arith.constant 0 : index
    %c0_13 = arith.constant 0 : index
    %27 = vector.load %arg8[%c0_12, %c0_13] : memref<256x128xf32, #tpu.memory_space<vmem>>, vector<256x128xf32>
    tpu.vector_store %arg8[%c0_12, %c0_13], %26 {strides = array<i32>} : memref<256x128xf32, #tpu.memory_space<vmem>>, vector<256x128xf32>,
    %c7 = arith.constant 7 : index
    %c0_14 = arith.constant 0 : index
    %28 = vector.load %arg7[%c7, %c0_14] : memref<304x4xf32, #tpu.memory_space<vmem>>, vector<256x4xf32>
    %c0_i32_15 = arith.constant 0 : i32
    %29 = vector.broadcast %c0_i32_15 : i32 to vector<256x1xi32>
    %30 = arith.cmpi sgt, %25, %29 : vector<256x1xi32>
    %cst_16 = arith.constant 0.000000e+00 : f32
    %31 = vector.shape_cast %30 : vector<256x1xi1> to vector<256x1xi1>
    %32 = vector.broadcast %31 : vector<256x1xi1> to vector<256x4xi1>
    %33 = vector.broadcast %cst_16 : f32 to vector<256x4xf32>
    %34 = arith.select %32, %28, %33 : vector<256x4xi1>, vector<256x4xf32>
    %c0_17 = arith.constant 0 : index
    %c0_18 = arith.constant 0 : index
    %35 = vector.load %arg8[%c0_17, %c0_18] : memref<256x128xf32, #tpu.memory_space<vmem>>, vector<256x4xf32>
    tpu.vector_store %arg8[%c0_17, %c0_18], %34 {strides = array<i32>} : memref<256x128xf32, #tpu.memory_space<vmem>>, vector<256x4xf32>,
    %c8 = arith.constant 8 : index
    %c0_19 = arith.constant 0 : index
    %36 = vector.load %arg7[%c8, %c0_19] : memref<304x4xf32, #tpu.memory_space<vmem>>, vector<256x4xf32>
    %c0_20 = arith.constant 0 : index
    %c4 = arith.constant 4 : index
    %37 = vector.load %arg8[%c0_20, %c4] : memref<256x128xf32, #tpu.memory_space<vmem>>, vector<256x4xf32>
    tpu.vector_store %arg8[%c0_20, %c4], %36 {strides = array<i32>} : memref<256x128xf32, #tpu.memory_space<vmem>>, vector<256x4xf32>,
    %c9 = arith.constant 9 : index
    %c0_21 = arith.constant 0 : index
    %38 = vector.load %arg7[%c9, %c0_21] : memref<304x4xf32, #tpu.memory_space<vmem>>, vector<256x4xf32>
    %c15_i32 = arith.constant 15 : i32
    %39 = vector.broadcast %c15_i32 : i32 to vector<256x1xi32>
    %40 = arith.cmpi slt, %25, %39 : vector<256x1xi32>
    %cst_22 = arith.constant 0.000000e+00 : f32
    %41 = vector.shape_cast %40 : vector<256x1xi1> to vector<256x1xi1>
    %42 = vector.broadcast %41 : vector<256x1xi1> to vector<256x4xi1>
    %43 = vector.broadcast %cst_22 : f32 to vector<256x4xf32>
    %44 = arith.select %42, %38, %43 : vector<256x4xi1>, vector<256x4xf32>
    %c0_23 = arith.constant 0 : index
    %c8_24 = arith.constant 8 : index
    %45 = vector.load %arg8[%c0_23, %c8_24] : memref<256x128xf32, #tpu.memory_space<vmem>>, vector<256x4xf32>
    tpu.vector_store %arg8[%c0_23, %c8_24], %44 {strides = array<i32>} : memref<256x128xf32, #tpu.memory_space<vmem>>, vector<256x4xf32>,
    %c23 = arith.constant 23 : index
    %c0_25 = arith.constant 0 : index
    %46 = vector.load %arg7[%c23, %c0_25] : memref<304x4xf32, #tpu.memory_space<vmem>>, vector<256x4xf32>
    %c0_i32_26 = arith.constant 0 : i32
    %47 = vector.broadcast %c0_i32_26 : i32 to vector<256x1xi32>
    %48 = arith.cmpi sgt, %25, %47 : vector<256x1xi32>
    %cst_27 = arith.constant 0.000000e+00 : f32
    %49 = vector.shape_cast %48 : vector<256x1xi1> to vector<256x1xi1>
    %50 = vector.broadcast %49 : vector<256x1xi1> to vector<256x4xi1>
    %51 = vector.broadcast %cst_27 : f32 to vector<256x4xf32>
    %52 = arith.select %50, %46, %51 : vector<256x4xi1>, vector<256x4xf32>
    %c0_28 = arith.constant 0 : index
    %c12 = arith.constant 12 : index
    %53 = vector.load %arg8[%c0_28, %c12] : memref<256x128xf32, #tpu.memory_space<vmem>>, vector<256x4xf32>
    tpu.vector_store %arg8[%c0_28, %c12], %52 {strides = array<i32>} : memref<256x128xf32, #tpu.memory_space<vmem>>, vector<256x4xf32>,
    %c24_29 = arith.constant 24 : index
    %c0_30 = arith.constant 0 : index
    %54 = vector.load %arg7[%c24_29, %c0_30] : memref<304x4xf32, #tpu.memory_space<vmem>>, vector<256x4xf32>
    %c0_31 = arith.constant 0 : index
    %c16 = arith.constant 16 : index
    %55 = vector.load %arg8[%c0_31, %c16] : memref<256x128xf32, #tpu.memory_space<vmem>>, vector<256x4xf32>
    tpu.vector_store %arg8[%c0_31, %c16], %54 {strides = array<i32>} : memref<256x128xf32, #tpu.memory_space<vmem>>, vector<256x4xf32>,
    %c25 = arith.constant 25 : index
    %c0_32 = arith.constant 0 : index
    %56 = vector.load %arg7[%c25, %c0_32] : memref<304x4xf32, #tpu.memory_space<vmem>>, vector<256x4xf32>
    %c15_i32_33 = arith.constant 15 : i32
    %57 = vector.broadcast %c15_i32_33 : i32 to vector<256x1xi32>
    %58 = arith.cmpi slt, %25, %57 : vector<256x1xi32>
    %cst_34 = arith.constant 0.000000e+00 : f32
    %59 = vector.shape_cast %58 : vector<256x1xi1> to vector<256x1xi1>
    %60 = vector.broadcast %59 : vector<256x1xi1> to vector<256x4xi1>
    %61 = vector.broadcast %cst_34 : f32 to vector<256x4xf32>
    %62 = arith.select %60, %56, %61 : vector<256x4xi1>, vector<256x4xf32>
    %c0_35 = arith.constant 0 : index
    %c20 = arith.constant 20 : index
    %63 = vector.load %arg8[%c0_35, %c20] : memref<256x128xf32, #tpu.memory_space<vmem>>, vector<256x4xf32>
    tpu.vector_store %arg8[%c0_35, %c20], %62 {strides = array<i32>} : memref<256x128xf32, #tpu.memory_space<vmem>>, vector<256x4xf32>,
    %c39 = arith.constant 39 : index
    %c0_36 = arith.constant 0 : index
    %64 = vector.load %arg7[%c39, %c0_36] : memref<304x4xf32, #tpu.memory_space<vmem>>, vector<256x4xf32>
    %c0_i32_37 = arith.constant 0 : i32
    %65 = vector.broadcast %c0_i32_37 : i32 to vector<256x1xi32>
    %66 = arith.cmpi sgt, %25, %65 : vector<256x1xi32>
    %cst_38 = arith.constant 0.000000e+00 : f32
    %67 = vector.shape_cast %66 : vector<256x1xi1> to vector<256x1xi1>
    %68 = vector.broadcast %67 : vector<256x1xi1> to vector<256x4xi1>
    %69 = vector.broadcast %cst_38 : f32 to vector<256x4xf32>
    %70 = arith.select %68, %64, %69 : vector<256x4xi1>, vector<256x4xf32>
    %c0_39 = arith.constant 0 : index
    %c24_40 = arith.constant 24 : index
    %71 = vector.load %arg8[%c0_39, %c24_40] : memref<256x128xf32, #tpu.memory_space<vmem>>, vector<256x4xf32>
    tpu.vector_store %arg8[%c0_39, %c24_40], %70 {strides = array<i32>} : memref<256x128xf32, #tpu.memory_space<vmem>>, vector<256x4xf32>,
    %c40 = arith.constant 40 : index
    %c0_41 = arith.constant 0 : index
    %72 = vector.load %arg7[%c40, %c0_41] : memref<304x4xf32, #tpu.memory_space<vmem>>, vector<256x4xf32>
    %c0_42 = arith.constant 0 : index
    %c28 = arith.constant 28 : index
    %73 = vector.load %arg8[%c0_42, %c28] : memref<256x128xf32, #tpu.memory_space<vmem>>, vector<256x4xf32>
    tpu.vector_store %arg8[%c0_42, %c28], %72 {strides = array<i32>} : memref<256x128xf32, #tpu.memory_space<vmem>>, vector<256x4xf32>,
    %c41 = arith.constant 41 : index
    %c0_43 = arith.constant 0 : index
    %74 = vector.load %arg7[%c41, %c0_43] : memref<304x4xf32, #tpu.memory_space<vmem>>, vector<256x4xf32>
    %c15_i32_44 = arith.constant 15 : i32
    %75 = vector.broadcast %c15_i32_44 : i32 to vector<256x1xi32>
    %76 = arith.cmpi slt, %25, %75 : vector<256x1xi32>
    %cst_45 = arith.constant 0.000000e+00 : f32
    %77 = vector.shape_cast %76 : vector<256x1xi1> to vector<256x1xi1>
    %78 = vector.broadcast %77 : vector<256x1xi1> to vector<256x4xi1>
    %79 = vector.broadcast %cst_45 : f32 to vector<256x4xf32>
    %80 = arith.select %78, %74, %79 : vector<256x4xi1>, vector<256x4xf32>
    %c0_46 = arith.constant 0 : index
    %c32 = arith.constant 32 : index
    %81 = vector.load %arg8[%c0_46, %c32] : memref<256x128xf32, #tpu.memory_space<vmem>>, vector<256x4xf32>
    tpu.vector_store %arg8[%c0_46, %c32], %80 {strides = array<i32>} : memref<256x128xf32, #tpu.memory_space<vmem>>, vector<256x4xf32>,
    %c0_47 = arith.constant 0 : index
    %c0_48 = arith.constant 0 : index
    %82 = vector.load %arg8[%c0_47, %c0_48] : memref<256x128xf32, #tpu.memory_space<vmem>>, vector<256x128xf32>
    %83 = arith.truncf %82 : vector<256x128xf32> to vector<256x128xbf16>
    %c0_49 = arith.constant 0 : index
    %c0_50 = arith.constant 0 : index
    %84 = vector.load %arg2[%c0_49, %c0_50] : memref<128x128xbf16, #tpu.memory_space<vmem>>, vector<128x128xbf16>
    %cst_51 = arith.constant dense<0.000000e+00> : vector<256x128xf32>
    %85 = tpu.matmul %83, %84, %cst_51 {dimension_numbers = #tpu.dot_dimension_numbers<[1], [0], [0], [1], [0, 0, 1, 1], [], []>} : vector<256x128xbf16>, vector<128x128xbf16>, vector<256x128xf32> -> vector<256x128xf32>
    %c0_52 = arith.constant 0 : index
    %c0_53 = arith.constant 0 : index
    %86 = vector.load %arg3[%c0_52, %c0_53] : memref<1x128xf32, #tpu.memory_space<vmem>>, vector<1x128xf32>
    %87 = vector.broadcast %86 : vector<1x128xf32> to vector<256x128xf32>
    %88 = arith.addf %85, %87 : vector<256x128xf32>
    %cst_54 = arith.constant 0.000000e+00 : f32
    %89 = vector.broadcast %cst_54 : f32 to vector<256x128xf32>
    %90 = arith.maximumf %88, %89 : vector<256x128xf32>
    %91 = arith.truncf %90 : vector<256x128xf32> to vector<256x128xbf16>
    %cst_55 = arith.constant 0.000000e+00 : f32
    %92 = vector.broadcast %cst_55 : f32 to vector<256x128xf32>
    %c0_56 = arith.constant 0 : index
    %c0_57 = arith.constant 0 : index
    %93 = vector.load %arg8[%c0_56, %c0_57] : memref<256x128xf32, #tpu.memory_space<vmem>>, vector<256x128xf32>
    tpu.vector_store %arg8[%c0_56, %c0_57], %92 {strides = array<i32>} : memref<256x128xf32, #tpu.memory_space<vmem>>, vector<256x128xf32>,
    %c0_58 = arith.constant 0 : index
    %c0_59 = arith.constant 0 : index
    %c0_60 = arith.constant 0 : index
    %94 = vector.load %arg1[%c0_58, %c0_59, %c0_60] : memref<1x256x4xf32, #tpu.memory_space<vmem>>, vector<1x256x4xf32>
    %95 = vector.shape_cast %94 : vector<1x256x4xf32> to vector<256x4xf32>
    %c0_61 = arith.constant 0 : index
    %c0_62 = arith.constant 0 : index
    %96 = vector.load %arg8[%c0_61, %c0_62] : memref<256x128xf32, #tpu.memory_space<vmem>>, vector<256x4xf32>
    tpu.vector_store %arg8[%c0_61, %c0_62], %95 {strides = array<i32>} : memref<256x128xf32, #tpu.memory_space<vmem>>, vector<256x4xf32>,
    %c0_63 = arith.constant 0 : index
    %c0_64 = arith.constant 0 : index
    %97 = vector.load %arg4[%c0_63, %c0_64] : memref<128x128xbf16, #tpu.memory_space<vmem>>, vector<128x128xbf16>
    %cst_65 = arith.constant dense<0.000000e+00> : vector<256x128xf32>
    %98 = tpu.matmul %91, %97, %cst_65 {dimension_numbers = #tpu.dot_dimension_numbers<[1], [0], [0], [1], [0, 0, 1, 1], [], []>} : vector<256x128xbf16>, vector<128x128xbf16>, vector<256x128xf32> -> vector<256x128xf32>
    %c0_66 = arith.constant 0 : index
    %c0_67 = arith.constant 0 : index
    %99 = vector.load %arg5[%c0_66, %c0_67] : memref<1x128xf32, #tpu.memory_space<vmem>>, vector<1x128xf32>
    %100 = vector.broadcast %99 : vector<1x128xf32> to vector<256x128xf32>
    %101 = arith.addf %98, %100 : vector<256x128xf32>
    %c0_68 = arith.constant 0 : index
    %c0_69 = arith.constant 0 : index
    %102 = vector.load %arg8[%c0_68, %c0_69] : memref<256x128xf32, #tpu.memory_space<vmem>>, vector<256x128xf32>
    %103 = arith.addf %101, %102 : vector<256x128xf32>
    %cst_70 = arith.constant 0.000000e+00 : f32
    %104 = vector.broadcast %cst_70 : f32 to vector<256x128xf32>
    %105 = arith.maximumf %103, %104 : vector<256x128xf32>
    %c0_71 = arith.constant 0 : index
    %c0_72 = arith.constant 0 : index
    %c0_73 = arith.constant 0 : index
    %106 = vector.load %arg6[%c0_71, %c0_72, %c0_73] : memref<1x256x128xf32, #tpu.memory_space<vmem>>, vector<1x256x128xf32>
    %107 = vector.shape_cast %106 : vector<1x256x128xf32> to vector<256x128xf32>
    %108 = vector.shape_cast %105 : vector<256x128xf32> to vector<1x256x128xf32>
    tpu.vector_store %arg6[%c0_71, %c0_72, %c0_73], %108 {strides = array<i32>} : memref<1x256x128xf32, #tpu.memory_space<vmem>>, vector<1x256x128xf32>,
    return
  }
  func.func @transform_0(%arg0: i32) -> (i32, i32, i32) {
    %c0_i32 = arith.constant 0 : i32
    %c0_i32_0 = arith.constant 0 : i32
    %c0_i32_1 = arith.constant 0 : i32
    return %arg0, %c0_i32, %c0_i32_0 : i32, i32, i32
  }
  func.func @transform_1(%arg0: i32) -> (i32, i32) {
    %c0_i32 = arith.constant 0 : i32
    %c0_i32_0 = arith.constant 0 : i32
    %c0_i32_1 = arith.constant 0 : i32
    return %c0_i32, %c0_i32_0 : i32, i32
  }
  func.func @transform_2(%arg0: i32) -> (i32, i32) {
    %c0_i32 = arith.constant 0 : i32
    %c0_i32_0 = arith.constant 0 : i32
    %c0_i32_1 = arith.constant 0 : i32
    return %c0_i32, %c0_i32_0 : i32, i32
  }
  func.func @transform_3(%arg0: i32) -> (i32, i32) {
    %c0_i32 = arith.constant 0 : i32
    %c0_i32_0 = arith.constant 0 : i32
    %c0_i32_1 = arith.constant 0 : i32
    return %c0_i32, %c0_i32_0 : i32, i32
  }
  func.func @transform_4(%arg0: i32) -> (i32, i32) {
    %c0_i32 = arith.constant 0 : i32
    %c0_i32_0 = arith.constant 0 : i32
    %c0_i32_1 = arith.constant 0 : i32
    return %c0_i32, %c0_i32_0 : i32, i32
  }
  func.func @transform_5(%arg0: i32) -> (i32, i32, i32) {
    %c0_i32 = arith.constant 0 : i32
    %c0_i32_0 = arith.constant 0 : i32
    %c0_i32_1 = arith.constant 0 : i32
    return %arg0, %c0_i32, %c0_i32_0 : i32, i32, i32
  }
}

</mosaic_0001>

<bundles_post_ra>
// kernel: tpu_custom_call.1
= control target key start
LH: loop header
LB: loop body
LE: loop exit
PB: predicated region body
PF: predicated region fallthrough
CT: control target
= control target key end

     0   :  { %10 = vsyncpa [#allocation5], 0  ;;  %s5422_s0 = inlined_call_operand.vmem [shape: f32[2,256,4], index: 0, kind: input, shape index: {}]   ;;  %s5423_s1 = inlined_call_operand.vmem [shape: bf16[128,128], index: 1, kind: input, shape index: {}]   ;;  %s5424_s2 = inlined_call_operand.vmem [shape: f32[1,128], index: 2, kind: input, shape index: {}]   ;;  %s5425_s3 = inlined_call_operand.vmem [shape: bf16[128,128], index: 3, kind: input, shape index: {}]   ;;  %s5426_s4 = inlined_call_operand.vmem [shape: f32[1,128], index: 4, kind: input, shape index: {}]   ;;  %s5427_s5 = inlined_call_operand.hbm [shape: f32[2,256,128], index: 5, kind: output, shape index: {}]  }
   0x1   :  { %12 = vsyncpa [#allocation5 + $0x1], 0  ;;  %s3745_s18 = smov 0   ;;  %s3747_s19 = smov 0  }
   0x2   :  { %s3749_s20 = smov 0   ;;  %s3751_s21 = smov 0  }
   0x3 LB: > { %s3766_s22 = sadd.s32 4294967295, %s3703_s21   ;;  %s3479_s23 = sadd.s32 4294967294, %s3703_s21   ;;  %s3703_s21 = sphi %s3751_s21, %s5687_s21   ;;  %s3699_s20 = sphi %s3749_s20, %s5686_s20   ;;  %s3695_s19 = sphi %s3747_s19, %s5685_s19   ;;  %s3691_s18 = sphi %s3745_s18, %s5684_s18  }
   0x4   : > { %s3770_s24 = sadd.s32 1, %s3703_s21   ;;  %s135_s25 = sadd.s32 1, %s3699_s20 }
   0x5   : > { %s132_s26 = ssub.s32 %s3703_s21, %s3770_s24  ;;  %p145_p0 = scmp.ne.s32.totalorder %s3699_s20, %s3695_s19 }
   0x6   : > { %p133_p1 = scmp.eq.s32.totalorder %s132_s26, 0  ;;  %p146_p2 = scmp.eq.s32.totalorder %s3766_s22, 1 }
   0x7   : > { %p151_p3 = scmp.ne.s32.totalorder %s3695_s19, %s3691_s18  ;;  %p152_p4 = scmp.eq.s32.totalorder %s3479_s23, 1 }
   0x8   : > { %s3781_s27 = scalar_select %p133_p1, %s3699_s20, %s135_s25  }
   0x9   : > { %p3783_p5 = por %p146_p2, %p145_p0  ;;  %p3787_p6 = por %p152_p4, %p151_p3 }
   0xa   : > { %p3482_p7 = scmp.ge.s32.totalorder %s3703_s21, 1  ;;  %p190_p8 = scmp.lt.s32.totalorder %s3703_s21, 3 }
   0xc   : > { %p191_p9 = pnand %p3482_p7, %p190_p8 }
   0xe   : > { %194 = sbr.rel (%p191_p9) target bundleno = 1148 (0x47c), region = 40 }
  0x13   : > { %vm5428_vm0 = vcmask 31744   ;;  %v5456_v0 = vmov 0.0   ;;  %s3706_s30 = smov 4   ;;  %p218_p10 = scmp.lt.s32.totalorder %s3766_s22, 1  ;;  %vm5435_vm3 = vcmask 64544  }
  0x14   : > { %225 = vst.msk [vmem:[#allocation2 + $0x8] sm:$0xff] %vm5428_vm0, %v5456_v0  ;;  %s3707_s11 = smov 8   ;;  %s3708_s12 = smov 12  }
  0x15   : > { %224 = vst.msk [vmem:[#allocation2] sm:$0xff] %vm5428_vm0, %v5456_v0  ;;  %s219_s6 = scalar_select %p218_p10, %s3766_s22, 1 }
  0x16   : > { %226 = vst.msk [vmem:[#allocation2 + $0x10] sm:$0xff] %vm5428_vm0, %v5456_v0  ;;  %s3709_s13 = smov 16   ;;  %s3710_s14 = smov 24  }
  0x17   : > { %227 = vst.msk [vmem:[#allocation2 + $0x118] sm:$0xff] %vm5428_vm0, %v5456_v0  ;;  %s3555_s7 = sshll.u32 %s219_s6, 8  ;;  %s3711_s15 = smov 20  }
  0x18   : > { %228 = vst.msk [vmem:[#allocation2 + $0x120] sm:$0xff] %vm5428_vm0, %v5456_v0  ;;  %s3835_s10 = scalar_lea.vmem %s5422_s0, %s3555_s7  ;;  %s3712_s16 = smov 28  }
  0x19   : > { %229 = vst.msk [vmem:[#allocation2 + $0x128] sm:$0xff] %vm5428_vm0, %v5456_v0  ;;  %v230_v3 = vld [vmem:[%s3835_s10] sm:$0xff]  ;;  %v231_v5 = vld [vmem:[%s3835_s10 + $0x8] sm:$0xff]  ;;  %v237_v7 = vld [vmem:[%s3835_s10 + $0x38] sm:$0xff]  ;;  %s3713_s17 = smov 32  }
  0x1a   : > { %743 = vst [vmem:[#allocation3] sm:$0xff] %v5456_v0  ;;  %v234_v4 = vld [vmem:[%s3835_s10 + $0x20] sm:$0xff]  ;;  %v262_v6 = vmax.f32 %v230_v3, 0.0  ;;  %v235_v9 = vld [vmem:[%s3835_s10 + $0x28] sm:$0xff]  ;;  %v263_v10 = vmax.f32 %v231_v5, 0.0  ;;  %v240_v11 = vld [vmem:[%s3835_s10 + $0x50] sm:$0xff] }
  0x1b   : > { %v967_v1 = vld [vmem:[#allocation2 + $0x8] sm:$0xff]  ;;  %744 = vst [vmem:[#allocation3 + $0x8] sm:$0xff] %v5456_v0  ;;  %v266_v8 = vmax.f32 %v234_v4, 0.0  ;;  %v269_v12 = vmax.f32 %v237_v7, 0.0  ;;  %v232_v13 = vld [vmem:[%s3835_s10 + $0x10] sm:$0xff]  ;;  %v267_v14 = vmax.f32 %v235_v9, 0.0 }
  0x1c   : > { %1031 = vrot.lane.b32.xlu0 %v967_v1, %s3706_s30  ;;  %745 = vst [vmem:[#allocation3 + $0x10] sm:$0xff] %v5456_v0  ;;  %v238_v15 = vld [vmem:[%s3835_s10 + $0x40] sm:$0xff]  ;;  %v272_v16 = vmax.f32 %v240_v11, 0.0  ;;  %v243_v17 = vld [vmem:[%s3835_s10 + $0x68] sm:$0xff]  ;;  %v264_v18 = vmax.f32 %v232_v13, 0.0  ;;  %v233_v19 = vld [vmem:[%s3835_s10 + $0x18] sm:$0xff] }
  0x1d   : > { %746 = vst [vmem:[#allocation3 + $0x18] sm:$0xff] %v5456_v0  ;;  %v968_v2 = vld [vmem:[#allocation2 + $0x10] sm:$0xff]  ;;  %v270_v20 = vmax.f32 %v238_v15, 0.0  ;;  %v241_v21 = vld [vmem:[%s3835_s10 + $0x58] sm:$0xff]  ;;  %v275_v22 = vmax.f32 %v243_v17, 0.0  ;;  %v265_v23 = vmax.f32 %v233_v19, 0.0  ;;  %v326_v19 = vlaneseq }
  0x1e   : > { %747 = vst [vmem:[#allocation3 + $0x20] sm:$0xff] %v5456_v0  ;;  %v246_v24 = vld [vmem:[%s3835_s10 + $0x80] sm:$0xff]  ;;  %v236_v25 = vld [vmem:[%s3835_s10 + $0x30] sm:$0xff]  ;;  %v273_v26 = vmax.f32 %v241_v21, 0.0  ;;  %v249_v35 = vld [vmem:[%s3835_s10 + $0x98] sm:$0xff] }
  0x1f   : > { %748 = vst [vmem:[#allocation3 + $0x28] sm:$0xff] %v5456_v0  ;;  %v244_v27 = vld [vmem:[%s3835_s10 + $0x70] sm:$0xff]  ;;  %v278_v29 = vmax.f32 %v246_v24, 0.0  ;;  %v268_v31 = vmax.f32 %v236_v25, 0.0  ;;  %v239_v36 = vld [vmem:[%s3835_s10 + $0x48] sm:$0xff]  ;;  %v281_v38 = vmax.f32 %v249_v35, 0.0 }
  0x20   : > { %749 = vst [vmem:[#allocation3 + $0x30] sm:$0xff] %v5456_v0  ;;  %v276_v32 = vmax.f32 %v244_v27, 0.0  ;;  %v271_v39 = vmax.f32 %v239_v36, 0.0  ;;  %v247_v40 = vld [vmem:[%s3835_s10 + $0x88] sm:$0xff]  ;;  %v252_v44 = vld [vmem:[%s3835_s10 + $0xb0] sm:$0xff]  ;;  %v242_v45 = vld [vmem:[%s3835_s10 + $0x60] sm:$0xff] }
  0x21   : > { %750 = vst [vmem:[#allocation3 + $0x38] sm:$0xff] %v5456_v0  ;;  %v279_v41 = vmax.f32 %v247_v40, 0.0  ;;  %v250_v46 = vld [vmem:[%s3835_s10 + $0xa0] sm:$0xff]  ;;  %v284_v48 = vmax.f32 %v252_v44, 0.0  ;;  %v274_v49 = vmax.f32 %v242_v45, 0.0  ;;  %v255_v53 = vld [vmem:[%s3835_s10 + $0xc8] sm:$0xff] }
  0x22   : > { %751 = vst [vmem:[#allocation3 + $0x40] sm:$0xff] %v5456_v0  ;;  %v282_v50 = vmax.f32 %v250_v46, 0.0  ;;  %v245_v54 = vld [vmem:[%s3835_s10 + $0x78] sm:$0xff]  ;;  %v287_v57 = vmax.f32 %v255_v53, 0.0  ;;  %v258_v62 = vld [vmem:[%s3835_s10 + $0xe0] sm:$0xff]  ;;  %v248_v63 = vld [vmem:[%s3835_s10 + $0x90] sm:$0xff] }
  0x23   : > { %752 = vst [vmem:[#allocation3 + $0x48] sm:$0xff] %v5456_v0  ;;  %v253_v55 = vld [vmem:[%s3835_s10 + $0xb8] sm:$0xff]  ;;  %v277_v58 = vmax.f32 %v245_v54, 0.0  ;;  %v256_v1 = vld [vmem:[%s3835_s10 + $0xd0] sm:$0xff]  ;;  %v290_v3 = vmax.f32 %v258_v62, 0.0  ;;  %v280_v4 = vmax.f32 %v248_v63, 0.0 }
  0x24   : > { %753 = vst [vmem:[#allocation3 + $0x50] sm:$0xff] %v5456_v0  ;;  %1033 = vrot.lane.b32.xlu0 %v968_v2, %s3706_s30  ;;  %v285_v59 = vmax.f32 %v253_v55, 0.0  ;;  %v288_v5 = vmax.f32 %v256_v1, 0.0  ;;  %v259_v9 = vld [vmem:[%s3835_s10 + $0xe8] sm:$0xff]  ;;  %v254_v15 = vld [vmem:[%s3835_s10 + $0xc0] sm:$0xff]  ;;  %v257_v21 = vld [vmem:[%s3835_s10 + $0xd8] sm:$0xff] }
  0x25   : > { %754 = vst [vmem:[#allocation3 + $0x58] sm:$0xff] %v5456_v0  ;;  %v286_v17 = vmax.f32 %v254_v15, 0.0  ;;  %v3926_v24 = vshrl.u32 %v326_v19, 7  ;;  %v775_v36 = vld [vmem:[#allocation2 + $0x7] sm:$0xff] }
  0x26   : > { %755 = vst [vmem:[#allocation3 + $0x60] sm:$0xff] %v5456_v0 }
  0x27   : > { %756 = vst [vmem:[#allocation3 + $0x68] sm:$0xff] %v5456_v0  ;;  %v363_v35 = vand.u32 15, %v3926_v24  ;;  %v334_v40 = vadd.s32 56, %v3926_v24  ;;  %v331_v44 = vadd.s32 32, %v3926_v24  ;;  %v333_v1 = vadd.s32 48, %v3926_v24 }
  0x28   : > { %757 = vst [vmem:[#allocation3 + $0x70] sm:$0xff] %v5456_v0  ;;  %v340_v15 = vadd.s32 104, %v3926_v24 }
  0x29   : > { %758 = vst [vmem:[#allocation3 + $0x78] sm:$0xff] %v5456_v0  ;;  %vm3945_vm2 = vcmp.gt.s32.totalorder %v363_v35, 0  ;;  %v337_v35 = vadd.s32 80, %v3926_v24 }
  0x2a   : > { %759 = vst [vmem:[#allocation3 + $0x80] sm:$0xff] %v5456_v0  ;;  %v454_v19 = vand.u32 15, %v340_v15  ;;  %v5538_v15 = vmov 0 }
  0x2b   : > { %760 = vst [vmem:[#allocation3 + $0x88] sm:$0xff] %v5456_v0 }
  0x2c   : > { %761 = vst [vmem:[#allocation3 + $0x90] sm:$0xff] %v5456_v0  ;;  %vm4049_vm11 = vcmp.lt.s32.totalorder %v454_v19, 15 }
  0x2d   : > { %762 = vst [vmem:[#allocation3 + $0x98] sm:$0xff] %v5456_v0 }
  0x2e   : > { %763 = vst [vmem:[#allocation3 + $0xa0] sm:$0xff] %v5456_v0 }
  0x2f   : > { %764 = vst [vmem:[#allocation3 + $0xa8] sm:$0xff] %v5456_v0 }
  0x30   : > { %765 = vst [vmem:[#allocation3 + $0xb0] sm:$0xff] %v5456_v0 }
  0x31   : > { %766 = vst [vmem:[#allocation3 + $0xb8] sm:$0xff] %v5456_v0 }
  0x32   : > { %767 = vst [vmem:[#allocation3 + $0xc0] sm:$0xff] %v5456_v0 }
  0x33   : > { %768 = vst [vmem:[#allocation3 + $0xc8] sm:$0xff] %v5456_v0 }
  0x34   : > { %769 = vst [vmem:[#allocation3 + $0xd0] sm:$0xff] %v5456_v0 }
  0x35   : > { %770 = vst [vmem:[#allocation3 + $0xd8] sm:$0xff] %v5456_v0 }
  0x36   : > { %771 = vst [vmem:[#allocation3 + $0xe0] sm:$0xff] %v5456_v0 }
  0x37   : > { %772 = vst [vmem:[#allocation3 + $0xe8] sm:$0xff] %v5456_v0 }
  0x38   : > { %773 = vst [vmem:[#allocation3 + $0xf0] sm:$0xff] %v5456_v0 }
  0x39   : > { %774 = vst [vmem:[#allocation3 + $0xf8] sm:$0xff] %v5456_v0 }
  0x3a   : > { %294 = vst.msk [vmem:[#allocation2 + $0x18] sm:$0xff] %vm5428_vm0, %v262_v6 }
  0x3b   : > { %298 = vst.msk [vmem:[#allocation2 + $0x38] sm:$0xff] %vm5428_vm0, %v266_v8  ;;  %v251_v8 = vld [vmem:[%s3835_s10 + $0xa8] sm:$0xff] }
  0x3c   : > { %295 = vst.msk [vmem:[#allocation2 + $0x20] sm:$0xff] %vm5428_vm0, %v263_v10  ;;  %v283_v11 = vmax.f32 %v251_v8, 0.0 }
  0x3d   : > { %301 = vst.msk [vmem:[#allocation2 + $0x50] sm:$0xff] %vm5428_vm0, %v269_v12  ;;  %v291_v12 = vmax.f32 %v259_v9, 0.0 }
  0x3e   : > { %299 = vst.msk [vmem:[#allocation2 + $0x40] sm:$0xff] %vm5428_vm0, %v267_v14 }
  0x3f   : > { %304 = vst.msk [vmem:[#allocation2 + $0x68] sm:$0xff] %vm5428_vm0, %v272_v16 }
  0x40   : > { %296 = vst.msk [vmem:[#allocation2 + $0x28] sm:$0xff] %vm5428_vm0, %v264_v18 }
  0x41   : > { %v969_v28 = vld [vmem:[#allocation2 + $0x18] sm:$0xff]  ;;  %302 = vst.msk [vmem:[#allocation2 + $0x58] sm:$0xff] %vm5428_vm0, %v270_v20 }
  0x42   : > { %1035 = vrot.lane.b32.xlu1 %v969_v28, %s3706_s30  ;;  %v973_v30 = vld [vmem:[#allocation2 + $0x38] sm:$0xff]  ;;  %307 = vst.msk [vmem:[#allocation2 + $0x80] sm:$0xff] %vm5428_vm0, %v275_v22 }
  0x43   : > { %1043 = vrot.lane.b32.xlu0 %v973_v30, %s3706_s30  ;;  %297 = vst.msk [vmem:[#allocation2 + $0x30] sm:$0xff] %vm5428_vm0, %v265_v23  ;;  %v970_v33 = vld [vmem:[#allocation2 + $0x20] sm:$0xff]  ;;  %v289_v23 = vmax.f32 %v257_v21, 0.0  ;;  %v1161_v30 = vld [vmem:[#allocation2 + $0x11] sm:$0xff] }
  0x44   : > { %305 = vst.msk [vmem:[#allocation2 + $0x70] sm:$0xff] %vm5428_vm0, %v273_v26  ;;  %v976_v37 = vld [vmem:[#allocation2 + $0x50] sm:$0xff]  ;;  %v328_v26 = vadd.s32 8, %v3926_v24  ;;  %v1162_v63 = vld [vmem:[#allocation2 + $0x19] sm:$0xff] }
  0x45   : > { %310 = vst.msk [vmem:[#allocation2 + $0x98] sm:$0xff] %vm5428_vm0, %v278_v29  ;;  %v974_v43 = vld [vmem:[#allocation2 + $0x40] sm:$0xff]  ;;  %v3965_v53 = vld [vmem:[#allocation2 + $0x17] sm:$0xff] }
  0x46   : > { %300 = vst.msk [vmem:[#allocation2 + $0x48] sm:$0xff] %vm5428_vm0, %v268_v31  ;;  %v979_v47 = vld [vmem:[#allocation2 + $0x68] sm:$0xff]  ;;  %v370_v29 = vand.u32 15, %v328_v26  ;;  %v5504_v31 = vmov 0  ;;  %v3570_v26 = vld [vmem:[%s5425_s3 + $0x30] sm:$0xff] }
  0x47   : > { %v971_v34 = vld [vmem:[#allocation2 + $0x28] sm:$0xff]  ;;  %308 = vst.msk [vmem:[#allocation2 + $0x88] sm:$0xff] %vm5428_vm0, %v276_v32 }
  0x48   : > { %1039 = vrot.lane.b32.xlu2 %v971_v34, %s3706_s30  ;;  %313 = vst.msk [vmem:[#allocation2 + $0xb0] sm:$0xff] %vm5428_vm0, %v281_v38  ;;  %v977_v52 = vld [vmem:[#allocation2 + $0x58] sm:$0xff]  ;;  %vm3935_vm1 = vcmp.lt.s32.totalorder %v370_v29, 15  ;;  %v903_v38 = vsel %vm3945_vm2, %v775_v36, 0.0 }
  0x49   : > { %303 = vst.msk [vmem:[#allocation2 + $0x60] sm:$0xff] %vm5428_vm0, %v271_v39  ;;  %v982_v56 = vld [vmem:[#allocation2 + $0x80] sm:$0xff]  ;;  %v5505_v31 = vsel %vm3935_vm1, 4294967295, %v5504_v31  ;;  %v1289_v34 = vsel %vm3935_vm1, %v1161_v30, 0.0 }
  0x4a   : > { %1037 = vrot.lane.b32.xlu1 %v970_v33, %s3706_s30  ;;  %311 = vst.msk [vmem:[#allocation2 + $0xa0] sm:$0xff] %vm5428_vm0, %v279_v41  ;;  %v972_v42 = vld [vmem:[#allocation2 + $0x30] sm:$0xff] }
  0x4b   : > { %1049 = vrot.lane.b32.xlu0 %v976_v37, %s3706_s30  ;;  %316 = vst.msk [vmem:[#allocation2 + $0xc8] sm:$0xff] %vm5428_vm0, %v284_v48  ;;  %v980_v61 = vld [vmem:[#allocation2 + $0x70] sm:$0xff]  ;;  %v391_v48 = vand.u32 15, %v331_v44 }
  0x4c   : > { %306 = vst.msk [vmem:[#allocation2 + $0x78] sm:$0xff] %vm5428_vm0, %v274_v49  ;;  %v985_v2 = vld [vmem:[#allocation2 + $0x98] sm:$0xff]  ;;  %v1164_v45 = vld [vmem:[#allocation2 + $0x29] sm:$0xff]  ;;  %v330_v49 = vadd.s32 24, %v3926_v24 }
  0x4d   : > { %314 = vst.msk [vmem:[#allocation2 + $0xb8] sm:$0xff] %vm5428_vm0, %v282_v50  ;;  %v975_v51 = vld [vmem:[#allocation2 + $0x48] sm:$0xff]  ;;  %vm3969_vm5 = vcmp.gt.s32.totalorder %v391_v48, 0  ;;  %v4070_v48 = vld [vmem:[#allocation2 + $0x57] sm:$0xff] }
  0x4e   : > { %319 = vst.msk [vmem:[#allocation2 + $0xe0] sm:$0xff] %vm5428_vm0, %v287_v57  ;;  %v983_v7 = vld [vmem:[#allocation2 + $0x88] sm:$0xff] }
  0x4f   : > { %309 = vst.msk [vmem:[#allocation2 + $0x90] sm:$0xff] %vm5428_vm0, %v277_v58  ;;  %v988_v10 = vld [vmem:[#allocation2 + $0xb0] sm:$0xff]  ;;  %v1167_v58 = vld [vmem:[#allocation2 + $0x41] sm:$0xff] }
  0x50   : > { %1041 = vrot.lane.b32.xlu2 %v972_v42, %s3706_s30  ;;  %317 = vst.msk [vmem:[#allocation2 + $0xd0] sm:$0xff] %vm5428_vm0, %v285_v59  ;;  %v978_v60 = vld [vmem:[#allocation2 + $0x60] sm:$0xff]  ;;  %v329_v42 = vadd.s32 16, %v3926_v24  ;;  %v776_v50 = vld [vmem:[#allocation2 + $0xf] sm:$0xff]  ;;  %v5512_v59 = vmov 0 }
  0x51   : > { %322 = vst.msk [vmem:[#allocation2 + $0xf8] sm:$0xff] %vm5428_vm0, %v290_v3  ;;  %v986_v14 = vld [vmem:[#allocation2 + $0xa0] sm:$0xff]  ;;  %v4000_v8 = vld [vmem:[#allocation2 + $0x2f] sm:$0xff] }
  0x52   : > { %1045 = vrot.lane.b32.xlu1 %v974_v43, %s3706_s30  ;;  %312 = vst.msk [vmem:[#allocation2 + $0xa8] sm:$0xff] %vm5428_vm0, %v280_v4  ;;  %v991_v16 = vld [vmem:[#allocation2 + $0xc8] sm:$0xff]  ;;  %v377_v46 = vand.u32 15, %v329_v42  ;;  %v405_v4 = vand.u32 15, %v333_v1  ;;  %v1169_v42 = vld [vmem:[#allocation2 + $0x51] sm:$0xff] }
  0x53   : > { %1055 = vrot.lane.b32.xlu0 %v979_v47, %s3706_s30  ;;  %320 = vst.msk [vmem:[#allocation2 + $0xe8] sm:$0xff] %vm5428_vm0, %v288_v5  ;;  %v981_v6 = vld [vmem:[#allocation2 + $0x78] sm:$0xff]  ;;  %v412_v47 = vand.u32 15, %v334_v40  ;;  %v3992_v5 = vld [vmem:[#allocation2 + $0x21] sm:$0xff]  ;;  %v1168_v36 = vld [vmem:[#allocation2 + $0x49] sm:$0xff] }
  0x54   : > { %315 = vst.msk [vmem:[#allocation2 + $0xc0] sm:$0xff] %vm5428_vm0, %v283_v11  ;;  %v989_v20 = vld [vmem:[#allocation2 + $0xb8] sm:$0xff]  ;;  %vm3961_vm4 = vcmp.gt.s32.totalorder %v377_v46, 0  ;;  %vm4003_vm8 = vcmp.gt.s32.totalorder %v405_v4, 0  ;;  %v4066_v46 = vld [vmem:[#allocation2 + $0x67] sm:$0xff] }
  0x55   : > { %323 = vst.msk [vmem:[#allocation2 + $0x100] sm:$0xff] %vm5428_vm0, %v291_v12  ;;  %v994_v22 = vld [vmem:[#allocation2 + $0xe0] sm:$0xff]  ;;  %v905_v55 = vsel %vm3961_vm4, %v3965_v53, 0.0  ;;  %vm3981_vm6 = vcmp.lt.s32.totalorder %v412_v47, 15  ;;  %v1165_v11 = vld [vmem:[#allocation2 + $0x31] sm:$0xff]  ;;  %v5520_v12 = vmov 0 }
  0x56   : > { %v984_v13 = vld [vmem:[#allocation2 + $0x90] sm:$0xff]  ;;  %318 = vst.msk [vmem:[#allocation2 + $0xd8] sm:$0xff] %vm5428_vm0, %v286_v17  ;;  %v5513_v59 = vsel %vm3981_vm6, 4294967295, %v5512_v59  ;;  %v335_v17 = vadd.s32 64, %v3926_v24  ;;  %v4068_v47 = vld [vmem:[#allocation2 + $0x5f] sm:$0xff] }
  0x57   : > { %321 = vst.msk [vmem:[#allocation2 + $0xf0] sm:$0xff] %vm5428_vm0, %v289_v23  ;;  %v992_v27 = vld [vmem:[#allocation2 + $0xd0] sm:$0xff] }
  0x58   : > { %1047 = vrot.lane.b32.xlu2 %v975_v51, %s3706_s30  ;;  %v997_v28 = vld [vmem:[#allocation2 + $0xf8] sm:$0xff]  ;;  %935 = vst.msk [vmem:[#allocation3] sm:$0xff] %vm5428_vm0, %v903_v38  ;;  %v3959_v51 = vld [vmem:[#allocation2 + $0x27] sm:$0xff]  ;;  %v4031_v23 = vld [vmem:[#allocation2 + $0x4f] sm:$0xff]  ;;  %v339_v38 = vadd.s32 96, %v3926_v24 }
  0x59   : > { %v987_v18 = vld [vmem:[#allocation2 + $0xa8] sm:$0xff]  ;;  %936 = vst.msk [vmem:[#allocation3 + $0x8] sm:$0xff] %vm5428_vm0, %v776_v50  ;;  %v907_v57 = vsel %vm3969_vm5, %v3959_v51, 0.0  ;;  %v1173_v30 = vld [vmem:[#allocation2 + $0x71] sm:$0xff]  ;;  %v5533_v50 = vmov 0 }
  0x5a   : > { %1051 = vrot.lane.b32.xlu1 %v977_v52, %s3706_s30  ;;  %v995_v33 = vld [vmem:[#allocation2 + $0xe8] sm:$0xff]  ;;  %937 = vst.msk [vmem:[#allocation3 + $0x10] sm:$0xff] %vm5428_vm0, %v905_v55  ;;  %v3562_v52 = vld [vmem:[%s5423_s1 + $0x30] sm:$0xff] }
  0x5b   : > { %1061 = vrot.lane.b32.xlu0 %v982_v56, %s3706_s30  ;;  %v990_v25 = vld [vmem:[#allocation2 + $0xc0] sm:$0xff]  ;;  %v332_v56 = vadd.s32 40, %v3926_v24  ;;  %5514 = vst [vmem:[#allocation7_spill] sm:$0xff] %v5513_v59  ;;  %v1176_v1 = vld [vmem:[#allocation2 + $0x89] sm:$0xff] }
  0x5c   : > { %v998_v43 = vld [vmem:[#allocation2 + $0x100] sm:$0xff]  ;;  %939 = vst.msk [vmem:[#allocation3 + $0x20] sm:$0xff] %vm5428_vm0, %v907_v57  ;;  %v5535_v57 = vmov 0 }
  0x5d   : > { %v993_v32 = vld [vmem:[#allocation2 + $0xd8] sm:$0xff]  ;;  %v398_v3 = vand.u32 15, %v332_v56  ;;  %940 = vst.msk [vmem:[#allocation3 + $0x28] sm:$0xff] %vm5428_vm0, %v4000_v8  ;;  %v1171_v56 = vld [vmem:[#allocation2 + $0x61] sm:$0xff] }
  0x5e   : > { %v996_v39 = vld [vmem:[#allocation2 + $0xf0] sm:$0xff]  ;;  %944 = vst.msk [vmem:[#allocation3 + $0x48] sm:$0xff] %vm5428_vm0, %v4031_v23 }
  0x5f   : > { %vm4011_vm9 = vcmp.lt.s32.totalorder %v398_v3, 15  ;;  %946 = vst.msk [vmem:[#allocation3 + $0x58] sm:$0xff] %vm5428_vm0, %v4068_v47  ;;  %v4283_v59 = vld [vmem:[#allocation2 + $0xd7] sm:$0xff] }
  0x60   : > { %1053 = vrot.lane.b32.xlu2 %v978_v60, %s3706_s30  ;;  %v1160_v60 = vld [vmem:[#allocation2 + $0x9] sm:$0xff]  ;;  %v5521_v12 = vsel %vm4011_vm9, 4294967295, %v5520_v12 }
  0x61   : > { %5522 = vst [vmem:[#allocation9_spill] sm:$0xff] %v5521_v12  ;;  %v355_v12 = vadd.s32 224, %v3926_v24 }
  0x62   : > { %1057 = vrot.lane.b32.xlu1 %v980_v61, %s3706_s30  ;;  %v384_v61 = vand.u32 15, %v330_v49  ;;  %v5531_v49 = vmov 0 }
  0x63   : > { %1067 = vrot.lane.b32.xlu0 %v985_v2, %s3706_s30  ;;  %v1295_v2 = vsel %vm3981_vm6, %v1167_v58, 0.0 }
  0x64   : > { %vm3994_vm7 = vcmp.lt.s32.totalorder %v384_v61, 15  ;;  %v346_v61 = vadd.s32 152, %v3926_v24 }
  0x68   : > { %1059 = vrot.lane.b32.xlu2 %v981_v6, %s3706_s30  ;;  %v5515_v6 = vmov 0 }
  0x69   : > { %v5516_v6 = vsel %vm3994_vm7, 4294967295, %v5515_v6 }
  0x6a   : > { %1063 = vrot.lane.b32.xlu1 %v983_v7, %s3706_s30  ;;  %5517 = vst [vmem:[#allocation8_spill] sm:$0xff] %v5516_v6  ;;  %v3998_v7 = vld [vmem:[#allocation2 + $0x37] sm:$0xff] }
  0x6b   : > { %1073 = vrot.lane.b32.xlu0 %v988_v10, %s3706_s30  ;;  %v4009_v10 = vld [vmem:[#allocation2 + $0x1f] sm:$0xff] }
  0x6c   : > { %938 = vst.msk [vmem:[#allocation3 + $0x18] sm:$0xff] %vm5428_vm0, %v4009_v10 }
  0x70   : > { %1065 = vrot.lane.b32.xlu2 %v984_v13, %s3706_s30  ;;  %v909_v13 = vsel %vm4003_vm8, %v3998_v7, 0.0 }
  0x71   : > { %941 = vst.msk [vmem:[#allocation3 + $0x30] sm:$0xff] %vm5428_vm0, %v909_v13  ;;  %v4105_v13 = vld [vmem:[#allocation2 + $0x7f] sm:$0xff] }
  0x72   : > { %1069 = vrot.lane.b32.xlu1 %v986_v14, %s3706_s30  ;;  %v1291_v14 = vsel %vm3994_vm7, %v3992_v5, 0.0  ;;  %vm5555_vm7 = vcmask 31744  }
  0x73   : > { %1079 = vrot.lane.b32.xlu0 %v991_v16, %s3706_s30  ;;  %v1293_v16 = vsel %vm4011_vm9, %v1165_v11, 0.0  ;;  %v342_v11 = vadd.s32 120, %v3926_v24  ;;  %vm5557_vm1 = vmmov %vm5555_vm7 }
  0x78   : > { %1071 = vrot.lane.b32.xlu2 %v987_v18, %s3706_s30  ;;  %v1170_v18 = vld [vmem:[#allocation2 + $0x59] sm:$0xff] }
  0x7a   : > { %1075 = vrot.lane.b32.xlu1 %v989_v20, %s3706_s30  ;;  %v419_v20 = vand.u32 15, %v335_v17  ;;  %v344_v17 = vadd.s32 136, %v3926_v24 }
  0x7b   : > { %1085 = vrot.lane.b32.xlu0 %v994_v22, %s3706_s30  ;;  %v336_v22 = vadd.s32 72, %v3926_v24 }
  0x7c   : > { %vm4037_vm10 = vcmp.gt.s32.totalorder %v419_v20, 0  ;;  %v4122_v20 = vld [vmem:[#allocation2 + $0xa1] sm:$0xff] }
  0x80   : > { %1077 = vrot.lane.b32.xlu2 %v990_v25, %s3706_s30  ;;  %v4033_v25 = vld [vmem:[#allocation2 + $0x47] sm:$0xff] }
  0x81   : > { %v911_v29 = vsel %vm4037_vm10, %v4033_v25, 0.0 }
  0x82   : > { %1081 = vrot.lane.b32.xlu1 %v992_v27, %s3706_s30  ;;  %v4041_v27 = vld [vmem:[#allocation2 + $0x3f] sm:$0xff]  ;;  %943 = vst.msk [vmem:[#allocation3 + $0x40] sm:$0xff] %vm5428_vm0, %v911_v29  ;;  %v468_v29 = vand.u32 15, %v342_v11  ;;  %v352_v11 = vadd.s32 200, %v3926_v24 }
  0x83   : > { %1091 = vrot.lane.b32.xlu0 %v997_v28, %s3706_s30  ;;  %v338_v28 = vadd.s32 88, %v3926_v24  ;;  %942 = vst.msk [vmem:[#allocation3 + $0x38] sm:$0xff] %vm5428_vm0, %v4041_v27 }
  0x85   : > { %v440_v40 = vand.u32 15, %v338_v28  ;;  %v4128_v28 = vld [vmem:[#allocation2 + $0x6f] sm:$0xff] }
  0x87   : > { %vm4085_vm15 = vcmp.lt.s32.totalorder %v440_v40, 15 }
  0x88   : > { %1083 = vrot.lane.b32.xlu2 %v993_v32, %s3706_s30  ;;  %v5525_v32 = vmov 0  ;;  %v5536_v57 = vsel %vm4085_vm15, 4294967295, %v5535_v57 }
  0x89   : > { %v5526_v32 = vsel %vm4049_vm11, 4294967295, %v5525_v32  ;;  %5537 = vst [vmem:[#allocation12_spill] sm:$0xff] %v5536_v57 }
  0x8a   : > { %1087 = vrot.lane.b32.xlu1 %v995_v33, %s3706_s30  ;;  %5527 = vst [vmem:[#allocation10_spill] sm:$0xff] %v5526_v32  ;;  %v1166_v33 = vld [vmem:[#allocation2 + $0x39] sm:$0xff] }
  0x8b   : > { %1354 = vrot.lane.b32.xlu0 %v1289_v34, %s3707_s11  ;;  %v426_v34 = vand.u32 15, %v336_v22  ;;  %v1172_v22 = vld [vmem:[#allocation2 + $0x69] sm:$0xff] }
  0x8d   : > { %vm4062_vm12 = vcmp.lt.s32.totalorder %v426_v34, 15  ;;  %v1174_v34 = vld [vmem:[#allocation2 + $0x79] sm:$0xff] }
  0x8e   : > { %v1032_v41 = vpop.permute.xlu0 %1031 }
  0x8f   : > { %1128 = vst.msk [vmem:[#allocation3] sm:$0xff] %vm5435_vm3, %v1032_v41  ;;  %v433_v41 = vand.u32 15, %v337_v35  ;;  %v345_v35 = vadd.s32 144, %v3926_v24 }
  0x90   : > { %1089 = vrot.lane.b32.xlu2 %v996_v39, %s3706_s30  ;;  %v1301_v39 = vsel %vm4049_vm11, %v1173_v30, 0.0  ;;  %vm5540_vm11 = vcmask 31744   ;;  %v343_v30 = vadd.s32 128, %v3926_v24 }
  0x91   : > { %vm4072_vm13 = vcmp.gt.s32.totalorder %v433_v41, 0  ;;  %950 = vst.msk [vmem:[#allocation3 + $0x78] sm:$0xff] %vm5540_vm11, %v4105_v13  ;;  %v1175_v41 = vld [vmem:[#allocation2 + $0x81] sm:$0xff] }
  0x92   : > { %1093 = vrot.lane.b32.xlu1 %v998_v43, %s3706_s30  ;;  %v447_v43 = vand.u32 15, %v339_v38  ;;  %v5532_v49 = vsel %vm4072_vm13, 4294967295, %v5531_v49  ;;  %v913_v55 = vsel %vm4072_vm13, %v4070_v48, 0.0  ;;  %v475_v40 = vand.u32 15, %v343_v30 }
  0x93   : > { %1360 = vrot.lane.b32.xlu0 %v1164_v45, %s3707_s11  ;;  %v5528_v45 = vmov 0  ;;  %945 = vst.msk [vmem:[#allocation3 + $0x50] sm:$0xff] %vm5428_vm0, %v913_v55  ;;  %v4147_v55 = vld [vmem:[#allocation2 + $0x97] sm:$0xff] }
  0x94   : > { %v5529_v45 = vsel %vm4062_vm12, 4294967295, %v5528_v45  ;;  %vm4078_vm14 = vcmp.gt.s32.totalorder %v447_v43, 0  ;;  %vm4153_vm6 = vcmp.gt.s32.totalorder %v475_v40, 0 }
  0x95   : > { %5530 = vst [vmem:[#allocation11_spill] sm:$0xff] %v5529_v45  ;;  %v5534_v50 = vsel %vm4078_vm14, 4294967295, %v5533_v50  ;;  %v915_v58 = vsel %vm4078_vm14, %v4066_v46, 0.0 }
  0x96   : > { %v1034_v62 = vpop.permute.xlu0 %1033  ;;  %947 = vst.msk [vmem:[#allocation3 + $0x60] sm:$0xff] %vm5428_vm0, %v915_v58  ;;  %v4151_v58 = vld [vmem:[#allocation2 + $0x87] sm:$0xff] }
  0x97   : > { %1129 = vst.msk [vmem:[#allocation3 + $0x8] sm:$0xff] %vm5435_vm3, %v1034_v62  ;;  %v1299_v62 = vsel %vm4085_vm15, %v1171_v56, 0.0  ;;  %v4149_v56 = vld [vmem:[#allocation2 + $0x8f] sm:$0xff] }
  0x98   : > { %1352 = vrot.lane.b32.xlu2 %v1160_v60, %s3707_s11  ;;  %v1297_v60 = vsel %vm4062_vm12, %v1169_v42, 0.0  ;;  %vm5543_vm12 = vmmov %vm5540_vm11  ;;  %v489_v42 = vand.u32 15, %v345_v35  ;;  %952 = vst.msk [vmem:[#allocation3 + $0x88] sm:$0xff] %vm5555_vm7, %v4149_v56  ;;  %v4192_v35 = vld [vmem:[#allocation2 + $0xa7] sm:$0xff] }
  0x99   : > { %948 = vst.msk [vmem:[#allocation3 + $0x68] sm:$0xff] %vm5543_vm12, %v4128_v28  ;;  %vm5559_vm7 = vmmov %vm5557_vm1 }
  0x9a   : > { %1356 = vrot.lane.b32.xlu1 %v1162_v63, %s3707_s11  ;;  %v341_v63 = vadd.s32 112, %v3926_v24  ;;  %vm4159_vm12 = vcmp.gt.s32.totalorder %v489_v42, 0  ;;  %v1185_v42 = vld [vmem:[#allocation2 + $0xd1] sm:$0xff] }
  0x9b   : > { %1366 = vrot.lane.b32.xlu0 %v1295_v2, %s3707_s11  ;;  %v496_v2 = vand.u32 15, %v346_v61  ;;  %v5551_v61 = vmov 0 }
  0x9c   : > { %v461_v3 = vand.u32 15, %v341_v63  ;;  %v5552_v61 = vsel %vm4159_vm12, 4294967295, %v5551_v61  ;;  %v1177_v63 = vld [vmem:[#allocation2 + $0x91] sm:$0xff] }
  0x9d   : > { %vm4124_vm15 = vcmp.lt.s32.totalorder %v496_v2, 15  ;;  %v921_v2 = vsel %vm4159_vm12, %v4147_v55, 0.0  ;;  %vm5581_vm12 = vcmask 31744  }
  0x9e   : > { %vm4111_vm0 = vcmp.gt.s32.totalorder %v461_v3, 0  ;;  %v1307_v38 = vsel %vm4124_vm15, %v4122_v20, 0.0  ;;  %953 = vst.msk [vmem:[#allocation3 + $0x90] sm:$0xff] %vm5557_vm1, %v921_v2 }
  0x9f   : > { %v5539_v15 = vsel %vm4111_vm0, 4294967295, %v5538_v15 }
  0xa0   : > { %1358 = vrot.lane.b32.xlu2 %v1291_v14, %s3707_s11  ;;  %v4107_v14 = vld [vmem:[#allocation2 + $0x77] sm:$0xff] }
  0xa2   : > { %1362 = vrot.lane.b32.xlu1 %v1293_v16, %s3707_s11  ;;  %v1040_v21 = vpop.permute.xlu2 %1039 }
  0xa3   : > { %1372 = vrot.lane.b32.xlu0 %v1170_v18, %s3707_s11  ;;  %1132 = vst.msk [vmem:[#allocation3 + $0x20] sm:$0xff] %vm5435_vm3, %v1040_v21  ;;  %v917_v18 = vsel %vm4111_vm0, %v4107_v14, 0.0  ;;  %v5541_v21 = vmov 0 }
  0xa4   : > { %v5542_v21 = vsel %vm4124_vm15, 4294967295, %v5541_v21  ;;  %949 = vst.msk [vmem:[#allocation3 + $0x70] sm:$0xff] %vm5540_vm11, %v917_v18  ;;  %v347_v18 = vadd.s32 160, %v3926_v24 }
  0xa8   : > { %1364 = vrot.lane.b32.xlu2 %v1166_v33, %s3707_s11  ;;  %v260_v33 = vld [vmem:[%s3835_s10 + $0xf0] sm:$0xff] }
  0xaa   : > { %1368 = vrot.lane.b32.xlu1 %v1168_v36, %s3707_s11  ;;  %v1042_v44 = vpop.permute.xlu2 %1041  ;;  %v292_v36 = vmax.f32 %v260_v33, 0.0  ;;  %v348_v33 = vadd.s32 168, %v3926_v24 }
  0xab   : > { %1378 = vrot.lane.b32.xlu0 %v1301_v39, %s3707_s11  ;;  %1133 = vst.msk [vmem:[#allocation3 + $0x28] sm:$0xff] %vm5435_vm3, %v1042_v44  ;;  %v482_v39 = vand.u32 15, %v344_v17  ;;  %v5545_v44 = vmov 0 }
  0xac   : > { %v510_v2 = vand.u32 15, %v348_v33  ;;  %v5569_v33 = vmov 0 }
  0xad   : > { %vm4163_vm9 = vcmp.lt.s32.totalorder %v482_v39, 15  ;;  %v350_v39 = vadd.s32 184, %v3926_v24 }
  0xae   : > { %v1305_v17 = vsel %vm4163_vm9, %v1177_v63, 0.0  ;;  %v4214_v63 = vld [vmem:[#allocation2 + $0x9f] sm:$0xff] }
  0xb0   : > { %1370 = vrot.lane.b32.xlu2 %v1297_v60, %s3707_s11  ;;  %v5548_v60 = vmov 0 }
  0xb1   : > { %v5549_v60 = vsel %vm4153_vm6, 4294967295, %v5548_v60 }
  0xb2   : > { %1374 = vrot.lane.b32.xlu1 %v1299_v62, %s3707_s11  ;;  %v1048_v4 = vpop.permute.xlu2 %1047 }
  0xb3   : > { %1384 = vrot.lane.b32.xlu0 %v1176_v1, %s3707_s11  ;;  %1136 = vst.msk [vmem:[#allocation3 + $0x40] sm:$0xff] %vm5435_vm3, %v1048_v4  ;;  %v5553_v1 = vmov 0 }
  0xb4   : > { %v1036_v16 = vpop.permute.xlu1 %1035  ;;  %v5554_v1 = vsel %vm4163_vm9, 4294967295, %v5553_v1 }
  0xb5   : > { %1130 = vst.msk [vmem:[#allocation3 + $0x10] sm:$0xff] %vm5435_vm3, %v1036_v16  ;;  %v1044_v19 = vpop.permute.xlu0 %1043  ;;  %v919_v16 = vsel %vm4153_vm6, %v4151_v58, 0.0 }
  0xb6   : > { %1134 = vst.msk [vmem:[#allocation3 + $0x30] sm:$0xff] %vm5435_vm3, %v1044_v19  ;;  %vm5544_vm3 = vmmov %vm5540_vm11  ;;  %vm4143_vm11 = vcmp.lt.s32.totalorder %v468_v29, 15  ;;  %v4184_v19 = vld [vmem:[#allocation2 + $0xb9] sm:$0xff]  ;;  %v503_v29 = vand.u32 15, %v347_v18 }
  0xb7   : > { %324 = vst.msk [vmem:[#allocation2 + $0x108] sm:$0xff] %vm5544_vm3, %v292_v36  ;;  %v5546_v44 = vsel %vm4143_vm11, 4294967295, %v5545_v44  ;;  %vm5550_vm3 = vcmask 64544   ;;  %v1303_v4 = vsel %vm4143_vm11, %v1175_v41, 0.0  ;;  %v5561_v36 = vmov 0 }
  0xb8   : > { %1376 = vrot.lane.b32.xlu2 %v1172_v22, %s3707_s11  ;;  %5547 = vst [vmem:[#allocation13_spill] sm:$0xff] %v5546_v44  ;;  %vm5556_vm15 = vmmov %vm5550_vm3  ;;  %v538_v22 = vand.u32 15, %v352_v11  ;;  %v351_v11 = vadd.s32 192, %v3926_v24  ;;  %v1188_v44 = vld [vmem:[#allocation2 + $0xe9] sm:$0xff] }
  0xb9   : > { %5558 = vst [vmem:[#allocation14_spill] sm:$0xff] %v4184_v19  ;;  %vm5560_vm1 = vmmov %vm5550_vm3 }
  0xba   : > { %1380 = vrot.lane.b32.xlu1 %v1174_v34, %s3707_s11  ;;  %v1054_v43 = vpop.permute.xlu2 %1053  ;;  %951 = vst.msk [vmem:[#allocation3 + $0x80] sm:$0xff] %vm5559_vm7, %v919_v16  ;;  %v4190_v34 = vld [vmem:[#allocation2 + $0xaf] sm:$0xff]  ;;  %vm4208_vm11 = vcmp.lt.s32.totalorder %v538_v22, 15 }
  0xbb   : > { %1390 = vrot.lane.b32.xlu0 %v1307_v38, %s3707_s11  ;;  %1139 = vst.msk [vmem:[#allocation3 + $0x58] sm:$0xff] %vm5550_vm3, %v1054_v43  ;;  %v5565_v43 = vmov 0  ;;  %v1313_v16 = vsel %vm4208_vm11, %v1185_v42, 0.0  ;;  %v4228_v22 = vld [vmem:[#allocation2 + $0xb1] sm:$0xff]  ;;  %v5575_v42 = vmov 0 }
  0xbc   : > { %v1038_v62 = vpop.permute.xlu1 %1037  ;;  %v5566_v43 = vsel %vm4208_vm11, 4294967295, %v5565_v43 }
  0xbd   : > { %1131 = vst.msk [vmem:[#allocation3 + $0x18] sm:$0xff] %vm5556_vm15, %v1038_v62  ;;  %v1050_v3 = vpop.permute.xlu0 %1049  ;;  %vm4197_vm15 = vcmp.gt.s32.totalorder %v503_v29, 0  ;;  %v4212_v62 = vld [vmem:[#allocation2 + $0x99] sm:$0xff]  ;;  %v531_v29 = vand.u32 15, %v351_v11  ;;  %v5578_v11 = vmov 0 }
  0xbe   : > { %1137 = vst.msk [vmem:[#allocation3 + $0x48] sm:$0xff] %vm5550_vm3, %v1050_v3  ;;  %v5562_v36 = vsel %vm4197_vm15, 4294967295, %v5561_v36  ;;  %vm5563_vm3 = vmmov %vm5559_vm7  ;;  %v923_v40 = vsel %vm4197_vm15, %v4192_v35, 0.0  ;;  %v349_v3 = vadd.s32 176, %v3926_v24 }
  0xbf   : > { %956 = vst.msk [vmem:[#allocation3 + $0xa8] sm:$0xff] %vm5563_vm3, %v4190_v34  ;;  %vm5564_vm7 = vmmov %vm5560_vm1  ;;  %vm4248_vm11 = vcmp.gt.s32.totalorder %v531_v29, 0 }
  0xc0   : > { %1382 = vrot.lane.b32.xlu2 %v1303_v4, %s3707_s11  ;;  %5567 = vst [vmem:[#allocation15_spill] sm:$0xff] %v5566_v43  ;;  %v4218_v4 = vld [vmem:[#allocation2 + $0xa9] sm:$0xff]  ;;  %v517_v18 = vand.u32 15, %v349_v3  ;;  %v5576_v42 = vsel %vm4248_vm11, 4294967295, %v5575_v42  ;;  %v4252_v3 = vld [vmem:[#allocation2 + $0xc1] sm:$0xff] }
  0xc1   : > { %955 = vst.msk [vmem:[#allocation3 + $0xa0] sm:$0xff] %vm5563_vm3, %v923_v40  ;;  %v4240_v40 = vld [vmem:[#allocation2 + $0xb7] sm:$0xff]  ;;  %v4281_v43 = vld [vmem:[#allocation2 + $0xdf] sm:$0xff] }
  0xc2   : > { %1386 = vrot.lane.b32.xlu1 %v1305_v17, %s3707_s11  ;;  %v1060_v30 = vpop.permute.xlu2 %1059  ;;  %v524_v17 = vand.u32 15, %v350_v39  ;;  %v4238_v39 = vld [vmem:[#allocation2 + $0xbf] sm:$0xff]  ;;  %5577 = vst [vmem:[#allocation17_spill] sm:$0xff] %v4252_v3 }
  0xc3   : > { %1396 = vrot.lane.b32.xlu0 %v4184_v19, %s3707_s11  ;;  %1142 = vst.msk [vmem:[#allocation3 + $0x70] sm:$0xff] %vm5560_vm1, %v1060_v30 }
  0xc4   : > { %v1046_v38 = vpop.permute.xlu1 %1045  ;;  %vm4254_vm9 = vcmp.lt.s32.totalorder %v524_v17, 15  ;;  %958 = vst.msk [vmem:[#allocation3 + $0xb8] sm:$0xff] %vm5581_vm12, %v4238_v39 }
  0xc5   : > { %1135 = vst.msk [vmem:[#allocation3 + $0x38] sm:$0xff] %vm5564_vm7, %v1046_v38  ;;  %v1056_v41 = vpop.permute.xlu0 %1055  ;;  %vm5568_vm7 = vmmov %vm5563_vm3  ;;  %v4236_v38 = vld [vmem:[#allocation2 + $0xc7] sm:$0xff]  ;;  %vm4242_vm3 = vcmp.gt.s32.totalorder %v517_v18, 0  ;;  %v5579_v11 = vsel %vm4254_vm9, 4294967295, %v5578_v11  ;;  %v1311_v0 = vsel %vm4254_vm9, %v4252_v3, 0.0  ;;  %v559_v3 = vand.u32 15, %v355_v12 }
  0xc6   : > { %1140 = vst.msk [vmem:[#allocation3 + $0x60] sm:$0xff] %vm5560_vm1, %v1056_v41  ;;  %vm4232_vm1 = vcmp.lt.s32.totalorder %v510_v2, 15  ;;  %v5572_v41 = vmov 0  ;;  %v927_v18 = vsel %vm4248_vm11, %v4236_v38, 0.0  ;;  %v925_v17 = vsel %vm4242_vm3, %v4240_v40, 0.0  ;;  %v5146_v12 = vld [vmem:[#allocation2 + $0x89] sm:$0xff] }
  0xc7   : > { %954 = vst.msk [vmem:[#allocation3 + $0x98] sm:$0xff] %vm5568_vm7, %v4214_v63  ;;  %v5570_v33 = vsel %vm4232_vm1, 4294967295, %v5569_v33  ;;  %v5573_v41 = vsel %vm4242_vm3, 4294967295, %v5572_v41  ;;  %vm5574_vm7 = vcmask 64544   ;;  %v1309_v29 = vsel %vm4232_vm1, %v4228_v22, 0.0 }
  0xc8   : > { %1388 = vrot.lane.b32.xlu2 %v4212_v62, %s3707_s11  ;;  %5571 = vst [vmem:[#allocation16_spill] sm:$0xff] %v5570_v33  ;;  %vm5582_vm6 = vmmov %vm5574_vm7  ;;  %v1186_v33 = vld [vmem:[#allocation2 + $0xd9] sm:$0xff]  ;;  %vm5602_vm3 = vcmask 31744  }
  0xc9   : > { %5580 = vst [vmem:[#allocation18_spill] sm:$0xff] %v5579_v11  ;;  %vm5604_vm15 = vmmov %vm5602_vm3 }
  0xca   : > { %1392 = vrot.lane.b32.xlu1 %v4218_v4, %s3707_s11  ;;  %v1066_v30 = vpop.permute.xlu2 %1065  ;;  %959 = vst.msk [vmem:[#allocation3 + $0xc0] sm:$0xff] %vm5581_vm12, %v927_v18  ;;  %v5585_v18 = vmov 0 }
  0xcb   : > { %1402 = vrot.lane.b32.xlu0 %v1313_v16, %s3707_s11  ;;  %1145 = vst.msk [vmem:[#allocation3 + $0x88] sm:$0xff] %vm5574_vm7, %v1066_v30  ;;  %v358_v30 = vadd.s32 248, %v3926_v24  ;;  %vm5583_vm7 = vmmov %vm5582_vm6 }
  0xcc   : > { %v1052_v2 = vpop.permute.xlu1 %1051  ;;  %vm5587_vm9 = vmmov %vm5583_vm7 }
  0xcd   : > { %1138 = vst.msk [vmem:[#allocation3 + $0x50] sm:$0xff] %vm5582_vm6, %v1052_v2  ;;  %v1062_v16 = vpop.permute.xlu0 %1061  ;;  %v353_v2 = vadd.s32 208, %v3926_v24  ;;  %vm5584_vm6 = vmmov %vm5581_vm12  ;;  %v580_v32 = vand.u32 15, %v358_v30  ;;  %v356_v30 = vadd.s32 232, %v3926_v24 }
  0xce   : > { %1143 = vst.msk [vmem:[#allocation3 + $0x78] sm:$0xff] %vm5583_vm7, %v1062_v16  ;;  %v354_v16 = vadd.s32 216, %v3926_v24 }
  0xcf   : > { %957 = vst.msk [vmem:[#allocation3 + $0xb0] sm:$0xff] %vm5584_vm6, %v925_v17  ;;  %v545_v57 = vand.u32 15, %v353_v2  ;;  %vm4298_vm1 = vcmp.lt.s32.totalorder %v580_v32, 15  ;;  %v4304_v2 = vld [vmem:[#allocation2 + $0xcf] sm:$0xff]  ;;  %v566_v6 = vand.u32 15, %v356_v30  ;;  %v4325_v30 = vld [vmem:[#allocation2 + $0xe7] sm:$0xff] }
  0xd0   : > { %1394 = vrot.lane.b32.xlu2 %v1309_v29, %s3707_s11  ;;  %962 = vst.msk [vmem:[#allocation3 + $0xd8] sm:$0xff] %vm5584_vm6, %v4281_v43  ;;  %v552_v11 = vand.u32 15, %v354_v16 }
  0xd1   : > { %vm4287_vm12 = vcmp.gt.s32.totalorder %v545_v57, 0  ;;  %v4302_v57 = vld [vmem:[#allocation2 + $0xc9] sm:$0xff]  ;;  %vm4337_vm11 = vcmp.lt.s32.totalorder %v566_v6, 15 }
  0xd2   : > { %1398 = vrot.lane.b32.xlu1 %v1311_v0, %s3707_s11  ;;  %v1072_v45 = vpop.permute.xlu2 %1071  ;;  %v5586_v18 = vsel %vm4287_vm12, 4294967295, %v5585_v18  ;;  %v929_v0 = vsel %vm4287_vm12, %v4283_v59, 0.0  ;;  %5591 = vst [vmem:[#allocation20_spill] sm:$0xff] %v4302_v57 }
  0xd3   : > { %1408 = vrot.lane.b32.xlu0 %v1188_v44, %s3707_s11  ;;  %1148 = vst.msk [vmem:[#allocation3 + $0xa0] sm:$0xff] %vm5583_vm7, %v1072_v45  ;;  %v1191_v44 = vld [vmem:[#allocation2 + $0x101] sm:$0xff]  ;;  %v5588_v45 = vmov 0 }
  0xd4   : > { %v1058_v29 = vpop.permute.xlu1 %1057  ;;  %v5589_v45 = vsel %vm4298_vm1, 4294967295, %v5588_v45  ;;  %961 = vst.msk [vmem:[#allocation3 + $0xd0] sm:$0xff] %vm5584_vm6, %v929_v0  ;;  %v1319_v32 = vsel %vm4298_vm1, %v1191_v44, 0.0  ;;  %v4323_v44 = vld [vmem:[#allocation2 + $0xef] sm:$0xff] }
  0xd5   : > { %1141 = vst.msk [vmem:[#allocation3 + $0x68] sm:$0xff] %vm5587_vm9, %v1058_v29  ;;  %v1068_v17 = vpop.permute.xlu0 %1067  ;;  %v357_v29 = vadd.s32 240, %v3926_v24  ;;  %vm5592_vm9 = vmmov %vm5584_vm6  ;;  %v4321_v24 = vld [vmem:[#allocation2 + $0xf7] sm:$0xff]  ;;  %vm4327_vm6 = vcmp.gt.s32.totalorder %v559_v3, 0 }
  0xd6   : > { %5590 = vst [vmem:[#allocation19_spill] sm:$0xff] %v5589_v45  ;;  %v931_v6 = vsel %vm4327_vm6, %v4325_v30, 0.0 }
  0xd7   : > { %1146 = vst.msk [vmem:[#allocation3 + $0x90] sm:$0xff] %vm5583_vm7, %v1068_v17  ;;  %v1187_v17 = vld [vmem:[#allocation2 + $0xe1] sm:$0xff]  ;;  %v573_v16 = vand.u32 15, %v357_v29  ;;  %vm4317_vm7 = vcmp.lt.s32.totalorder %v552_v11, 15  ;;  %v1189_v11 = vld [vmem:[#allocation2 + $0xf1] sm:$0xff]  ;;  %v5600_v29 = vmov 0 }
  0xd8   : > { %1400 = vrot.lane.b32.xlu2 %v4302_v57, %s3707_s11  ;;  %960 = vst.msk [vmem:[#allocation3 + $0xc8] sm:$0xff] %vm5592_vm9, %v4304_v2  ;;  %vm5597_vm9 = vcmask 64544   ;;  %v5601_v29 = vsel %vm4337_vm11, 4294967295, %v5600_v29  ;;  %v1515_v57 = vsel %vm3961_vm4, %v3959_v51, 0.0 }
  0xd9   : > { %vm4333_vm1 = vcmp.gt.s32.totalorder %v573_v16, 0  ;;  %964 = vst.msk [vmem:[#allocation3 + $0xe8] sm:$0xff] %vm5602_vm3, %v4323_v44  ;;  %vm5603_vm12 = vmmov %vm5597_vm9  ;;  %v1317_v16 = vsel %vm4337_vm11, %v1189_v11, 0.0 }
  0xda   : > { %1404 = vrot.lane.b32.xlu1 %v1186_v33, %s3707_s11  ;;  %v1078_v19 = vpop.permute.xlu2 %1077  ;;  %v933_v3 = vsel %vm4333_vm1, %v4321_v24, 0.0  ;;  %963 = vst.msk [vmem:[#allocation3 + $0xe0] sm:$0xff] %vm5602_vm3, %v931_v6  ;;  %vm5607_vm11 = vmmov %vm5597_vm9 }
  0xdb   : > { %1414 = vrot.lane.b32.xlu0 %v1319_v32, %s3707_s11  ;;  %1151 = vst.msk [vmem:[#allocation3 + $0xb8] sm:$0xff] %vm5597_vm9, %v1078_v19  ;;  %v1315_v32 = vsel %vm4317_vm7, %v1187_v17, 0.0 }
  0xdc   : > { %v1064_v33 = vpop.permute.xlu1 %1063  ;;  %965 = vst.msk [vmem:[#allocation3 + $0xf0] sm:$0xff] %vm5604_vm15, %v933_v3  ;;  %vm5606_vm15 = vmmov %vm5602_vm3 }
  0xdd   : > { %1144 = vst.msk [vmem:[#allocation3 + $0x80] sm:$0xff] %vm5603_vm12, %v1064_v33  ;;  %v1074_v19 = vpop.permute.xlu0 %1073  ;;  %v4362_v33 = vld [vmem:[#allocation2 + $0xff] sm:$0xff]  ;;  %vm5605_vm12 = vmmov %vm5597_vm9 }
  0xde   : > { %1149 = vst.msk [vmem:[#allocation3 + $0xa8] sm:$0xff] %vm5597_vm9, %v1074_v19  ;;  %v1190_v19 = vld [vmem:[#allocation2 + $0xf9] sm:$0xff]  ;;  %vm5608_vm3 = vmmov %vm5597_vm9 }
  0xdf   : > { %966 = vst.msk [vmem:[#allocation3 + $0xf8] sm:$0xff] %vm5606_vm15, %v4362_v33  ;;  %vm5610_vm15 = vmmov %vm5608_vm3 }
  0xe0   : > { %1406 = vrot.lane.b32.xlu2 %v1315_v32, %s3707_s11  ;;  %v1513_v32 = vsel %vm3945_vm2, %v3965_v53, 0.0  ;;  %v1521_v53 = vsel %vm4037_vm10, %v4070_v48, 0.0  ;;  %v1517_v48 = vsel %vm3969_vm5, %v3998_v7, 0.0 }
  0xe2   : > { %1410 = vrot.lane.b32.xlu1 %v1317_v16, %s3707_s11  ;;  %v1084_v17 = vpop.permute.xlu2 %1083 }
  0xe3   : > { %1581 = vrot.lane.b32.xlu0 %v1515_v57, %s3708_s12  ;;  %1154 = vst.msk [vmem:[#allocation3 + $0xd0] sm:$0xff] %vm5605_vm12, %v1084_v17  ;;  %vm5609_vm12 = vmmov %vm5608_vm3 }
  0xe4   : > { %v1070_v11 = vpop.permute.xlu1 %1069 }
  0xe5   : > { %1147 = vst.msk [vmem:[#allocation3 + $0x98] sm:$0xff] %vm5597_vm9, %v1070_v11  ;;  %v1080_v3 = vpop.permute.xlu0 %1079  ;;  %vm5611_vm9 = vmmov %vm5608_vm3 }
  0xe6   : > { %1152 = vst.msk [vmem:[#allocation3 + $0xc0] sm:$0xff] %vm5607_vm11, %v1080_v3  ;;  %vm1448_vm11 = vcmask 97344  }
  0xe8   : > { %1412 = vrot.lane.b32.xlu2 %v1190_v19, %s3707_s11 }
  0xea   : > { %1577 = vrot.lane.b32.xlu1 %v1513_v32, %s3708_s12  ;;  %v1090_v57 = vpop.permute.xlu2 %1089 }
  0xeb   : > { %1587 = vrot.lane.b32.xlu0 %v4041_v27, %s3708_s12  ;;  %1157 = vst.msk [vmem:[#allocation3 + $0xe8] sm:$0xff] %vm5608_vm3, %v1090_v57 }
  0xec   : > { %v1076_v6 = vpop.permute.xlu1 %1075 }
  0xed   : > { %1150 = vst.msk [vmem:[#allocation3 + $0xb0] sm:$0xff] %vm5609_vm12, %v1076_v6  ;;  %v1086_v16 = vpop.permute.xlu0 %1085  ;;  %vm5612_vm12 = vmmov %vm5608_vm3 }
  0xee   : > { %1155 = vst.msk [vmem:[#allocation3 + $0xd8] sm:$0xff] %vm5610_vm15, %v1086_v16  ;;  %vm5613_vm15 = vmmov %vm5608_vm3  ;;  %v1523_v16 = vsel %vm4072_vm13, %v4066_v46, 0.0  ;;  %vm5620_vm13 = vcmask 31744  }
  0xf0   : > { %1579 = vrot.lane.b32.xlu2 %v4009_v10, %s3708_s12  ;;  %v1519_v10 = vsel %vm4003_vm8, %v4033_v25, 0.0  ;;  %v1527_v25 = vsel %vm4111_vm0, %v4151_v58, 0.0  ;;  %vm5618_vm0 = vnez %v5573_v41  ;;  %v4750_v41 = vld [vmem:[#allocation2 + $0xe0] sm:$0xff] }
  0xf2   : > { %1583 = vrot.lane.b32.xlu1 %v4000_v8, %s3708_s12  ;;  %v1353_v17 = vpop.permute.xlu2 %1352 }
  0xf3   : > { %1593 = vrot.lane.b32.xlu0 %v1521_v53, %s3708_s12  ;;  %1449 = vst.msk [vmem:[#allocation3] sm:$0xff] %vm1448_vm11, %v1353_v17 }
  0xf4   : > { %v1082_v11 = vpop.permute.xlu1 %1081 }
  0xf5   : > { %1153 = vst.msk [vmem:[#allocation3 + $0xc8] sm:$0xff] %vm5611_vm9, %v1082_v11  ;;  %v1092_v3 = vpop.permute.xlu0 %1091  ;;  %vm5614_vm9 = vnez %v5562_v36 }
  0xf6   : > { %1158 = vst.msk [vmem:[#allocation3 + $0xf0] sm:$0xff] %vm5608_vm3, %v1092_v3  ;;  %vm5615_vm3 = vnez %v5549_v60  ;;  %v2366_v60 = vld [vmem:[#allocation2 + $0xb0] sm:$0xff] }
  0xf7   : > { %v1529_v11 = vsel %vm5615_vm3, %v4147_v55, 0.0 }
  0xf8   : > { %1585 = vrot.lane.b32.xlu2 %v1517_v48, %s3708_s12 }
  0xfa   : > { %1589 = vrot.lane.b32.xlu1 %v1519_v10, %s3708_s12  ;;  %v1359_v19 = vpop.permute.xlu2 %1358 }
  0xfb   : > { %1599 = vrot.lane.b32.xlu0 %v4128_v28, %s3708_s12  ;;  %1452 = vst.msk [vmem:[#allocation3 + $0x18] sm:$0xff] %vm1448_vm11, %v1359_v19 }
  0xfc   : > { %v1088_v32 = vpop.permute.xlu1 %1087 }
  0xfd   : > { %1156 = vst.msk [vmem:[#allocation3 + $0xe0] sm:$0xff] %vm5612_vm12, %v1088_v32  ;;  %v1355_v7 = vpop.permute.xlu0 %1354  ;;  %vm5616_vm12 = vnez %v5552_v61 }
  0xfe   : > { %1450 = vst.msk [vmem:[#allocation3 + $0x8] sm:$0xff] %vm1448_vm11, %v1355_v7  ;;  %v1535_v7 = vsel %vm5618_vm0, %v4236_v38, 0.0 }
 0x100   : > { %1591 = vrot.lane.b32.xlu2 %v4031_v23, %s3708_s12  ;;  %v1525_v23 = vsel %vm4078_vm14, %v4107_v14, 0.0  ;;  %v1533_v14 = vsel %vm5614_vm9, %v4240_v40, 0.0  ;;  %vm5619_vm14 = vnez %v5576_v42  ;;  %v4831_v42 = vld [vmem:[#allocation2 + $0xf0] sm:$0xff] }
 0x102   : > { %1595 = vrot.lane.b32.xlu1 %v4068_v47, %s3708_s12  ;;  %v1365_v57 = vpop.permute.xlu2 %1364 }
 0x103   : > { %1605 = vrot.lane.b32.xlu0 %v1527_v25, %s3708_s12  ;;  %1455 = vst.msk [vmem:[#allocation3 + $0x30] sm:$0xff] %vm1448_vm11, %v1365_v57  ;;  %v261_v25 = vld [vmem:[%s3835_s10 + $0xf8] sm:$0xff] }
 0x104   : > { %v1094_v28 = vpop.permute.xlu1 %1093  ;;  %v293_v57 = vmax.f32 %v261_v25, 0.0 }
 0x105   : > { %1159 = vst.msk [vmem:[#allocation3 + $0xf8] sm:$0xff] %vm5613_vm15, %v1094_v28  ;;  %v1361_v6 = vpop.permute.xlu0 %1360  ;;  %vm5617_vm15 = vnez %v5586_v18 }
 0x106   : > { %1453 = vst.msk [vmem:[#allocation3 + $0x20] sm:$0xff] %vm1448_vm11, %v1361_v6  ;;  %v1539_v48 = vsel %vm5617_vm15, %v4325_v30, 0.0  ;;  %v1537_v30 = vsel %vm5619_vm14, %v4283_v59, 0.0 }
 0x107   : > { %325 = vst.msk [vmem:[#allocation2 + $0x110] sm:$0xff] %vm5620_vm13, %v293_v57  ;;  %vm1673_vm13 = vcmask 130144   ;;  %v4520_v57 = vld [vmem:[#allocation2 + $0x40] sm:$0xff] }
 0x108   : > { %1597 = vrot.lane.b32.xlu2 %v1523_v16, %s3708_s12 }
 0x10a   : > { %1601 = vrot.lane.b32.xlu1 %v1525_v23, %s3708_s12  ;;  %v1371_v47 = vpop.permute.xlu2 %1370  ;;  %v1706_v23 = vld [vmem:[#allocation2 + $0x18] sm:$0xff] }
 0x10b   : > { %1611 = vrot.lane.b32.xlu0 %v4214_v63, %s3708_s12  ;;  %1458 = vst.msk [vmem:[#allocation3 + $0x48] sm:$0xff] %vm1448_vm11, %v1371_v47 }
 0x10c   : > { %v1357_v58 = vpop.permute.xlu1 %1356 }
 0x10d   : > { %1451 = vst.msk [vmem:[#allocation3 + $0x10] sm:$0xff] %vm1448_vm11, %v1357_v58  ;;  %v1367_v46 = vpop.permute.xlu0 %1366  ;;  %v1511_v58 = vld [vmem:[#allocation2 + $0x107] sm:$0xff] }
 0x10e   : > { %1456 = vst.msk [vmem:[#allocation3 + $0x38] sm:$0xff] %vm1448_vm11, %v1367_v46 }
 0x110   : > { %1603 = vrot.lane.b32.xlu2 %v4105_v13, %s3708_s12  ;;  %v1531_v13 = vsel %vm5616_vm12, %v4192_v35, 0.0 }
 0x112   : > { %1607 = vrot.lane.b32.xlu1 %v4149_v56, %s3708_s12  ;;  %v1377_v53 = vpop.permute.xlu2 %1376 }
 0x113   : > { %1617 = vrot.lane.b32.xlu0 %v1533_v14, %s3708_s12  ;;  %1461 = vst.msk [vmem:[#allocation3 + $0x60] sm:$0xff] %vm1448_vm11, %v1377_v53  ;;  %v1541_v14 = vsel %vm4327_vm6, %v4321_v24, 0.0  ;;  %v4491_v53 = vld [vmem:[#allocation2 + $0x30] sm:$0xff] }
 0x114   : > { %v1363_v63 = vpop.permute.xlu1 %1362 }
 0x115   : > { %1454 = vst.msk [vmem:[#allocation3 + $0x28] sm:$0xff] %vm1448_vm11, %v1363_v63  ;;  %v1373_v17 = vpop.permute.xlu0 %1372 }
 0x116   : > { %1459 = vst.msk [vmem:[#allocation3 + $0x50] sm:$0xff] %vm1448_vm11, %v1373_v17 }
 0x118   : > { %1609 = vrot.lane.b32.xlu2 %v1529_v11, %s3708_s12  ;;  %v1512_v11 = vld [vmem:[#allocation2 + $0x10f] sm:$0xff] }
 0x11a   : > { %1613 = vrot.lane.b32.xlu1 %v1531_v13, %s3708_s12  ;;  %v1383_v56 = vpop.permute.xlu2 %1382  ;;  %v1707_v13 = vld [vmem:[#allocation2 + $0x20] sm:$0xff] }
 0x11b   : > { %1623 = vrot.lane.b32.xlu0 %v4304_v2, %s3708_s12  ;;  %1464 = vst.msk [vmem:[#allocation3 + $0x78] sm:$0xff] %vm1448_vm11, %v1383_v56  ;;  %v4500_v56 = vld [vmem:[#allocation2 + $0x48] sm:$0xff] }
 0x11c   : > { %v1369_v3 = vpop.permute.xlu1 %1368 }
 0x11d   : > { %1457 = vst.msk [vmem:[#allocation3 + $0x40] sm:$0xff] %vm1448_vm11, %v1369_v3  ;;  %v1379_v55 = vpop.permute.xlu0 %1378 }
 0x11e   : > { %1462 = vst.msk [vmem:[#allocation3 + $0x68] sm:$0xff] %vm1448_vm11, %v1379_v55 }
 0x120   : > { %1615 = vrot.lane.b32.xlu2 %v4190_v34, %s3708_s12 }
 0x122   : > { %1619 = vrot.lane.b32.xlu1 %v4238_v39, %s3708_s12  ;;  %v1389_v10 = vpop.permute.xlu2 %1388 }
 0x123   : > { %1629 = vrot.lane.b32.xlu0 %v1539_v48, %s3708_s12  ;;  %1467 = vst.msk [vmem:[#allocation3 + $0x90] sm:$0xff] %vm1448_vm11, %v1389_v10  ;;  %v4508_v10 = vld [vmem:[#allocation2 + $0x28] sm:$0xff] }
 0x124   : > { %v1375_v19 = vpop.permute.xlu1 %1374 }
 0x125   : > { %1460 = vst.msk [vmem:[#allocation3 + $0x58] sm:$0xff] %vm1448_vm11, %v1375_v19  ;;  %v1385_v32 = vpop.permute.xlu0 %1384  ;;  %v4511_v19 = vld [vmem:[#allocation2 + $0x38] sm:$0xff] }
 0x126   : > { %1465 = vst.msk [vmem:[#allocation3 + $0x80] sm:$0xff] %vm1448_vm11, %v1385_v32  ;;  %v1723_v32 = vld [vmem:[#allocation2 + $0xa0] sm:$0xff] }
 0x128   : > { %1621 = vrot.lane.b32.xlu2 %v1535_v7, %s3708_s12 }
 0x12a   : > { %1625 = vrot.lane.b32.xlu1 %v1537_v30, %s3708_s12  ;;  %v1395_v28 = vpop.permute.xlu2 %1394 }
 0x12b   : > { %1635 = vrot.lane.b32.xlu0 %v4362_v33, %s3708_s12  ;;  %1470 = vst.msk [vmem:[#allocation3 + $0xa8] sm:$0xff] %vm1448_vm11, %v1395_v28  ;;  %v4523_v28 = vld [vmem:[#allocation2 + $0x50] sm:$0xff] }
 0x12c   : > { %v1381_v6 = vpop.permute.xlu1 %1380 }
 0x12d   : > { %1463 = vst.msk [vmem:[#allocation3 + $0x70] sm:$0xff] %vm1448_vm11, %v1381_v6  ;;  %v1391_v16 = vpop.permute.xlu0 %1390  ;;  %v2172_v6 = vsel %vm5615_vm3, %v4192_v35, 0.0  ;;  %vm5622_vm3 = vnez %v5505_v31  ;;  %v2174_v31 = vsel %vm5616_vm12, %v4240_v40, 0.0 }
 0x12e   : > { %1468 = vst.msk [vmem:[#allocation3 + $0x98] sm:$0xff] %vm1448_vm11, %v1391_v16 }
 0x130   : > { %1627 = vrot.lane.b32.xlu2 %v4281_v43, %s3708_s12 }
 0x132   : > { %1631 = vrot.lane.b32.xlu1 %v4323_v44, %s3708_s12  ;;  %v1401_v47 = vpop.permute.xlu2 %1400  ;;  %v1543_v44 = vsel %vm4333_vm1, %v1511_v58, 0.0 }
 0x133   : > { %1770 = vrot.lane.b32.xlu0 %v1706_v23, %s3709_s13  ;;  %1473 = vst.msk [vmem:[#allocation3 + $0xc0] sm:$0xff] %vm1448_vm11, %v1401_v47 }
 0x134   : > { %v1387_v33 = vpop.permute.xlu1 %1386 }
 0x135   : > { %1466 = vst.msk [vmem:[#allocation3 + $0x88] sm:$0xff] %vm1448_vm11, %v1387_v33  ;;  %v1397_v46 = vpop.permute.xlu0 %1396  ;;  %v1722_v33 = vld [vmem:[#allocation2 + $0x98] sm:$0xff] }
 0x136   : > { %1471 = vst.msk [vmem:[#allocation3 + $0xb0] sm:$0xff] %vm1448_vm11, %v1397_v46 }
 0x138   : > { %1633 = vrot.lane.b32.xlu2 %v1541_v14, %s3708_s12 }
 0x13a   : > { %1637 = vrot.lane.b32.xlu1 %v1543_v44, %s3708_s12  ;;  %v1407_v63 = vpop.permute.xlu2 %1406  ;;  %v1899_v44 = vld [vmem:[#allocation2 + $0x19] sm:$0xff] }
 0x13b   : > { %1776 = vrot.lane.b32.xlu0 %v4491_v53, %s3709_s13  ;;  %1476 = vst.msk [vmem:[#allocation3 + $0xd8] sm:$0xff] %vm1448_vm11, %v1407_v63 }
 0x13c   : > { %v1393_v17 = vpop.permute.xlu1 %1392 }
 0x13d   : > { %1469 = vst.msk [vmem:[#allocation3 + $0xa0] sm:$0xff] %vm1448_vm11, %v1393_v17  ;;  %v1403_v24 = vpop.permute.xlu0 %1402 }
 0x13e   : > { %1474 = vst.msk [vmem:[#allocation3 + $0xc8] sm:$0xff] %vm1448_vm11, %v1403_v24  ;;  %v2365_v24 = vld [vmem:[#allocation2 + $0xa8] sm:$0xff] }
 0x140   : > { %1639 = vrot.lane.b32.xlu2 %v1512_v11, %s3708_s12  ;;  %s3572_s12 = sshll.u32 %s3766_s22, 8 }
 0x141   : > { %s3413_s26 = scalar_lea.hbm %s5427_s5, %s3572_s12 }
 0x142   : > { %1772 = vrot.lane.b32.xlu1 %v1707_v13, %s3709_s13  ;;  %v1413_v3 = vpop.permute.xlu2 %1412  ;;  %s3416_s6 = sshll.u32 %s3413_s26, 4  ;;  %s3417_s6 = int_to_ptr.hbm [resolvable:$true] %s3416_s6 }
 0x143   : > { %1782 = vrot.lane.b32.xlu0 %v4500_v56, %s3709_s13  ;;  %1479 = vst.msk [vmem:[#allocation3 + $0xf0] sm:$0xff] %vm1448_vm11, %v1413_v3  ;;  %v1932_v3 = vsel %vm5622_vm3, %v3992_v5, 0.0  ;;  %s3655_s7 = sshra.s32 %s3417_s6, 4  ;;  %s3656_s7 = int_to_ptr.hbm [resolvable:$true] %s3655_s7 }
 0x144   : > { %v1399_v55 = vpop.permute.xlu1 %1398  ;;  %s3657_s8 = scalar_lea.hbm %s3656_s7, 256  ;;  %p3662_p0 = scmp.lt.s32.totalorder %s3656_s7, %s5427_s5 }
 0x145   : > { %1472 = vst.msk [vmem:[#allocation3 + $0xb8] sm:$0xff] %vm1448_vm11, %v1399_v55  ;;  %v1409_v48 = vpop.permute.xlu0 %1408  ;;  %p3658_p11 = scmp.ne.s32.totalorder %s3656_s7, %s3657_s8 }
 0x146   : > { %1477 = vst.msk [vmem:[#allocation3 + $0xe0] sm:$0xff] %vm1448_vm11, %v1409_v48  ;;  %v2543_v48 = vld [vmem:[#allocation2 + $0x31] sm:$0xff] }
 0x147   : > { %v2575_v5 = vsel %vm5622_vm3, %v2543_v48, 0.0  ;;  %vm2509_vm3 = vcmask 261344   ;;  %p3659_p12 = pnand %p3658_p11, %p3783_p5 }
 0x148   : > { %1774 = vrot.lane.b32.xlu2 %v4508_v10, %s3709_s13 }
 0x149   : > { %p3660_p13 = pneg %p3659_p12 }
 0x14a   : > { %1778 = vrot.lane.b32.xlu1 %v4511_v19, %s3709_s13  ;;  %v1580_v7 = vpop.permute.xlu2 %1579 }
 0x14b   : > { %1804 = vrot.lane.b32.xlu0 %v1723_v32, %s3709_s13  ;;  %1675 = vst.msk [vmem:[#allocation3 + $0x8] sm:$0xff] %vm1673_vm13, %v1580_v7  ;;  %v2156_v32 = vsel %vm3945_vm2, %v3959_v51, 0.0  ;;  %vm5623_vm2 = vnez %v5542_v21 }
 0x14c   : > { %v1405_v30 = vpop.permute.xlu1 %1404 }
 0x14d   : > { %1475 = vst.msk [vmem:[#allocation3 + $0xd0] sm:$0xff] %vm1448_vm11, %v1405_v30  ;;  %v1415_v25 = vpop.permute.xlu0 %1414 }
 0x14e   : > { %1480 = vst.msk [vmem:[#allocation3 + $0xf8] sm:$0xff] %vm1448_vm11, %v1415_v25 }
 0x150   : > { %1780 = vrot.lane.b32.xlu2 %v4520_v57, %s3709_s13 }
 0x152   : > { %1784 = vrot.lane.b32.xlu1 %v4523_v28, %s3709_s13  ;;  %v1586_v16 = vpop.permute.xlu2 %1585 }
 0x153   : > { %2252 = vrot.lane.b32.xlu0 %v2172_v6, %s3710_s14  ;;  %1678 = vst.msk [vmem:[#allocation3 + $0x20] sm:$0xff] %vm1673_vm13, %v1586_v16  ;;  %v2542_v6 = vld [vmem:[#allocation2 + $0x29] sm:$0xff]  ;;  %v4595_v16 = vld [vmem:[#allocation2 + $0xc0] sm:$0xff] }
 0x154   : > { %v1411_v23 = vpop.permute.xlu1 %1410 }
 0x155   : > { %1478 = vst.msk [vmem:[#allocation3 + $0xe8] sm:$0xff] %vm1448_vm11, %v1411_v23  ;;  %v1582_v47 = vpop.permute.xlu0 %1581  ;;  %vm5621_vm11 = vnez %v5554_v1  ;;  %v1950_v23 = vsel %vm5623_vm2, %v4228_v22, 0.0 }
 0x156   : > { %1676 = vst.msk [vmem:[#allocation3 + $0x10] sm:$0xff] %vm1673_vm13, %v1582_v47  ;;  %v1948_v14 = vsel %vm5621_vm11, %v4122_v20, 0.0  ;;  %v2591_v13 = vsel %vm5621_vm11, %v4228_v22, 0.0  ;;  %v5624_v22 = vld [vmem:[#allocation14_spill] sm:$0xff]  ;;  %vm1866_vm11 = vcmask 162944  }
 0x158   : > { %1802 = vrot.lane.b32.xlu2 %v1722_v33, %s3709_s13 }
 0x15a   : > { %2027 = vrot.lane.b32.xlu1 %v4212_v62, %s3711_s15  ;;  %v1592_v35 = vpop.permute.xlu2 %1591 }
 0x15b   : > { %2447 = vrot.lane.b32.xlu0 %v2366_v60, %s3712_s16  ;;  %1681 = vst.msk [vmem:[#allocation3 + $0x38] sm:$0xff] %vm1673_vm13, %v1592_v35 }
 0x15c   : > { %v1578_v58 = vpop.permute.xlu1 %1577 }
 0x15d   : > { %1674 = vst.msk [vmem:[#allocation3] sm:$0xff] %vm1673_vm13, %v1578_v58  ;;  %v1588_v46 = vpop.permute.xlu0 %1587 }
 0x15e   : > { %1679 = vst.msk [vmem:[#allocation3 + $0x28] sm:$0xff] %vm1673_vm13, %v1588_v46  ;;  %v5625_v46 = vld [vmem:[#allocation17_spill] sm:$0xff] }
 0x160   : > { %2029 = vrot.lane.b32.xlu2 %v1948_v14, %s3711_s15  ;;  %v2593_v14 = vsel %vm5623_vm2, %v5625_v46, 0.0 }
 0x162   : > { %2254 = vrot.lane.b32.xlu1 %v4190_v34, %s3710_s14  ;;  %v1598_v62 = vpop.permute.xlu2 %1597 }
 0x163   : > { %1995 = vrot.lane.b32.xlu0 %v1899_v44, %s3711_s15  ;;  %1684 = vst.msk [vmem:[#allocation3 + $0x50] sm:$0xff] %vm1673_vm13, %v1598_v62  ;;  %v5626_v44 = vld [vmem:[#allocation8_spill] sm:$0xff] }
 0x164   : > { %v1584_v63 = vpop.permute.xlu1 %1583  ;;  %vm5627_vm12 = vnez %v5626_v44  ;;  %v2128_v44 = vld [vmem:[#allocation2 + $0x47] sm:$0xff] }
 0x165   : > { %1677 = vst.msk [vmem:[#allocation3 + $0x18] sm:$0xff] %vm1673_vm13, %v1584_v63  ;;  %v1594_v17 = vpop.permute.xlu0 %1593  ;;  %v1934_v62 = vsel %vm5627_vm12, %v2543_v48, 0.0  ;;  %v2126_v63 = vld [vmem:[#allocation2 + $0x37] sm:$0xff]  ;;  %v3560_v48 = vld [vmem:[%s5423_s1 + $0x20] sm:$0xff] }
 0x166   : > { %1682 = vst.msk [vmem:[#allocation3 + $0x40] sm:$0xff] %vm1673_vm13, %v1594_v17 }
 0x168   : > { %2445 = vrot.lane.b32.xlu2 %v2365_v24, %s3712_s16 }
 0x16a   : > { %2670 = vrot.lane.b32.xlu1 %v4218_v4, %s3713_s17  ;;  %v1604_v20 = vpop.permute.xlu2 %1603 }
 0x16b   : > { %2222 = vrot.lane.b32.xlu0 %v4000_v8, %s3710_s14  ;;  %1687 = vst.msk [vmem:[#allocation3 + $0x68] sm:$0xff] %vm1673_vm13, %v1604_v20  ;;  %v2158_v20 = vsel %vm3961_vm4, %v2126_v63, 0.0  ;;  %vm2091_vm4 = vcmask 195744   ;;  %v4718_v63 = vld [vmem:[#allocation2 + $0x51] sm:$0xff] }
 0x16c   : > { %v1590_v34 = vpop.permute.xlu1 %1589 }
 0x16d   : > { %1680 = vst.msk [vmem:[#allocation3 + $0x30] sm:$0xff] %vm1673_vm13, %v1590_v34  ;;  %v1600_v11 = vpop.permute.xlu0 %1599  ;;  %v3563_v34 = vld [vmem:[%s5423_s1 + $0x38] sm:$0xff] }
 0x16e   : > { %1685 = vst.msk [vmem:[#allocation3 + $0x58] sm:$0xff] %vm1673_vm13, %v1600_v11  ;;  %3573 = vmatpush.bf16.msra.mxu2 %v3563_v34  ;;  %2883 = vmatpush.bf16.msra.mxu0 %v3563_v34  ;;  %v3069_v34 = vld [vmem:[%s3835_s10 + $0x88] sm:$0xff] }
 0x170   : > { %2672 = vrot.lane.b32.xlu2 %v2591_v13, %s3713_s17 }
 0x172   : > { %1997 = vrot.lane.b32.xlu1 %v1932_v3, %s3711_s15  ;;  %v1610_v8 = vpop.permute.xlu2 %1609  ;;  %3574 = vmatpush.bf16.msra.mxu2 %v3562_v52 }
 0x173   : > { %1806 = vrot.lane.b32.xlu0 %v2365_v24, %s3709_s13  ;;  %1690 = vst.msk [vmem:[#allocation3 + $0x80] sm:$0xff] %vm1673_vm13, %v1610_v8  ;;  %v4633_v24 = vld [vmem:[#allocation2 + $0x41] sm:$0xff]  ;;  %2884 = vmatpush.bf16.msra.mxu0 %v3562_v52  ;;  %v2178_v52 = vsel %vm5618_vm0, %v4283_v59, 0.0  ;;  %v1921_v59 = vld [vmem:[#allocation2 + $0xc9] sm:$0xff] }
 0x174   : > { %v1596_v55 = vpop.permute.xlu1 %1595  ;;  %v2577_v11 = vsel %vm5627_vm12, %v4633_v24, 0.0  ;;  %vm2734_vm12 = vcmask 294144  }
 0x175   : > { %1683 = vst.msk [vmem:[#allocation3 + $0x48] sm:$0xff] %vm1673_vm13, %v1596_v55  ;;  %v1606_v1 = vpop.permute.xlu0 %1605  ;;  %v3561_v55 = vld [vmem:[%s5423_s1 + $0x28] sm:$0xff] }
 0x176   : > { %1688 = vst.msk [vmem:[#allocation3 + $0x70] sm:$0xff] %vm1673_vm13, %v1606_v1  ;;  %3575 = vmatpush.bf16.msra.mxu2 %v3561_v55 }
 0x177   : > { %2885 = vmatpush.bf16.msra.mxu0 %v3561_v55 }
 0x178   : > { %2220 = vrot.lane.b32.xlu2 %v2156_v32, %s3710_s14 }
 0x17a   : > { %2413 = vrot.lane.b32.xlu1 %v4508_v10, %s3712_s16  ;;  %v1616_v7 = vpop.permute.xlu2 %1615  ;;  %3576 = vmatpush.bf16.msra.mxu2 %v3560_v48 }
 0x17b   : > { %2640 = vrot.lane.b32.xlu0 %v2575_v5, %s3713_s17  ;;  %1693 = vst.msk [vmem:[#allocation3 + $0x98] sm:$0xff] %vm1673_vm13, %v1616_v7  ;;  %2886 = vmatpush.bf16.msra.mxu0 %v3560_v48  ;;  %v1919_v5 = vld [vmem:[#allocation2 + $0xb9] sm:$0xff]  ;;  %v4674_v7 = vld [vmem:[#allocation2 + $0xd0] sm:$0xff] }
 0x17c   : > { %v1602_v30 = vpop.permute.xlu1 %1601  ;;  %v2546_v48 = vld [vmem:[#allocation2 + $0x49] sm:$0xff] }
 0x17d   : > { %1686 = vst.msk [vmem:[#allocation3 + $0x60] sm:$0xff] %vm1673_vm13, %v1602_v30  ;;  %v1612_v37 = vpop.permute.xlu0 %1611 }
 0x17e   : > { %1691 = vst.msk [vmem:[#allocation3 + $0x88] sm:$0xff] %vm1673_vm13, %v1612_v37  ;;  %v1920_v37 = vld [vmem:[#allocation2 + $0xc1] sm:$0xff] }
 0x180   : > { %2415 = vrot.lane.b32.xlu2 %v4491_v53, %s3712_s16 }
 0x182   : > { %1808 = vrot.lane.b32.xlu1 %v2366_v60, %s3709_s13  ;;  %v1622_v51 = vpop.permute.xlu2 %1621  ;;  %v2367_v60 = vld [vmem:[#allocation2 + $0xb8] sm:$0xff] }
 0x183   : > { %2256 = vrot.lane.b32.xlu0 %v2174_v31, %s3710_s14  ;;  %1696 = vst.msk [vmem:[#allocation3 + $0xb0] sm:$0xff] %vm1673_vm13, %v1622_v51  ;;  %v3558_v31 = vld [vmem:[%s5423_s1 + $0x10] sm:$0xff] }
 0x184   : > { %v1608_v10 = vpop.permute.xlu1 %1607 }
 0x185   : > { %1689 = vst.msk [vmem:[#allocation3 + $0x78] sm:$0xff] %vm1673_vm13, %v1608_v10  ;;  %v1618_v25 = vpop.permute.xlu0 %1617 }
 0x186   : > { %1694 = vst.msk [vmem:[#allocation3 + $0xa0] sm:$0xff] %vm1673_vm13, %v1618_v25  ;;  %v5628_v25 = vld [vmem:[#allocation16_spill] sm:$0xff] }
 0x188   : > { %2638 = vrot.lane.b32.xlu2 %v2542_v6, %s3713_s17 }
 0x18a   : > { %2031 = vrot.lane.b32.xlu1 %v4218_v4, %s3711_s15  ;;  %v1628_v61 = vpop.permute.xlu2 %1627 }
 0x18b   : > { %2451 = vrot.lane.b32.xlu0 %v4595_v16, %s3712_s16  ;;  %1699 = vst.msk [vmem:[#allocation3 + $0xc8] sm:$0xff] %vm1673_vm13, %v1628_v61 }
 0x18c   : > { %v1614_v40 = vpop.permute.xlu1 %1613 }
 0x18d   : > { %1692 = vst.msk [vmem:[#allocation3 + $0x90] sm:$0xff] %vm1673_vm13, %v1614_v40  ;;  %v1624_v53 = vpop.permute.xlu0 %1623  ;;  %v3556_v40 = vld [vmem:[%s5423_s1] sm:$0xff] }
 0x18e   : > { %1697 = vst.msk [vmem:[#allocation3 + $0xb8] sm:$0xff] %vm1673_vm13, %v1624_v53 }
 0x190   : > { %2033 = vrot.lane.b32.xlu2 %v1950_v23, %s3711_s15 }
 0x192   : > { %2258 = vrot.lane.b32.xlu1 %v4238_v39, %s3710_s14  ;;  %v1634_v4 = vpop.permute.xlu2 %1633 }
 0x193   : > { %1999 = vrot.lane.b32.xlu0 %v2542_v6, %s3711_s15  ;;  %1702 = vst.msk [vmem:[#allocation3 + $0xe0] sm:$0xff] %vm1673_vm13, %v1634_v4  ;;  %v2369_v4 = vld [vmem:[#allocation2 + $0xc8] sm:$0xff] }
 0x194   : > { %v1620_v47 = vpop.permute.xlu1 %1619 }
 0x195   : > { %1695 = vst.msk [vmem:[#allocation3 + $0xa8] sm:$0xff] %vm1673_vm13, %v1620_v47  ;;  %v1630_v33 = vpop.permute.xlu0 %1629  ;;  %v2129_v47 = vld [vmem:[#allocation2 + $0x4f] sm:$0xff] }
 0x196   : > { %1700 = vst.msk [vmem:[#allocation3 + $0xd0] sm:$0xff] %vm1673_vm13, %v1630_v33  ;;  %v5630_v33 = vld [vmem:[#allocation20_spill] sm:$0xff] }
 0x198   : > { %2449 = vrot.lane.b32.xlu2 %v2367_v60, %s3712_s16 }
 0x19a   : > { %2674 = vrot.lane.b32.xlu1 %v5624_v22, %s3713_s17  ;;  %v1640_v35 = vpop.permute.xlu2 %1639 }
 0x19b   : > { %2226 = vrot.lane.b32.xlu0 %v4041_v27, %s3710_s14  ;;  %1705 = vst.msk [vmem:[#allocation3 + $0xf8] sm:$0xff] %vm1673_vm13, %v1640_v35 }
 0x19c   : > { %v1626_v39 = vpop.permute.xlu1 %1625 }
 0x19d   : > { %1698 = vst.msk [vmem:[#allocation3 + $0xc0] sm:$0xff] %vm1673_vm13, %v1626_v39  ;;  %v1636_v58 = vpop.permute.xlu0 %1635 }
 0x19e   : > { %1703 = vst.msk [vmem:[#allocation3 + $0xe8] sm:$0xff] %vm1673_vm13, %v1636_v58  ;;  %v5631_v58 = vld [vmem:[#allocation9_spill] sm:$0xff] }
 0x19f   : > { %vm5632_vm2 = vnez %v5631_v58 }
 0x1a0   : > { %2676 = vrot.lane.b32.xlu2 %v2593_v14, %s3713_s17  ;;  %v1936_v46 = vsel %vm5632_vm2, %v4633_v24, 0.0 }
 0x1a2   : > { %2001 = vrot.lane.b32.xlu1 %v1934_v62, %s3711_s15  ;;  %v1775_v27 = vpop.permute.xlu2 %1774 }
 0x1a3   : > { %1810 = vrot.lane.b32.xlu0 %v2367_v60, %s3709_s13  ;;  %1869 = vst.msk [vmem:[#allocation3 + $0x10] sm:$0xff] %vm1866_vm11, %v1775_v27  ;;  %v4702_v60 = vld [vmem:[#allocation2 + $0xd1] sm:$0xff] }
 0x1a4   : > { %v1632_v17 = vpop.permute.xlu1 %1631 }
 0x1a5   : > { %1701 = vst.msk [vmem:[#allocation3 + $0xd8] sm:$0xff] %vm1673_vm13, %v1632_v17  ;;  %v1771_v21 = vpop.permute.xlu0 %1770  ;;  %v2160_v17 = vsel %vm3969_vm5, %v2128_v44, 0.0  ;;  %vm5634_vm5 = vcmask 31744  }
 0x1a6   : > { %1867 = vst.msk [vmem:[#allocation3] sm:$0xff] %vm1866_vm11, %v1771_v21  ;;  %v2579_v21 = vsel %vm5632_vm2, %v4718_v63, 0.0  ;;  %vm5635_vm0 = vmmov %vm5634_vm5 }
 0x1a7   : > { %vm5638_vm2 = vmmov %vm5635_vm0 }
 0x1a8   : > { %2224 = vrot.lane.b32.xlu2 %v2158_v20, %s3710_s14 }
 0x1aa   : > { %2417 = vrot.lane.b32.xlu1 %v4511_v19, %s3712_s16  ;;  %v1781_v13 = vpop.permute.xlu2 %1780  ;;  %v2176_v19 = vsel %vm5614_vm9, %v4236_v38, 0.0  ;;  %v2544_v38 = vld [vmem:[#allocation2 + $0x39] sm:$0xff]  ;;  %vm5629_vm9 = vnez %v5628_v25 }
 0x1ab   : > { %2644 = vrot.lane.b32.xlu0 %v2577_v11, %s3713_s17  ;;  %1872 = vst.msk [vmem:[#allocation3 + $0x28] sm:$0xff] %vm1866_vm11, %v1781_v13  ;;  %v1952_v6 = vsel %vm5629_vm9, %v1920_v37, 0.0  ;;  %v2595_v39 = vsel %vm5629_vm9, %v4702_v60, 0.0  ;;  %v5633_v13 = vmov 0.0   ;;  %v4771_v25 = vld [vmem:[#allocation2 + $0xd9] sm:$0xff] }
 0x1ac   : > { %v1638_v3 = vpop.permute.xlu1 %1637 }
 0x1ad   : > { %1704 = vst.msk [vmem:[#allocation3 + $0xf0] sm:$0xff] %vm1673_vm13, %v1638_v3  ;;  %v1777_v8 = vpop.permute.xlu0 %1776  ;;  %vm2316_vm13 = vcmask 228544  }
 0x1ae   : > { %1870 = vst.msk [vmem:[#allocation3 + $0x18] sm:$0xff] %vm1866_vm11, %v1777_v8 }
 0x1b0   : > { %2419 = vrot.lane.b32.xlu2 %v4520_v57, %s3712_s16  ;;  %v3559_v57 = vld [vmem:[%s5423_s1 + $0x18] sm:$0xff] }
 0x1b1   : > { %3577 = vmatpush.bf16.msra.mxu2 %v3559_v57  ;;  %2887 = vmatpush.bf16.msra.mxu0 %v3559_v57 }
 0x1b2   : > { %1812 = vrot.lane.b32.xlu1 %v4595_v16, %s3709_s13  ;;  %v1803_v1 = vpop.permute.xlu2 %1802  ;;  %v3557_v16 = vld [vmem:[%s5423_s1 + $0x8] sm:$0xff] }
 0x1b3   : > { %2260 = vrot.lane.b32.xlu0 %v2176_v19, %s3710_s14  ;;  %1883 = vst.msk [vmem:[#allocation3 + $0x80] sm:$0xff] %vm1866_vm11, %v1803_v1  ;;  %v3068_v19 = vld [vmem:[%s3835_s10 + $0x80] sm:$0xff] }
 0x1b4   : > { %v1773_v32 = vpop.permute.xlu1 %1772 }
 0x1b5   : > { %1868 = vst.msk [vmem:[#allocation3 + $0x8] sm:$0xff] %vm1866_vm11, %v1773_v32  ;;  %v1783_v36 = vpop.permute.xlu0 %1782  ;;  %3578 = vmatpush.bf16.msra.mxu2 %v3558_v31  ;;  %2888 = vmatpush.bf16.msra.mxu0 %v3558_v31  ;;  %v2371_v31 = vld [vmem:[#allocation2 + $0xd8] sm:$0xff] }
 0x1b6   : > { %1873 = vst.msk [vmem:[#allocation3 + $0x30] sm:$0xff] %vm1866_vm11, %v1783_v36 }
 0x1b8   : > { %2642 = vrot.lane.b32.xlu2 %v2544_v38, %s3713_s17 }
 0x1b9   : > { %3579 = vmatpush.bf16.msra.mxu2 %v3557_v16  ;;  %2889 = vmatpush.bf16.msra.mxu0 %v3557_v16  ;;  %v3053_v16 = vld [vmem:[%s3835_s10 + $0x8] sm:$0xff] }
 0x1ba   : > { %2035 = vrot.lane.b32.xlu1 %v1919_v5, %s3711_s15  ;;  %v2030_v30 = vpop.permute.xlu2 %2029 }
 0x1bb   : > { %2455 = vrot.lane.b32.xlu0 %v4674_v7, %s3712_s16 }
 0x1bc   : > { %v1779_v51 = vpop.permute.xlu1 %1778 }
 0x1bd   : > { %1871 = vst.msk [vmem:[#allocation3 + $0x20] sm:$0xff] %vm1866_vm11, %v1779_v51  ;;  %v1805_v10 = vpop.permute.xlu0 %1804  ;;  %3580 = vmatpush.bf16.msra.mxu2 %v3556_v40  ;;  %2890 = vmatpush.bf16.msra.mxu0 %v3556_v40  ;;  %v4781_v40 = vld [vmem:[#allocation2 + $0xe1] sm:$0xff] }
 0x1be   : > { %1884 = vst.msk [vmem:[#allocation3 + $0x88] sm:$0xff] %vm1866_vm11, %v1805_v10  ;;  %v3052_v10 = vld [vmem:[%s3835_s10] sm:$0xff] }
 0x1bf   : > { %2109 = vst.msk [vmem:[#allocation3 + $0x88] sm:$0xff] %vm2091_vm4, %v2030_v30 }
 0x1c0   : > { %2037 = vrot.lane.b32.xlu2 %v1952_v6, %s3711_s15 }
 0x1c2   : > { %2262 = vrot.lane.b32.xlu1 %v4304_v2, %s3710_s14  ;;  %v2446_v61 = vpop.permute.xlu2 %2445 }
 0x1c3   : > { %2003 = vrot.lane.b32.xlu0 %v2544_v38, %s3711_s15  ;;  %v5636_v38 = vld [vmem:[#allocation18_spill] sm:$0xff] }
 0x1c4   : > { %v1785_v53 = vpop.permute.xlu1 %1784  ;;  %vm5637_vm9 = vnez %v5636_v38  ;;  %v4851_v38 = vld [vmem:[#allocation2 + $0xe8] sm:$0xff] }
 0x1c5   : > { %1874 = vst.msk [vmem:[#allocation3 + $0x38] sm:$0xff] %vm1866_vm11, %v1785_v53  ;;  %v2253_v23 = vpop.permute.xlu0 %2252  ;;  %v1954_v57 = vsel %vm5637_vm9, %v4702_v60, 0.0  ;;  %v2130_v60 = vld [vmem:[#allocation2 + $0x57] sm:$0xff] }
 0x1c6   : > { %v2162_v58 = vsel %vm4003_vm8, %v2130_v60, 0.0  ;;  %vm5642_vm8 = vmmov %vm5638_vm2 }
 0x1c8   : > { %2453 = vrot.lane.b32.xlu2 %v2369_v4, %s3712_s16 }
 0x1ca   : > { %2678 = vrot.lane.b32.xlu1 %v5630_v33, %s3713_s17  ;;  %v2673_v2 = vpop.permute.xlu2 %2672 }
 0x1cb   : > { %2230 = vrot.lane.b32.xlu0 %v2129_v47, %s3710_s14  ;;  %v5640_v47 = vld [vmem:[#allocation7_spill] sm:$0xff] }
 0x1cc   : > { %v2028_v22 = vpop.permute.xlu1 %2027 }
 0x1cd   : > { %2108 = vst.msk [vmem:[#allocation3 + $0x80] sm:$0xff] %vm2091_vm4, %v2028_v22  ;;  %v2448_v35 = vpop.permute.xlu0 %2447 }
 0x1ce   : > { %2333 = vst.msk [vmem:[#allocation3 + $0x80] sm:$0xff] %vm2316_vm13, %v2253_v23 }
 0x1cf   : > { %2526 = vst.msk [vmem:[#allocation3 + $0x80] sm:$0xff] %vm2509_vm3, %v2446_v61 }
 0x1d0   : > { %2680 = vrot.lane.b32.xlu2 %v2595_v39, %s3713_s17  ;;  %v4797_v39 = vld [vmem:[#allocation2 + $0x61] sm:$0xff] }
 0x1d2   : > { %2005 = vrot.lane.b32.xlu1 %v1936_v46, %s3711_s15  ;;  %v2221_v14 = vpop.permute.xlu2 %2220  ;;  %v2355_v46 = vld [vmem:[#allocation2 + $0x58] sm:$0xff] }
 0x1d3   : > { %1814 = vrot.lane.b32.xlu0 %v2369_v4, %s3709_s13  ;;  %v2597_v4 = vsel %vm5637_vm9, %v4781_v40, 0.0 }
 0x1d4   : > { %v2255_v62 = vpop.permute.xlu1 %2254 }
 0x1d5   : > { %2334 = vst.msk [vmem:[#allocation3 + $0x88] sm:$0xff] %vm2316_vm13, %v2255_v62  ;;  %v1996_v27 = vpop.permute.xlu0 %1995 }
 0x1d6   : > { %2527 = vst.msk [vmem:[#allocation3 + $0x88] sm:$0xff] %vm2509_vm3, %v2448_v35 }
 0x1d7   : > { %2752 = vst.msk [vmem:[#allocation3 + $0x88] sm:$0xff] %vm2734_vm12, %v2673_v2 }
 0x1d8   : > { %2092 = vst.msk [vmem:[#allocation3] sm:$0xff] %vm2091_vm4, %v1996_v27  ;;  %2228 = vrot.lane.b32.xlu2 %v2160_v17, %s3710_s14  ;;  %v3071_v27 = vld [vmem:[%s3835_s10 + $0x98] sm:$0xff]  ;;  %v4813_v17 = vld [vmem:[#allocation2 + $0x60] sm:$0xff] }
 0x1d9   : > { %2317 = vst.msk [vmem:[#allocation3] sm:$0xff] %vm2316_vm13, %v2221_v14 }
 0x1da   : > { %2421 = vrot.lane.b32.xlu1 %v4500_v56, %s3712_s16  ;;  %v2416_v24 = vpop.permute.xlu2 %2415 }
 0x1db   : > { %2648 = vrot.lane.b32.xlu0 %v2579_v21, %s3713_s17 }
 0x1dc   : > { %v2671_v54 = vpop.permute.xlu1 %2670 }
 0x1dd   : > { %2751 = vst.msk [vmem:[#allocation3 + $0x80] sm:$0xff] %vm2734_vm12, %v2671_v54  ;;  %v2223_v20 = vpop.permute.xlu0 %2222 }
 0x1de   : > { %v2784_v11 = vld [vmem:[#allocation3 + $0x88] sm:$0xff] }
 0x1df   : > { %3037 = vst [vmem:[#allocation3 + $0x88] sm:$0xff] %v5633_v13 }
 0x1e0   : > { %3101 = vst.msk [vmem:[#allocation3 + $0x88] sm:$0xff] %vm5634_vm5, %v3069_v34  ;;  %2423 = vrot.lane.b32.xlu2 %v4523_v28, %s3712_s16  ;;  %vm5639_vm5 = vmmov %vm5635_vm0 }
 0x1e2   : > { %1816 = vrot.lane.b32.xlu1 %v4674_v7, %s3709_s13  ;;  %v2639_v56 = vpop.permute.xlu2 %2638 }
 0x1e3   : > { %2264 = vrot.lane.b32.xlu0 %v2178_v52, %s3710_s14  ;;  %v3070_v52 = vld [vmem:[%s3835_s10 + $0x90] sm:$0xff] }
 0x1e4   : > { %v1998_v3 = vpop.permute.xlu1 %1997  ;;  %v2783_v8 = vld [vmem:[#allocation3 + $0x80] sm:$0xff] }
 0x1e5   : > { %2093 = vst.msk [vmem:[#allocation3 + $0x8] sm:$0xff] %vm2091_vm4, %v1998_v3  ;;  %v2807_v55 = vpack.c.bf16 %v2784_v11, %v2783_v8  ;;  %v1807_v1 = vpop.permute.xlu0 %1806  ;;  %v4826_v3 = vld [vmem:[#allocation2 + $0x59] sm:$0xff] }
 0x1e6   : > { %2318 = vst.msk [vmem:[#allocation3 + $0x8] sm:$0xff] %vm2316_vm13, %v2223_v20 }
 0x1e7   : > { %2931 = vmatmul.bf16.vlgmr.msra.gmra.mxu2 %v2807_v55  ;;  %3036 = vst [vmem:[#allocation3 + $0x80] sm:$0xff] %v5633_v13 }
 0x1e8   : > { %3100 = vst.msk [vmem:[#allocation3 + $0x80] sm:$0xff] %vm5635_vm0, %v3068_v19  ;;  %2646 = vrot.lane.b32.xlu2 %v2546_v48, %s3713_s17  ;;  %vm5641_vm0 = vnez %v5640_v47  ;;  %v3571_v47 = vld [vmem:[%s5425_s3 + $0x38] sm:$0xff] }
 0x1e9   : > { %2511 = vst.msk [vmem:[#allocation3 + $0x8] sm:$0xff] %vm2509_vm3, %v2416_v24  ;;  %v1938_v33 = vsel %vm5641_vm0, %v4718_v63, 0.0  ;;  %v2581_v14 = vsel %vm5641_vm0, %v4797_v39, 0.0  ;;  %v2148_v63 = vld [vmem:[#allocation2 + $0xe7] sm:$0xff]  ;;  %vm5648_vm0 = vmmov %vm5639_vm5  ;;  %3581 = vmatpush.bf16.msra.mxu3 %v3571_v47  ;;  %3184 = vmatpush.bf16.msra.mxu1 %v3571_v47  ;;  %v5008_v47 = vld [vmem:[%s5424_s2] ss:$0 sm:$0xff] }
 0x1ea   : > { %2039 = vrot.lane.b32.xlu1 %v1921_v59, %s3711_s15  ;;  %1885 = vst.msk [vmem:[#allocation3 + $0x90] sm:$0xff] %vm1866_vm11, %v1807_v1  ;;  %v2034_v28 = vpop.permute.xlu2 %2033  ;;  %v2180_v24 = vsel %vm5619_vm14, %v2148_v63, 0.0  ;;  %vm5643_vm14 = vmmov %vm5638_vm2  ;;  %v5644_v1 = vld [vmem:[#allocation15_spill] sm:$0xff] }
 0x1eb   : > { %2459 = vrot.lane.b32.xlu0 %v4750_v41, %s3712_s16  ;;  %vm5645_vm9 = vnez %v5644_v1  ;;  %v2149_v59 = vld [vmem:[#allocation2 + $0xef] sm:$0xff] }
 0x1ec   : > { %v2414_v32 = vpop.permute.xlu1 %2413 }
 0x1ed   : > { %2510 = vst.msk [vmem:[#allocation3] sm:$0xff] %vm2509_vm3, %v2414_v32  ;;  %v2641_v36 = vpop.permute.xlu0 %2640  ;;  %3582 = vmatpush.bf16.msra.mxu3 %v3570_v26  ;;  %3185 = vmatpush.bf16.msra.mxu1 %v3570_v26 }
 0x1ee   : > { %2735 = vst.msk [vmem:[#allocation3] sm:$0xff] %vm2734_vm12, %v2639_v56 }
 0x1ef   : > { %2736 = vst.msk [vmem:[#allocation3 + $0x8] sm:$0xff] %vm2734_vm12, %v2641_v36 }
 0x1f0   : > { %2041 = vrot.lane.b32.xlu2 %v1954_v57, %s3711_s15 }
 0x1f2   : > { %2266 = vrot.lane.b32.xlu1 %v4281_v43, %s3710_s14  ;;  %v2450_v5 = vpop.permute.xlu2 %2449  ;;  %v2131_v43 = vld [vmem:[#allocation2 + $0x5f] sm:$0xff] }
 0x1f3   : > { %2007 = vrot.lane.b32.xlu0 %v2546_v48, %s3711_s15  ;;  %v1956_v48 = vsel %vm5645_vm9, %v4781_v40, 0.0 }
 0x1f4   : > { %v1809_v7 = vpop.permute.xlu1 %1808 }
 0x1f5   : > { %1886 = vst.msk [vmem:[#allocation3 + $0x98] sm:$0xff] %vm1866_vm11, %v1809_v7  ;;  %v2257_v30 = vpop.permute.xlu0 %2256  ;;  %v2767_v37 = vld [vmem:[#allocation3] sm:$0xff] }
 0x1f6   : > { %2111 = vst.msk [vmem:[#allocation3 + $0x98] sm:$0xff] %vm2091_vm4, %v2034_v28  ;;  %v2768_v51 = vld [vmem:[#allocation3 + $0x8] sm:$0xff]  ;;  %v2566_v7 = vld [vmem:[#allocation2 + $0xe9] sm:$0xff] }
 0x1f7   : > { %v2799_v6 = vpack.c.bf16 %v2768_v51, %v2767_v37  ;;  %3020 = vst [vmem:[#allocation3] sm:$0xff] %v5633_v13  ;;  %v3055_v37 = vld [vmem:[%s3835_s10 + $0x18] sm:$0xff] }
 0x1f8   : > { %3021 = vst [vmem:[#allocation3 + $0x8] sm:$0xff] %v5633_v13  ;;  %2457 = vrot.lane.b32.xlu2 %v2371_v31, %s3712_s16 }
 0x1f9   : > { %2891 = vmatmul.bf16.vlgmr.msra.gmra.mxu0 %v2799_v6  ;;  %3084 = vst.msk [vmem:[#allocation3] sm:$0xff] %vm5638_vm2, %v3052_v10 }
 0x1fa   : > { %2682 = vrot.lane.b32.xlu1 %v4771_v25, %s3713_s17  ;;  %3085 = vst.msk [vmem:[#allocation3 + $0x8] sm:$0xff] %vm5639_vm5, %v3053_v16  ;;  %v2677_v61 = vpop.permute.xlu2 %2676 }
 0x1fb   : > { %2234 = vrot.lane.b32.xlu0 %v2131_v43, %s3710_s14 }
 0x1fc   : > { %v2032_v53 = vpop.permute.xlu1 %2031 }
 0x1fd   : > { %2110 = vst.msk [vmem:[#allocation3 + $0x90] sm:$0xff] %vm2091_vm4, %v2032_v53  ;;  %v2452_v23 = vpop.permute.xlu0 %2451 }
 0x1fe   : > { %2335 = vst.msk [vmem:[#allocation3 + $0x90] sm:$0xff] %vm2316_vm13, %v2257_v30 }
 0x1ff   : > { %2528 = vst.msk [vmem:[#allocation3 + $0x90] sm:$0xff] %vm2509_vm3, %v2450_v5  ;;  %v3054_v5 = vld [vmem:[%s3835_s10 + $0x10] sm:$0xff] }
 0x200   : > { %2684 = vrot.lane.b32.xlu2 %v2597_v4, %s3713_s17 }
 0x202   : > { %2009 = vrot.lane.b32.xlu1 %v1938_v33, %s3711_s15  ;;  %v2225_v2 = vpop.permute.xlu2 %2224 }
 0x203   : > { %1818 = vrot.lane.b32.xlu0 %v2371_v31, %s3709_s13  ;;  %v5646_v31 = vld [vmem:[#allocation11_spill] sm:$0xff] }
 0x204   : > { %v2259_v22 = vpop.permute.xlu1 %2258  ;;  %vm5647_vm2 = vnez %v5646_v31  ;;  %v4976_v31 = vld [vmem:[#allocation2 + $0x101] sm:$0xff] }
 0x205   : > { %2336 = vst.msk [vmem:[#allocation3 + $0x98] sm:$0xff] %vm2316_vm13, %v2259_v22  ;;  %v2000_v35 = vpop.permute.xlu0 %1999  ;;  %v1940_v51 = vsel %vm5647_vm2, %v4797_v39, 0.0  ;;  %v2133_v39 = vld [vmem:[#allocation2 + $0x6f] sm:$0xff] }
 0x206   : > { %2529 = vst.msk [vmem:[#allocation3 + $0x98] sm:$0xff] %vm2509_vm3, %v2452_v23  ;;  %v2132_v23 = vld [vmem:[#allocation2 + $0x67] sm:$0xff] }
 0x207   : > { %2754 = vst.msk [vmem:[#allocation3 + $0x98] sm:$0xff] %vm2734_vm12, %v2677_v61  ;;  %v4875_v61 = vld [vmem:[#allocation2 + $0x68] sm:$0xff]  ;;  %v2164_v33 = vsel %vm4037_vm10, %v2132_v23, 0.0  ;;  %vm5649_vm10 = vmmov %vm5648_vm0 }
 0x208   : > { %2094 = vst.msk [vmem:[#allocation3 + $0x10] sm:$0xff] %vm2091_vm4, %v2000_v35  ;;  %2232 = vrot.lane.b32.xlu2 %v2162_v58, %s3710_s14  ;;  %v3073_v35 = vld [vmem:[%s3835_s10 + $0xa8] sm:$0xff] }
 0x209   : > { %2319 = vst.msk [vmem:[#allocation3 + $0x10] sm:$0xff] %vm2316_vm13, %v2225_v2 }
 0x20a   : > { %2425 = vrot.lane.b32.xlu1 %v2355_v46, %s3712_s16  ;;  %v2420_v44 = vpop.permute.xlu2 %2419 }
 0x20b   : > { %2652 = vrot.lane.b32.xlu0 %v2581_v14, %s3713_s17  ;;  %v3569_v14 = vld [vmem:[%s5425_s3 + $0x28] sm:$0xff] }
 0x20c   : > { %v2675_v9 = vpop.permute.xlu1 %2674  ;;  %3583 = vmatpush.bf16.msra.mxu3 %v3569_v14  ;;  %3186 = vmatpush.bf16.msra.mxu1 %v3569_v14 }
 0x20d   : > { %2753 = vst.msk [vmem:[#allocation3 + $0x90] sm:$0xff] %vm2734_vm12, %v2675_v9  ;;  %v2227_v62 = vpop.permute.xlu0 %2226 }
 0x20e   : > { %v2786_v21 = vld [vmem:[#allocation3 + $0x98] sm:$0xff] }
 0x20f   : > { %3039 = vst [vmem:[#allocation3 + $0x98] sm:$0xff] %v5633_v13 }
 0x210   : > { %3103 = vst.msk [vmem:[#allocation3 + $0x98] sm:$0xff] %vm5642_vm8, %v3071_v27  ;;  %2427 = vrot.lane.b32.xlu2 %v4813_v17, %s3712_s16  ;;  %v3568_v27 = vld [vmem:[%s5425_s3 + $0x20] sm:$0xff]  ;;  %vm5650_vm8 = vmmov %vm5648_vm0 }
 0x211   : > { %3584 = vmatpush.bf16.msra.mxu3 %v3568_v27  ;;  %3187 = vmatpush.bf16.msra.mxu1 %v3568_v27 }
 0x212   : > { %1820 = vrot.lane.b32.xlu1 %v4750_v41, %s3709_s13  ;;  %v2643_v54 = vpop.permute.xlu2 %2642 }
 0x213   : > { %2268 = vrot.lane.b32.xlu0 %v2180_v24, %s3710_s14  ;;  %v3567_v24 = vld [vmem:[%s5425_s3 + $0x18] sm:$0xff] }
 0x214   : > { %v2002_v20 = vpop.permute.xlu1 %2001  ;;  %v2785_v34 = vld [vmem:[#allocation3 + $0x90] sm:$0xff] }
 0x215   : > { %2095 = vst.msk [vmem:[#allocation3 + $0x18] sm:$0xff] %vm2091_vm4, %v2002_v20  ;;  %v2808_v11 = vpack.c.bf16 %v2786_v21, %v2785_v34  ;;  %v1811_v56 = vpop.permute.xlu0 %1810  ;;  %v2151_v20 = vld [vmem:[#allocation2 + $0xff] sm:$0xff]  ;;  %3585 = vmatpush.bf16.msra.mxu3 %v3567_v24  ;;  %3188 = vmatpush.bf16.msra.mxu1 %v3567_v24 }
 0x216   : > { %2320 = vst.msk [vmem:[#allocation3 + $0x18] sm:$0xff] %vm2316_vm13, %v2227_v62  ;;  %v5027_v24 = vld [vmem:[#allocation2 + $0x78] sm:$0xff] }
 0x217   : > { %2936 = vmatmul.bf16.gmra.mxu2 %v2808_v11  ;;  %3038 = vst [vmem:[#allocation3 + $0x90] sm:$0xff] %v5633_v13  ;;  %v4932_v11 = vld [vmem:[#allocation2 + $0x71] sm:$0xff] }
 0x218   : > { %3102 = vst.msk [vmem:[#allocation3 + $0x90] sm:$0xff] %vm5643_vm14, %v3070_v52  ;;  %2650 = vrot.lane.b32.xlu2 %v4826_v3, %s3713_s17  ;;  %vm5651_vm14 = vmmov %vm5648_vm0 }
 0x219   : > { %2513 = vst.msk [vmem:[#allocation3 + $0x18] sm:$0xff] %vm2509_vm3, %v2420_v44 }
 0x21a   : > { %2043 = vrot.lane.b32.xlu1 %v4771_v25, %s3711_s15  ;;  %1887 = vst.msk [vmem:[#allocation3 + $0xa0] sm:$0xff] %vm1866_vm11, %v1811_v56  ;;  %v2038_v8 = vpop.permute.xlu2 %2037  ;;  %v4866_v25 = vld [vmem:[#allocation2 + $0xf1] sm:$0xff] }
 0x21b   : > { %2463 = vrot.lane.b32.xlu0 %v4831_v42, %s3712_s16  ;;  %v2599_v43 = vsel %vm5645_vm9, %v4866_v25, 0.0  ;;  %v3566_v56 = vld [vmem:[%s5425_s3 + $0x10] sm:$0xff]  ;;  %vm5653_vm9 = vnez %v5532_v49  ;;  %v4996_v49 = vld [vmem:[#allocation2 + $0x80] sm:$0xff] }
 0x21c   : > { %v2418_v55 = vpop.permute.xlu1 %2417  ;;  %3586 = vmatpush.bf16.msra.mxu3 %v3566_v56  ;;  %3189 = vmatpush.bf16.msra.mxu1 %v3566_v56  ;;  %v5042_v56 = vld [vmem:[#allocation2 + $0x81] sm:$0xff] }
 0x21d   : > { %2512 = vst.msk [vmem:[#allocation3 + $0x10] sm:$0xff] %vm2509_vm3, %v2418_v55  ;;  %v2645_v19 = vpop.permute.xlu0 %2644  ;;  %v1958_v55 = vsel %vm4317_vm7, %v4866_v25, 0.0  ;;  %v4979_v25 = vld [vmem:[#allocation2 + $0x100] sm:$0xff] }
 0x21e   : > { %2737 = vst.msk [vmem:[#allocation3 + $0x10] sm:$0xff] %vm2734_vm12, %v2643_v54  ;;  %v4923_v54 = vld [vmem:[#allocation2 + $0x69] sm:$0xff] }
 0x21f   : > { %2738 = vst.msk [vmem:[#allocation3 + $0x18] sm:$0xff] %vm2734_vm12, %v2645_v19  ;;  %v4950_v19 = vld [vmem:[#allocation2 + $0xf9] sm:$0xff] }
 0x220   : > { %2045 = vrot.lane.b32.xlu2 %v1956_v48, %s3711_s15  ;;  %v2150_v48 = vld [vmem:[#allocation2 + $0xf7] sm:$0xff] }
 0x222   : > { %2270 = vrot.lane.b32.xlu1 %v2149_v59, %s3710_s14  ;;  %v2454_v41 = vpop.permute.xlu2 %2453 }
 0x223   : > { %1786 = vrot.lane.b32.xlu0 %v2355_v46, %s3709_s13  ;;  %v4902_v46 = vld [vmem:[#allocation2 + $0x70] sm:$0xff] }
 0x224   : > { %v1813_v28 = vpop.permute.xlu1 %1812 }
 0x225   : > { %1888 = vst.msk [vmem:[#allocation3 + $0xa8] sm:$0xff] %vm1866_vm11, %v1813_v28  ;;  %v2261_v32 = vpop.permute.xlu0 %2260  ;;  %v2769_v36 = vld [vmem:[#allocation3 + $0x10] sm:$0xff] }
 0x226   : > { %2113 = vst.msk [vmem:[#allocation3 + $0xa8] sm:$0xff] %vm2091_vm4, %v2038_v8  ;;  %v2770_v57 = vld [vmem:[#allocation3 + $0x18] sm:$0xff] }
 0x227   : > { %v2800_v30 = vpack.c.bf16 %v2770_v57, %v2769_v36  ;;  %3022 = vst [vmem:[#allocation3 + $0x10] sm:$0xff] %v5633_v13  ;;  %v3565_v8 = vld [vmem:[%s5425_s3 + $0x8] sm:$0xff]  ;;  %v2182_v36 = vsel %vm5617_vm15, %v2150_v48, 0.0  ;;  %v3056_v57 = vld [vmem:[%s3835_s10 + $0x20] sm:$0xff]  ;;  %vm5652_vm15 = vmmov %vm5648_vm0 }
 0x228   : > { %3023 = vst [vmem:[#allocation3 + $0x18] sm:$0xff] %v5633_v13  ;;  %2461 = vrot.lane.b32.xlu2 %v4851_v38, %s3712_s16  ;;  %3587 = vmatpush.bf16.msra.mxu3 %v3565_v8  ;;  %v5052_v48 = vld [vmem:[#allocation2 + $0x108] sm:$0xff] }
 0x229   : > { %2896 = vmatmul.bf16.gmra.mxu0 %v2800_v30  ;;  %3086 = vst.msk [vmem:[#allocation3 + $0x10] sm:$0xff] %vm5639_vm5, %v3054_v5  ;;  %3190 = vmatpush.bf16.msra.mxu1 %v3565_v8  ;;  %v4964_v5 = vld [vmem:[#allocation2 + $0xf8] sm:$0xff]  ;;  %v3057_v30 = vld [vmem:[%s3835_s10 + $0x28] sm:$0xff]  ;;  %vm5657_vm5 = vmmov %vm5648_vm0 }
 0x22a   : > { %2686 = vrot.lane.b32.xlu1 %v2566_v7, %s3713_s17  ;;  %3087 = vst.msk [vmem:[#allocation3 + $0x18] sm:$0xff] %vm5648_vm0, %v3055_v37  ;;  %v2681_v10 = vpop.permute.xlu2 %2680 }
 0x22b   : > { %2013 = vrot.lane.b32.xlu0 %v1940_v51, %s3711_s15 }
 0x22c   : > { %v2036_v6 = vpop.permute.xlu1 %2035 }
 0x22d   : > { %2112 = vst.msk [vmem:[#allocation3 + $0xa0] sm:$0xff] %vm2091_vm4, %v2036_v6  ;;  %v2456_v16 = vpop.permute.xlu0 %2455  ;;  %v2601_v6 = vsel %vm4317_vm7, %v4976_v31, 0.0 }
 0x22e   : > { %2337 = vst.msk [vmem:[#allocation3 + $0xa0] sm:$0xff] %vm2316_vm13, %v2261_v32 }
 0x22f   : > { %2530 = vst.msk [vmem:[#allocation3 + $0xa0] sm:$0xff] %vm2509_vm3, %v2454_v41  ;;  %v3564_v41 = vld [vmem:[%s5425_s3] sm:$0xff] }
 0x230   : > { %2688 = vrot.lane.b32.xlu2 %v2599_v43, %s3713_s17  ;;  %3588 = vmatpush.bf16.msra.mxu3 %v3564_v41 }
 0x231   : > { %3191 = vmatpush.bf16.msra.mxu1 %v3564_v41 }
 0x232   : > { %1788 = vrot.lane.b32.xlu1 %v4813_v17, %s3709_s13  ;;  %v2229_v40 = vpop.permute.xlu2 %2228  ;;  %v3072_v17 = vld [vmem:[%s3835_s10 + $0xa0] sm:$0xff] }
 0x233   : > { %2429 = vrot.lane.b32.xlu0 %v4875_v61, %s3712_s16 }
 0x234   : > { %v2263_v53 = vpop.permute.xlu1 %2262 }
 0x235   : > { %2338 = vst.msk [vmem:[#allocation3 + $0xa8] sm:$0xff] %vm2316_vm13, %v2263_v53  ;;  %v2004_v4 = vpop.permute.xlu0 %2003 }
 0x236   : > { %2531 = vst.msk [vmem:[#allocation3 + $0xa8] sm:$0xff] %vm2509_vm3, %v2456_v16 }
 0x237   : > { %2756 = vst.msk [vmem:[#allocation3 + $0xa8] sm:$0xff] %vm2734_vm12, %v2681_v10  ;;  %v2134_v10 = vld [vmem:[#allocation2 + $0x77] sm:$0xff] }
 0x238   : > { %2096 = vst.msk [vmem:[#allocation3 + $0x20] sm:$0xff] %vm2091_vm4, %v2004_v4  ;;  %2011 = vrot.lane.b32.xlu2 %v4826_v3, %s3711_s15  ;;  %v2166_v16 = vsel %vm5653_vm9, %v2134_v10, 0.0 }
 0x239   : > { %2321 = vst.msk [vmem:[#allocation3 + $0x20] sm:$0xff] %vm2316_vm13, %v2229_v40 }
 0x23a   : > { %2236 = vrot.lane.b32.xlu1 %v2164_v33, %s3710_s14  ;;  %v2424_v2 = vpop.permute.xlu2 %2423 }
 0x23b   : > { %1824 = vrot.lane.b32.xlu0 %v4831_v42, %s3709_s13  ;;  %v2583_v42 = vsel %vm5647_vm2, %v4932_v11, 0.0  ;;  %vm5656_vm2 = vmmov %vm5648_vm0  ;;  %vm5658_vm0 = vnez %v5601_v29  ;;  %v5080_v29 = vld [vmem:[#allocation2 + $0x110] sm:$0xff] }
 0x23c   : > { %v2679_v60 = vpop.permute.xlu1 %2678  ;;  %vm5665_vm9 = vmmov %vm5656_vm2 }
 0x23d   : > { %2755 = vst.msk [vmem:[#allocation3 + $0xa0] sm:$0xff] %vm2734_vm12, %v2679_v60  ;;  %v2231_v22 = vpop.permute.xlu0 %2230 }
 0x23e   : > { %v2788_v58 = vld [vmem:[#allocation3 + $0xa8] sm:$0xff] }
 0x23f   : > { %3041 = vst [vmem:[#allocation3 + $0xa8] sm:$0xff] %v5633_v13 }
 0x240   : > { %3105 = vst.msk [vmem:[#allocation3 + $0xa8] sm:$0xff] %vm5649_vm10, %v3073_v35  ;;  %2238 = vrot.lane.b32.xlu2 %v2133_v39, %s3710_s14  ;;  %v5017_v35 = vld [vmem:[#allocation2 + $0x79] sm:$0xff]  ;;  %vm5659_vm10 = vmmov %vm5656_vm2 }
 0x242   : > { %2431 = vrot.lane.b32.xlu1 %v4902_v46, %s3712_s16  ;;  %v2647_v44 = vpop.permute.xlu2 %2646 }
 0x243   : > { %2047 = vrot.lane.b32.xlu0 %v2566_v7, %s3711_s15 }
 0x244   : > { %v2006_v9 = vpop.permute.xlu1 %2005  ;;  %v2787_v62 = vld [vmem:[#allocation3 + $0xa0] sm:$0xff] }
 0x245   : > { %2097 = vst.msk [vmem:[#allocation3 + $0x28] sm:$0xff] %vm2091_vm4, %v2006_v9  ;;  %v2809_v63 = vpack.c.bf16 %v2788_v58, %v2787_v62  ;;  %v1815_v21 = vpop.permute.xlu0 %1814 }
 0x246   : > { %2322 = vst.msk [vmem:[#allocation3 + $0x28] sm:$0xff] %vm2316_vm13, %v2231_v22  ;;  %v2135_v22 = vld [vmem:[#allocation2 + $0x7f] sm:$0xff] }
 0x247   : > { %2941 = vmatmul.bf16.gmra.mxu2 %v2809_v63  ;;  %3040 = vst [vmem:[#allocation3 + $0xa0] sm:$0xff] %v5633_v13 }
 0x248   : > { %3104 = vst.msk [vmem:[#allocation3 + $0xa0] sm:$0xff] %vm5650_vm8, %v3072_v17  ;;  %1822 = vrot.lane.b32.xlu2 %v4851_v38, %s3709_s13  ;;  %v3074_v17 = vld [vmem:[%s3835_s10 + $0xb0] sm:$0xff]  ;;  %vm5660_vm8 = vmmov %vm5656_vm2 }
 0x249   : > { %2515 = vst.msk [vmem:[#allocation3 + $0x28] sm:$0xff] %vm2509_vm3, %v2424_v2  ;;  %v5654_v2 = vld [vmem:[#allocation12_spill] sm:$0xff] }
 0x24a   : > { %2654 = vrot.lane.b32.xlu1 %v4923_v54, %s3713_s17  ;;  %1889 = vst.msk [vmem:[#allocation3 + $0xb0] sm:$0xff] %vm1866_vm11, %v1815_v21  ;;  %v2042_v34 = vpop.permute.xlu2 %2041  ;;  %vm5655_vm7 = vnez %v5654_v2  ;;  %v3077_v2 = vld [vmem:[%s3835_s10 + $0xc8] sm:$0xff] }
 0x24b   : > { %2274 = vrot.lane.b32.xlu0 %v2151_v20, %s3710_s14  ;;  %v1942_v60 = vsel %vm5655_vm7, %v4932_v11, 0.0 }
 0x24c   : > { %v2422_v52 = vpop.permute.xlu1 %2421 }
 0x24d   : > { %2514 = vst.msk [vmem:[#allocation3 + $0x20] sm:$0xff] %vm2509_vm3, %v2422_v52  ;;  %v2649_v3 = vpop.permute.xlu0 %2648 }
 0x24e   : > { %2739 = vst.msk [vmem:[#allocation3 + $0x20] sm:$0xff] %vm2734_vm12, %v2647_v44 }
 0x24f   : > { %2740 = vst.msk [vmem:[#allocation3 + $0x28] sm:$0xff] %vm2734_vm12, %v2649_v3 }
 0x250   : > { %2656 = vrot.lane.b32.xlu2 %v2583_v42, %s3713_s17 }
 0x252   : > { %2049 = vrot.lane.b32.xlu1 %v1958_v55, %s3711_s15  ;;  %v2458_v1 = vpop.permute.xlu2 %2457  ;;  %v2585_v55 = vsel %vm5655_vm7, %v5042_v56, 0.0  ;;  %vm5668_vm7 = vmmov %vm5656_vm2 }
 0x253   : > { %2690 = vrot.lane.b32.xlu0 %v4950_v19, %s3713_s17 }
 0x254   : > { %v1817_v59 = vpop.permute.xlu1 %1816 }
 0x255   : > { %1890 = vst.msk [vmem:[#allocation3 + $0xb8] sm:$0xff] %vm1866_vm11, %v1817_v59  ;;  %v2265_v28 = vpop.permute.xlu0 %2264  ;;  %v2771_v32 = vld [vmem:[#allocation3 + $0x20] sm:$0xff] }
 0x256   : > { %2115 = vst.msk [vmem:[#allocation3 + $0xb8] sm:$0xff] %vm2091_vm4, %v2042_v34  ;;  %v2772_v38 = vld [vmem:[#allocation3 + $0x28] sm:$0xff]  ;;  %v1960_v34 = vsel %vm5658_vm0, %v4976_v31, 0.0 }
 0x257   : > { %v2801_v7 = vpack.c.bf16 %v2772_v38, %v2771_v32  ;;  %3024 = vst [vmem:[#allocation3 + $0x20] sm:$0xff] %v5633_v13  ;;  %v2152_v38 = vld [vmem:[#allocation2 + $0x107] sm:$0xff] }
 0x258   : > { %3025 = vst [vmem:[#allocation3 + $0x28] sm:$0xff] %v5633_v13  ;;  %2272 = vrot.lane.b32.xlu2 %v2182_v36, %s3710_s14 }
 0x259   : > { %2901 = vmatmul.bf16.gmra.mxu0 %v2801_v7  ;;  %3088 = vst.msk [vmem:[#allocation3 + $0x20] sm:$0xff] %vm5651_vm14, %v3056_v57  ;;  %v5060_v7 = vld [vmem:[#allocation2 + $0x111] sm:$0xff]  ;;  %vm5663_vm14 = vmmov %vm5656_vm2 }
 0x25a   : > { %2465 = vrot.lane.b32.xlu1 %v4964_v5, %s3712_s16  ;;  %3089 = vst.msk [vmem:[#allocation3 + $0x28] sm:$0xff] %vm5652_vm15, %v3057_v30  ;;  %v2685_v18 = vpop.permute.xlu2 %2684  ;;  %v2603_v10 = vsel %vm5658_vm0, %v5060_v7, 0.0  ;;  %vm5664_vm15 = vnez %v5534_v50  ;;  %vm5671_vm0 = vnez %v5539_v15 }
 0x25b   : > { %1792 = vrot.lane.b32.xlu0 %v4902_v46, %s3709_s13 }
 0x25c   : > { %v2040_v37 = vpop.permute.xlu1 %2039 }
 0x25d   : > { %2114 = vst.msk [vmem:[#allocation3 + $0xb0] sm:$0xff] %vm2091_vm4, %v2040_v37  ;;  %v2460_v51 = vpop.permute.xlu0 %2459  ;;  %v2184_v37 = vsel %vm4327_vm6, %v2152_v38, 0.0 }
 0x25e   : > { %2339 = vst.msk [vmem:[#allocation3 + $0xb0] sm:$0xff] %vm2316_vm13, %v2265_v28 }
 0x25f   : > { %2532 = vst.msk [vmem:[#allocation3 + $0xb0] sm:$0xff] %vm2509_vm3, %v2458_v1 }
 0x260   : > { %2467 = vrot.lane.b32.xlu2 %v4979_v25, %s3712_s16 }
 0x262   : > { %2692 = vrot.lane.b32.xlu1 %v2601_v6, %s3713_s17  ;;  %v2233_v43 = vpop.permute.xlu2 %2232 }
 0x263   : > { %2240 = vrot.lane.b32.xlu0 %v2166_v16, %s3710_s14  ;;  %v2153_v16 = vld [vmem:[#allocation2 + $0x10f] sm:$0xff] }
 0x264   : > { %v2267_v40 = vpop.permute.xlu1 %2266 }
 0x265   : > { %2340 = vst.msk [vmem:[#allocation3 + $0xb8] sm:$0xff] %vm2316_vm13, %v2267_v40  ;;  %v2008_v53 = vpop.permute.xlu0 %2007 }
 0x266   : > { %2533 = vst.msk [vmem:[#allocation3 + $0xb8] sm:$0xff] %vm2509_vm3, %v2460_v51  ;;  %v3059_v51 = vld [vmem:[%s3835_s10 + $0x38] sm:$0xff] }
 0x267   : > { %2758 = vst.msk [vmem:[#allocation3 + $0xb8] sm:$0xff] %vm2734_vm12, %v2685_v18  ;;  %v3058_v18 = vld [vmem:[%s3835_s10 + $0x30] sm:$0xff] }
 0x268   : > { %2098 = vst.msk [vmem:[#allocation3 + $0x30] sm:$0xff] %vm2091_vm4, %v2008_v53  ;;  %1790 = vrot.lane.b32.xlu2 %v4875_v61, %s3709_s13  ;;  %v3075_v61 = vld [vmem:[%s3835_s10 + $0xb8] sm:$0xff]  ;;  %v5089_v53 = vld [vmem:[#allocation2 + $0x109] sm:$0xff] }
 0x269   : > { %2323 = vst.msk [vmem:[#allocation3 + $0x30] sm:$0xff] %vm2316_vm13, %v2233_v43 }
 0x26a   : > { %2015 = vrot.lane.b32.xlu1 %v4923_v54, %s3711_s15  ;;  %v2932_v0 = vpop.f32.mrf.mxu2  ;;  %v2428_v23 = vpop.permute.xlu2 %2427 }
 0x26b   : > { %2435 = vrot.lane.b32.xlu0 %v4996_v49, %s3712_s16  ;;  %v2933_v39 = vadd.f32 %v5008_v47, %v2932_v0  ;;  %v2137_v0 = vld [vmem:[#allocation2 + $0x8f] sm:$0xff] }
 0x26c   : > { %v2683_v4 = vpop.permute.xlu1 %2682 }
 0x26d   : > { %2757 = vst.msk [vmem:[#allocation3 + $0xb0] sm:$0xff] %vm2734_vm12, %v2683_v4  ;;  %v2235_v33 = vpop.permute.xlu0 %2234  ;;  %v2988_v62 = vmax.f32 %v2933_v39, 0.0 }
 0x26e   : > { %v2790_v26 = vld [vmem:[#allocation3 + $0xb8] sm:$0xff] }
 0x26f   : > { %3043 = vst [vmem:[#allocation3 + $0xb8] sm:$0xff] %v5633_v13 }
 0x270   : > { %3107 = vst.msk [vmem:[#allocation3 + $0xb8] sm:$0xff] %vm5656_vm2, %v3075_v61  ;;  %2017 = vrot.lane.b32.xlu2 %v1942_v60, %s3711_s15 }
 0x272   : > { %2242 = vrot.lane.b32.xlu1 %v2135_v22, %s3710_s14  ;;  %v2934_v58 = vpop.f32.mrf.mxu2  ;;  %v2651_v46 = vpop.permute.xlu2 %2650 }
 0x273   : > { %v2935_v14 = vadd.f32 %v5008_v47, %v2934_v58  ;;  %2658 = vrot.lane.b32.xlu0 %v5017_v35, %s3713_s17 }
 0x274   : > { %v2010_v44 = vpop.permute.xlu1 %2009  ;;  %v2789_v9 = vld [vmem:[#allocation3 + $0xb0] sm:$0xff] }
 0x275   : > { %v2989_v27 = vmax.f32 %v2935_v14, 0.0  ;;  %2099 = vst.msk [vmem:[#allocation3 + $0x38] sm:$0xff] %vm2091_vm4, %v2010_v44  ;;  %v2810_v63 = vpack.c.bf16 %v2790_v26, %v2789_v9  ;;  %v1819_v21 = vpop.permute.xlu0 %1818  ;;  %v5661_v26 = vld [vmem:[#allocation10_spill] sm:$0xff] }
 0x276   : > { %2324 = vst.msk [vmem:[#allocation3 + $0x38] sm:$0xff] %vm2316_vm13, %v2235_v33  ;;  %v2892_v54 = vpop.f32.mrf.mxu0  ;;  %vm5662_vm6 = vnez %v5661_v26  ;;  %v2363_v26 = vld [vmem:[#allocation2 + $0x98] sm:$0xff] }
 0x277   : > { %2946 = vmatmul.bf16.gmra.mxu2 %v2810_v63  ;;  %3042 = vst [vmem:[#allocation3 + $0xb0] sm:$0xff] %v5633_v13  ;;  %v3012_v20 = vpack.c.bf16 %v2989_v27, %v2988_v62  ;;  %v2893_v3 = vadd.f32 %v5008_v47, %v2892_v54  ;;  %v1944_v22 = vsel %vm5662_vm6, %v5042_v56, 0.0  ;;  %v3076_v63 = vld [vmem:[%s3835_s10 + $0xc0] sm:$0xff] }
 0x278   : > { %3106 = vst.msk [vmem:[#allocation3 + $0xb0] sm:$0xff] %vm5657_vm5, %v3074_v17  ;;  %2433 = vrot.lane.b32.xlu2 %v5027_v24, %s3712_s16 }
 0x279   : > { %3232 = vmatmul.bf16.vlgmr.msra.gmra.mxu3 %v3012_v20  ;;  %2517 = vst.msk [vmem:[#allocation3 + $0x38] sm:$0xff] %vm2509_vm3, %v2428_v23  ;;  %v2972_v59 = vmax.f32 %v2893_v3, 0.0 }
 0x27a   : > { %1826 = vrot.lane.b32.xlu1 %v4964_v5, %s3709_s13  ;;  %1891 = vst.msk [vmem:[#allocation3 + $0xc0] sm:$0xff] %vm1866_vm11, %v1819_v21  ;;  %v2046_v11 = vpop.permute.xlu2 %2045  ;;  %v5117_v21 = vld [vmem:[#allocation2 + $0x91] sm:$0xff] }
 0x27b   : > { %2053 = vrot.lane.b32.xlu0 %v1960_v34, %s3711_s15  ;;  %v2361_v34 = vld [vmem:[#allocation2 + $0x88] sm:$0xff] }
 0x27c   : > { %v2426_v52 = vpop.permute.xlu1 %2425 }
 0x27d   : > { %2516 = vst.msk [vmem:[#allocation3 + $0x30] sm:$0xff] %vm2509_vm3, %v2426_v52  ;;  %v2653_v42 = vpop.permute.xlu0 %2652 }
 0x27e   : > { %2741 = vst.msk [vmem:[#allocation3 + $0x30] sm:$0xff] %vm2734_vm12, %v2651_v46  ;;  %v2894_v8 = vpop.f32.mrf.mxu0  ;;  %v2136_v46 = vld [vmem:[#allocation2 + $0x87] sm:$0xff] }
 0x27f   : > { %2742 = vst.msk [vmem:[#allocation3 + $0x38] sm:$0xff] %vm2734_vm12, %v2653_v42  ;;  %v2895_v1 = vadd.f32 %v5008_v47, %v2894_v8  ;;  %v2154_v42 = vld [vmem:[#allocation2 + $0x117] sm:$0xff] }
 0x280   : > { %1828 = vrot.lane.b32.xlu2 %v4979_v25, %s3709_s13  ;;  %v5133_v8 = vld [vmem:[#allocation2 + $0x90] sm:$0xff] }
 0x281   : > { %v2973_v41 = vmax.f32 %v2895_v1, 0.0 }
 0x282   : > { %2660 = vrot.lane.b32.xlu1 %v2585_v55, %s3713_s17  ;;  %v2462_v28 = vpop.permute.xlu2 %2461 }
 0x283   : > { %2469 = vrot.lane.b32.xlu0 %v5052_v48, %s3712_s16  ;;  %v3004_v32 = vpack.c.bf16 %v2973_v41, %v2972_v59 }
 0x284   : > { %v1821_v36 = vpop.permute.xlu1 %1820 }
 0x285   : > { %1892 = vst.msk [vmem:[#allocation3 + $0xc8] sm:$0xff] %vm1866_vm11, %v1821_v36  ;;  %3192 = vmatmul.bf16.vlgmr.msra.gmra.mxu1 %v3004_v32  ;;  %v2269_v57 = vpop.permute.xlu0 %2268  ;;  %v2773_v5 = vld [vmem:[#allocation3 + $0x30] sm:$0xff] }
 0x286   : > { %2117 = vst.msk [vmem:[#allocation3 + $0xc8] sm:$0xff] %vm2091_vm4, %v2046_v11  ;;  %v2774_v30 = vld [vmem:[#allocation3 + $0x38] sm:$0xff]  ;;  %v2587_v11 = vsel %vm5662_vm6, %v5117_v21, 0.0  ;;  %vm5674_vm6 = vmmov %vm5656_vm2 }
 0x287   : > { %v2802_v31 = vpack.c.bf16 %v2774_v30, %v2773_v5  ;;  %3026 = vst [vmem:[#allocation3 + $0x30] sm:$0xff] %v5633_v13 }
 0x288   : > { %3027 = vst [vmem:[#allocation3 + $0x38] sm:$0xff] %v5633_v13  ;;  %2051 = vrot.lane.b32.xlu2 %v4950_v19, %s3711_s15 }
 0x289   : > { %2906 = vmatmul.bf16.gmra.mxu0 %v2802_v31  ;;  %3090 = vst.msk [vmem:[#allocation3 + $0x30] sm:$0xff] %vm5659_vm10, %v3058_v18  ;;  %v3061_v18 = vld [vmem:[%s3835_s10 + $0x48] sm:$0xff]  ;;  %vm5672_vm10 = vmmov %vm5656_vm2 }
 0x28a   : > { %2276 = vrot.lane.b32.xlu1 %v2184_v37, %s3710_s14  ;;  %3091 = vst.msk [vmem:[#allocation3 + $0x38] sm:$0xff] %vm5660_vm8, %v3059_v51  ;;  %v2689_v45 = vpop.permute.xlu2 %2688  ;;  %v5666_v51 = vld [vmem:[#allocation19_spill] sm:$0xff]  ;;  %vm5673_vm8 = vmmov %vm5656_vm2 }
 0x28b   : > { %2696 = vrot.lane.b32.xlu0 %v2603_v10, %s3713_s17 }
 0x28c   : > { %v2044_v25 = vpop.permute.xlu1 %2043 }
 0x28d   : > { %2116 = vst.msk [vmem:[#allocation3 + $0xc0] sm:$0xff] %vm2091_vm4, %v2044_v25  ;;  %v2464_v6 = vpop.permute.xlu0 %2463 }
 0x28e   : > { %2341 = vst.msk [vmem:[#allocation3 + $0xc0] sm:$0xff] %vm2316_vm13, %v2269_v57  ;;  %v2380_v57 = vld [vmem:[#allocation2 + $0x120] sm:$0xff] }
 0x28f   : > { %2534 = vst.msk [vmem:[#allocation3 + $0xc0] sm:$0xff] %vm2509_vm3, %v2462_v28 }
 0x290   : > { %2278 = vrot.lane.b32.xlu2 %v2153_v16, %s3710_s14 }
 0x292   : > { %2471 = vrot.lane.b32.xlu1 %v5080_v29, %s3712_s16  ;;  %v2012_v19 = vpop.permute.xlu2 %2011 }
 0x293   : > { %2019 = vrot.lane.b32.xlu0 %v5017_v35, %s3711_s15 }
 0x294   : > { %v2271_v43 = vpop.permute.xlu1 %2270 }
 0x295   : > { %2342 = vst.msk [vmem:[#allocation3 + $0xc8] sm:$0xff] %vm2316_vm13, %v2271_v43  ;;  %v1787_v40 = vpop.permute.xlu0 %1786  ;;  %v2379_v43 = vld [vmem:[#allocation2 + $0x118] sm:$0xff] }
 0x296   : > { %2535 = vst.msk [vmem:[#allocation3 + $0xc8] sm:$0xff] %vm2509_vm3, %v2464_v6 }
 0x297   : > { %2760 = vst.msk [vmem:[#allocation3 + $0xc8] sm:$0xff] %vm2734_vm12, %v2689_v45  ;;  %v2155_v45 = vld [vmem:[#allocation2 + $0x11f] sm:$0xff] }
 0x298   : > { %1875 = vst.msk [vmem:[#allocation3 + $0x40] sm:$0xff] %vm1866_vm11, %v1787_v40  ;;  %2694 = vrot.lane.b32.xlu2 %v5089_v53, %s3713_s17  ;;  %v2572_v40 = vld [vmem:[#allocation2 + $0x119] sm:$0xff] }
 0x299   : > { %2100 = vst.msk [vmem:[#allocation3 + $0x40] sm:$0xff] %vm2091_vm4, %v2012_v19 }
 0x29a   : > { %1794 = vrot.lane.b32.xlu1 %v5027_v24, %s3709_s13  ;;  %v2937_v23 = vpop.f32.mrf.mxu2  ;;  %v2239_v4 = vpop.permute.xlu2 %2238  ;;  %v2168_v24 = vsel %vm5664_vm15, %v2136_v46, 0.0  ;;  %vm5676_vm15 = vmmov %vm5656_vm2 }
 0x29b   : > { %2246 = vrot.lane.b32.xlu0 %v2137_v0, %s3710_s14  ;;  %v2938_v35 = vadd.f32 %v5008_v47, %v2937_v23 }
 0x29c   : > { %v2687_v33 = vpop.permute.xlu1 %2686 }
 0x29d   : > { %2759 = vst.msk [vmem:[#allocation3 + $0xc0] sm:$0xff] %vm2734_vm12, %v2687_v33  ;;  %v2014_v61 = vpop.permute.xlu0 %2013  ;;  %v2990_v62 = vmax.f32 %v2938_v35, 0.0  ;;  %v2573_v33 = vld [vmem:[#allocation2 + $0x121] sm:$0xff] }
 0x29e   : > { %v2792_v60 = vld [vmem:[#allocation3 + $0xc8] sm:$0xff] }
 0x29f   : > { %3045 = vst [vmem:[#allocation3 + $0xc8] sm:$0xff] %v5633_v13 }
 0x2a0   : > { %3109 = vst.msk [vmem:[#allocation3 + $0xc8] sm:$0xff] %vm5663_vm14, %v3077_v2  ;;  %1796 = vrot.lane.b32.xlu2 %v4996_v49, %s3709_s13  ;;  %vm5675_vm14 = vmmov %vm5656_vm2 }
 0x2a2   : > { %2021 = vrot.lane.b32.xlu1 %v1944_v22, %s3711_s15  ;;  %v2939_v39 = vpop.f32.mrf.mxu2  ;;  %v1823_v58 = vpop.permute.xlu2 %1822 }
 0x2a3   : > { %v2940_v14 = vadd.f32 %v5008_v47, %v2939_v39  ;;  %1830 = vrot.lane.b32.xlu0 %v5052_v48, %s3709_s13  ;;  %1893 = vst.msk [vmem:[#allocation3 + $0xd0] sm:$0xff] %vm1866_vm11, %v1823_v58  ;;  %v2186_v48 = vsel %vm4333_vm1, %v2154_v42, 0.0  ;;  %vm5667_vm1 = vnez %v5666_v51  ;;  %v5229_v51 = vld [vmem:[%s5426_s4] ss:$0 sm:$0xff] }
 0x2a4   : > { %v1789_v44 = vpop.permute.xlu1 %1788  ;;  %v2791_v9 = vld [vmem:[#allocation3 + $0xc0] sm:$0xff]  ;;  %v1962_v10 = vsel %vm5667_vm1, %v5060_v7, 0.0  ;;  %v3060_v7 = vld [vmem:[%s3835_s10 + $0x40] sm:$0xff] }
 0x2a5   : > { %v2991_v27 = vmax.f32 %v2940_v14, 0.0  ;;  %1876 = vst.msk [vmem:[#allocation3 + $0x48] sm:$0xff] %vm1866_vm11, %v1789_v44  ;;  %v2811_v49 = vpack.c.bf16 %v2792_v60, %v2791_v9  ;;  %v2430_v17 = vpop.permute.xlu0 %2429  ;;  %v2605_v60 = vsel %vm5667_vm1, %v2573_v33, 0.0  ;;  %v2138_v14 = vld [vmem:[#allocation2 + $0x97] sm:$0xff]  ;;  %vm5678_vm1 = vmmov %vm5656_vm2 }
 0x2a6   : > { %2101 = vst.msk [vmem:[#allocation3 + $0x48] sm:$0xff] %vm2091_vm4, %v2014_v61  ;;  %v2897_v54 = vpop.f32.mrf.mxu0  ;;  %v3078_v44 = vld [vmem:[%s3835_s10 + $0xd0] sm:$0xff] }
 0x2a7   : > { %2951 = vmatmul.bf16.gmra.mxu2 %v2811_v49  ;;  %3044 = vst [vmem:[#allocation3 + $0xc0] sm:$0xff] %v5633_v13  ;;  %v3013_v20 = vpack.c.bf16 %v2991_v27, %v2990_v62  ;;  %v2898_v56 = vadd.f32 %v5008_v47, %v2897_v54 }
 0x2a8   : > { %3108 = vst.msk [vmem:[#allocation3 + $0xc0] sm:$0xff] %vm5665_vm9, %v3076_v63  ;;  %2244 = vrot.lane.b32.xlu2 %v2168_v24, %s3710_s14  ;;  %v2557_v63 = vld [vmem:[#allocation2 + $0xa1] sm:$0xff]  ;;  %v2170_v24 = vsel %vm5671_vm0, %v2138_v14, 0.0  ;;  %vm5677_vm9 = vmmov %vm5656_vm2 }
 0x2a9   : > { %3237 = vmatmul.bf16.gmra.mxu3 %v3013_v20  ;;  %2326 = vst.msk [vmem:[#allocation3 + $0x48] sm:$0xff] %vm2316_vm13, %v2239_v4  ;;  %v2974_v59 = vmax.f32 %v2898_v56, 0.0 }
 0x2aa   : > { %2437 = vrot.lane.b32.xlu1 %v2361_v34, %s3712_s16  ;;  %v2657_v50 = vpop.permute.xlu2 %2656 }
 0x2ab   : > { %2664 = vrot.lane.b32.xlu0 %v2587_v11, %s3713_s17 }
 0x2ac   : > { %v2237_v52 = vpop.permute.xlu1 %2236 }
 0x2ad   : > { %2325 = vst.msk [vmem:[#allocation3 + $0x40] sm:$0xff] %vm2316_vm13, %v2237_v52  ;;  %v1825_v3 = vpop.permute.xlu0 %1824  ;;  %v3079_v52 = vld [vmem:[%s3835_s10 + $0xd8] sm:$0xff] }
 0x2ae   : > { %2518 = vst.msk [vmem:[#allocation3 + $0x40] sm:$0xff] %vm2509_vm3, %v2430_v17  ;;  %v2899_v55 = vpop.f32.mrf.mxu0 }
 0x2af   : > { %1894 = vst.msk [vmem:[#allocation3 + $0xd8] sm:$0xff] %vm1866_vm11, %v1825_v3  ;;  %v2900_v1 = vadd.f32 %v5008_v47, %v2899_v55  ;;  %v2139_v3 = vld [vmem:[#allocation2 + $0x9f] sm:$0xff] }
 0x2b0   : > { %2439 = vrot.lane.b32.xlu2 %v5133_v8, %s3712_s16 }
 0x2b1   : > { %v2975_v41 = vmax.f32 %v2900_v1, 0.0 }
 0x2b2   : > { %1832 = vrot.lane.b32.xlu1 %v5080_v29, %s3709_s13  ;;  %v2273_v28 = vpop.permute.xlu2 %2272 }
 0x2b3   : > { %2280 = vrot.lane.b32.xlu0 %v2186_v48, %s3710_s14  ;;  %v3005_v32 = vpack.c.bf16 %v2975_v41, %v2974_v59 }
 0x2b4   : > { %v2432_v36 = vpop.permute.xlu1 %2431 }
 0x2b5   : > { %2519 = vst.msk [vmem:[#allocation3 + $0x48] sm:$0xff] %vm2509_vm3, %v2432_v36  ;;  %3197 = vmatmul.bf16.gmra.mxu1 %v3005_v32  ;;  %v2048_v38 = vpop.permute.xlu0 %2047  ;;  %v2556_v36 = vld [vmem:[#allocation2 + $0x99] sm:$0xff] }
 0x2b6   : > { %2744 = vst.msk [vmem:[#allocation3 + $0x48] sm:$0xff] %vm2734_vm12, %v2657_v50 }
 0x2b7   : > { %2118 = vst.msk [vmem:[#allocation3 + $0xd0] sm:$0xff] %vm2091_vm4, %v2048_v38 }
 0x2b8   : > { %2343 = vst.msk [vmem:[#allocation3 + $0xd0] sm:$0xff] %vm2316_vm13, %v2273_v28  ;;  %2662 = vrot.lane.b32.xlu2 %v5146_v12, %s3713_s17 }
 0x2ba   : > { %2055 = vrot.lane.b32.xlu1 %v5089_v53, %s3711_s15  ;;  %v2468_v5 = vpop.permute.xlu2 %2467  ;;  %v5669_v53 = vld [vmem:[#allocation13_spill] sm:$0xff] }
 0x2bb   : > { %2475 = vrot.lane.b32.xlu0 %v2380_v57, %s3712_s16  ;;  %vm5670_vm5 = vnez %v5669_v53 }
 0x2bc   : > { %v2655_v30 = vpop.permute.xlu1 %2654  ;;  %v1946_v0 = vsel %vm5670_vm5, %v5117_v21, 0.0  ;;  %v2589_v54 = vsel %vm5670_vm5, %v2557_v63, 0.0  ;;  %vm5681_vm5 = vmmov %vm5678_vm1 }
 0x2bd   : > { %2743 = vst.msk [vmem:[#allocation3 + $0x40] sm:$0xff] %vm2734_vm12, %v2655_v30  ;;  %v2275_v37 = vpop.permute.xlu0 %2274  ;;  %v2776_v31 = vld [vmem:[#allocation3 + $0x48] sm:$0xff] }
 0x2be   : > { %3029 = vst [vmem:[#allocation3 + $0x48] sm:$0xff] %v5633_v13 }
 0x2bf   : > { %3093 = vst.msk [vmem:[#allocation3 + $0x48] sm:$0xff] %vm5668_vm7, %v3061_v18  ;;  %vm5679_vm7 = vmmov %vm5678_vm1 }
 0x2c0   : > { %2057 = vrot.lane.b32.xlu2 %v1962_v10, %s3711_s15 }
 0x2c2   : > { %2282 = vrot.lane.b32.xlu1 %v2155_v45, %s3710_s14  ;;  %v1791_v25 = vpop.permute.xlu2 %1790 }
 0x2c3   : > { %1798 = vrot.lane.b32.xlu0 %v2361_v34, %s3709_s13  ;;  %1877 = vst.msk [vmem:[#allocation3 + $0x50] sm:$0xff] %vm1866_vm11, %v1791_v25 }
 0x2c4   : > { %v2050_v6 = vpop.permute.xlu1 %2049  ;;  %v2775_v16 = vld [vmem:[#allocation3 + $0x40] sm:$0xff] }
 0x2c5   : > { %2119 = vst.msk [vmem:[#allocation3 + $0xd8] sm:$0xff] %vm2091_vm4, %v2050_v6  ;;  %v2803_v29 = vpack.c.bf16 %v2776_v31, %v2775_v16  ;;  %v2691_v19 = vpop.permute.xlu0 %2690  ;;  %v3289_v6 = vld [vmem:[#allocation3 + $0x80] sm:$0xff] }
 0x2c6   : > { %2344 = vst.msk [vmem:[#allocation3 + $0xd8] sm:$0xff] %vm2316_vm13, %v2275_v37 }
 0x2c7   : > { %2911 = vmatmul.bf16.gmra.mxu0 %v2803_v29  ;;  %3028 = vst [vmem:[#allocation3 + $0x40] sm:$0xff] %v5633_v13 }
 0x2c8   : > { %3092 = vst.msk [vmem:[#allocation3 + $0x40] sm:$0xff] %vm5656_vm2, %v3060_v7  ;;  %2473 = vrot.lane.b32.xlu2 %v2379_v43, %s3712_s16  ;;  %v3063_v43 = vld [vmem:[%s3835_s10 + $0x58] sm:$0xff]  ;;  %vm5680_vm2 = vmmov %vm5678_vm1 }
 0x2c9   : > { %2537 = vst.msk [vmem:[#allocation3 + $0xd8] sm:$0xff] %vm2509_vm3, %v2468_v5  ;;  %v3062_v5 = vld [vmem:[%s3835_s10 + $0x50] sm:$0xff] }
 0x2ca   : > { %2698 = vrot.lane.b32.xlu1 %v2572_v40, %s3713_s17  ;;  %v2942_v23 = vpop.f32.mrf.mxu2  ;;  %v2018_v4 = vpop.permute.xlu2 %2017 }
 0x2cb   : > { %2025 = vrot.lane.b32.xlu0 %v1946_v0, %s3711_s15  ;;  %v2943_v22 = vadd.f32 %v5008_v47, %v2942_v23 }
 0x2cc   : > { %v2466_v61 = vpop.permute.xlu1 %2465 }
 0x2cd   : > { %2536 = vst.msk [vmem:[#allocation3 + $0xd0] sm:$0xff] %vm2509_vm3, %v2466_v61  ;;  %v1793_v2 = vpop.permute.xlu0 %1792  ;;  %v2992_v9 = vmax.f32 %v2943_v22, 0.0  ;;  %v3273_v61 = vld [vmem:[#allocation3] sm:$0xff] }
 0x2ce   : > { %2761 = vst.msk [vmem:[#allocation3 + $0xd0] sm:$0xff] %vm2734_vm12, %v2691_v19 }
 0x2cf   : > { %1878 = vst.msk [vmem:[#allocation3 + $0x58] sm:$0xff] %vm1866_vm11, %v1793_v2 }
 0x2d0   : > { %2103 = vst.msk [vmem:[#allocation3 + $0x58] sm:$0xff] %vm2091_vm4, %v2018_v4  ;;  %2700 = vrot.lane.b32.xlu2 %v2605_v60, %s3713_s17 }
 0x2d2   : > { %1800 = vrot.lane.b32.xlu1 %v5133_v8, %s3709_s13  ;;  %v2944_v35 = vpop.f32.mrf.mxu2  ;;  %v2434_v39 = vpop.permute.xlu2 %2433  ;;  %v2364_v8 = vld [vmem:[#allocation2 + $0xa0] sm:$0xff] }
 0x2d3   : > { %v2945_v58 = vadd.f32 %v5008_v47, %v2944_v35  ;;  %2441 = vrot.lane.b32.xlu0 %v2363_v26, %s3712_s16  ;;  %v3290_v35 = vld [vmem:[#allocation3 + $0x88] sm:$0xff] }
 0x2d4   : > { %v2693_v46 = vpop.permute.xlu1 %2692 }
 0x2d5   : > { %v2993_v62 = vmax.f32 %v2945_v58, 0.0  ;;  %2762 = vst.msk [vmem:[#allocation3 + $0xd8] sm:$0xff] %vm2734_vm12, %v2693_v46  ;;  %v2241_v27 = vpop.permute.xlu0 %2240  ;;  %v2793_v49 = vld [vmem:[#allocation3 + $0xd0] sm:$0xff] }
 0x2d6   : > { %v2902_v17 = vpop.f32.mrf.mxu0  ;;  %3046 = vst [vmem:[#allocation3 + $0xd0] sm:$0xff] %v5633_v13 }
 0x2d7   : > { %v3014_v21 = vpack.c.bf16 %v2993_v62, %v2992_v9  ;;  %3110 = vst.msk [vmem:[#allocation3 + $0xd0] sm:$0xff] %vm5672_vm10, %v3078_v44  ;;  %v2903_v15 = vadd.f32 %v5008_v47, %v2902_v17 }
 0x2d8   : > { %2023 = vrot.lane.b32.xlu2 %v5146_v12, %s3711_s15  ;;  %s215_s15 = sand.u32 1, %s3695_s19  }
 0x2d9   : > { %3242 = vmatmul.bf16.gmra.mxu3 %v3014_v21  ;;  %v2976_v1 = vmax.f32 %v2903_v15, 0.0  ;;  %s3402_s22 = scalar_lea.sflag [#allocation5], %s215_s15 }
 0x2da   : > { %2248 = vrot.lane.b32.xlu1 %v2170_v24, %s3710_s14  ;;  %v1829_v20 = vpop.permute.xlu2 %1828  ;;  %v3080_v24 = vld [vmem:[%s3835_s10 + $0xe0] sm:$0xff] }
 0x2db   : > { %2668 = vrot.lane.b32.xlu0 %v2589_v54, %s3713_s17  ;;  %1896 = vst.msk [vmem:[#allocation3 + $0xe8] sm:$0xff] %vm1866_vm11, %v1829_v20  ;;  %v3274_v20 = vld [vmem:[#allocation3 + $0x8] sm:$0xff] }
 0x2dc   : > { %v2016_v34 = vpop.permute.xlu1 %2015  ;;  %v2794_v11 = vld [vmem:[#allocation3 + $0xd8] sm:$0xff] }
 0x2dd   : > { %2102 = vst.msk [vmem:[#allocation3 + $0x50] sm:$0xff] %vm2091_vm4, %v2016_v34  ;;  %v2812_v50 = vpack.c.bf16 %v2794_v11, %v2793_v49  ;;  %v2436_v56 = vpop.permute.xlu0 %2435 }
 0x2de   : > { %2327 = vst.msk [vmem:[#allocation3 + $0x50] sm:$0xff] %vm2316_vm13, %v2241_v27  ;;  %v2904_v42 = vpop.f32.mrf.mxu0 }
 0x2df   : > { %2956 = vmatmul.bf16.gmra.mxu2 %v2812_v50  ;;  %3047 = vst [vmem:[#allocation3 + $0xd8] sm:$0xff] %v5633_v13  ;;  %v2905_v55 = vadd.f32 %v5008_v47, %v2904_v42 }
 0x2e0   : > { %3111 = vst.msk [vmem:[#allocation3 + $0xd8] sm:$0xff] %vm5673_vm8, %v3079_v52  ;;  %2250 = vrot.lane.b32.xlu2 %v2139_v3, %s3710_s14 }
 0x2e1   : > { %2520 = vst.msk [vmem:[#allocation3 + $0x50] sm:$0xff] %vm2509_vm3, %v2434_v39  ;;  %v2977_v48 = vmax.f32 %v2905_v55, 0.0 }
 0x2e2   : > { %2443 = vrot.lane.b32.xlu1 %v2364_v8, %s3712_s16  ;;  %v2052_v59 = vpop.permute.xlu2 %2051  ;;  %s3483_s16 = sshll.u32 %s215_s15, 8 }
 0x2e3   : > { %v3006_v41 = vpack.c.bf16 %v2977_v48, %v2976_v1 }
 0x2e4   : > { %v2243_v28 = vpop.permute.xlu1 %2242 }
 0x2e5   : > { %2328 = vst.msk [vmem:[#allocation3 + $0x58] sm:$0xff] %vm2316_vm13, %v2243_v28  ;;  %3202 = vmatmul.bf16.gmra.mxu1 %v3006_v41  ;;  %v2659_v32 = vpop.permute.xlu0 %2658 }
 0x2e6   : > { %2521 = vst.msk [vmem:[#allocation3 + $0x58] sm:$0xff] %vm2509_vm3, %v2436_v56  ;;  %v3081_v56 = vld [vmem:[%s3835_s10 + $0xe8] sm:$0xff] }
 0x2e7   : > { %2745 = vst.msk [vmem:[#allocation3 + $0x50] sm:$0xff] %vm2734_vm12, %v2659_v32 }
 0x2e8   : > { %2666 = vrot.lane.b32.xlu2 %v2556_v36, %s3713_s17  ;;  %s5243_s17 = scalar_lea.vmem [#allocation4], %s3483_s16  ;;  %s3661_s16 = scalar_lea.hbm %s5427_s5, 512 }
 0x2e9   : > { %s3414_s30 = sshll.u32 %s5243_s17, 4  ;;  %p3663_p1 = scmp.lt.s32.totalorder %s3661_s16, %s3657_s8  ;;  %s3415_s30 = int_to_ptr.vmem [resolvable:$true] %s3414_s30 }
 0x2ea   : > { %v2279_v38 = vpop.permute.xlu2 %2278 }
 0x2eb   : > { %p3664_p2 = por %p3663_p1, %p3662_p0 }
 0x2ec   : > { %v1827_v12 = vpop.permute.xlu1 %1826 }
 0x2ed   : > { %1895 = vst.msk [vmem:[#allocation3 + $0xe0] sm:$0xff] %vm1866_vm11, %v1827_v12  ;;  %v2054_v57 = vpop.permute.xlu0 %2053  ;;  %p3665_p3 = pnand %p3664_p2, %p3660_p13 }
 0x2ee   : > { %2120 = vst.msk [vmem:[#allocation3 + $0xe0] sm:$0xff] %vm2091_vm4, %v2052_v59  ;;  %v2777_v30 = vld [vmem:[#allocation3 + $0x50] sm:$0xff] }
 0x2ef   : > { %2121 = vst.msk [vmem:[#allocation3 + $0xe8] sm:$0xff] %vm2091_vm4, %v2054_v57 }
 0x2f0   : > { %2346 = vst.msk [vmem:[#allocation3 + $0xe8] sm:$0xff] %vm2316_vm13, %v2279_v38 }
 0x2f1   : > { %3030 = vst [vmem:[#allocation3 + $0x50] sm:$0xff] %v5633_v13 }
 0x2f2   : > { %3094 = vst.msk [vmem:[#allocation3 + $0x50] sm:$0xff] %vm5674_vm6, %v3062_v5  ;;  %v2695_v18 = vpop.permute.xlu2 %2694 }
 0x2f4   : > { %v2661_v37 = vpop.permute.xlu1 %2660 }
 0x2f5   : > { %2746 = vst.msk [vmem:[#allocation3 + $0x58] sm:$0xff] %vm2734_vm12, %v2661_v37  ;;  %v2470_v31 = vpop.permute.xlu0 %2469 }
 0x2fa   : > { %v2947_v10 = vpop.f32.mrf.mxu2  ;;  %v1797_v45 = vpop.permute.xlu2 %1796 }
 0x2fb   : > { %1880 = vst.msk [vmem:[#allocation3 + $0x68] sm:$0xff] %vm1866_vm11, %v1797_v45  ;;  %v2948_v0 = vadd.f32 %v5008_v47, %v2947_v10  ;;  %v3064_v45 = vld [vmem:[%s3835_s10 + $0x60] sm:$0xff] }
 0x2fc   : > { %v3233_v25 = vpop.f32.mrf.mxu3  ;;  %v2277_v16 = vpop.permute.xlu1 %2276  ;;  %v2778_v29 = vld [vmem:[#allocation3 + $0x58] sm:$0xff] }
 0x2fd   : > { %v3234_v7 = vadd.f32 %v5229_v51, %v3233_v25  ;;  %2345 = vst.msk [vmem:[#allocation3 + $0xe0] sm:$0xff] %vm2316_vm13, %v2277_v16  ;;  %v2804_v19 = vpack.c.bf16 %v2778_v29, %v2777_v30  ;;  %v2697_v40 = vpop.permute.xlu0 %2696  ;;  %v2994_v58 = vmax.f32 %v2948_v0, 0.0 }
 0x2fe   : > { %2538 = vst.msk [vmem:[#allocation3 + $0xe0] sm:$0xff] %vm2509_vm3, %v2470_v31 }
 0x2ff   : > { %v3321_v53 = vadd.f32 %v3289_v6, %v3234_v7  ;;  %2916 = vmatmul.bf16.gmra.mxu0 %v2804_v19  ;;  %3031 = vst [vmem:[#allocation3 + $0x58] sm:$0xff] %v5633_v13  ;;  %v3065_v6 = vld [vmem:[%s3835_s10 + $0x68] sm:$0xff]  ;;  %v3291_v7 = vld [vmem:[#allocation3 + $0x90] sm:$0xff] }
 0x300   : > { %3095 = vst.msk [vmem:[#allocation3 + $0x58] sm:$0xff] %vm5675_vm14, %v3063_v43 }
 0x301   : > { %v3353_v23 = vmax.f32 %v3321_v53, 0.0  ;;  %2763 = vst.msk [vmem:[#allocation3 + $0xe0] sm:$0xff] %vm2734_vm12, %v2695_v18 }
 0x302   : > { %v2949_v4 = vpop.f32.mrf.mxu2  ;;  %v3193_v33 = vpop.f32.mrf.mxu1 }
 0x303   : > { %3385 = vst [vmem:[%s5243_s17 + $0x80] sm:$0xff] %v3353_v23  ;;  %v2950_v2 = vadd.f32 %v5008_v47, %v2949_v4  ;;  %v3194_v60 = vadd.f32 %v5229_v51, %v3193_v33  ;;  %v2245_v26 = vpop.permute.xlu2 %2244 }
 0x304   : > { %v3235_v22 = vpop.f32.mrf.mxu3  ;;  %v2472_v39 = vpop.permute.xlu1 %2471 }
 0x305   : > { %v2995_v46 = vmax.f32 %v2950_v2, 0.0  ;;  %v3236_v14 = vadd.f32 %v5229_v51, %v3235_v22  ;;  %2539 = vst.msk [vmem:[#allocation3 + $0xe8] sm:$0xff] %vm2509_vm3, %v2472_v39  ;;  %v3305_v44 = vadd.f32 %v3273_v61, %v3194_v60  ;;  %v2020_v9 = vpop.permute.xlu0 %2019  ;;  %v3275_v2 = vld [vmem:[#allocation3 + $0x10] sm:$0xff] }
 0x306   : > { %2764 = vst.msk [vmem:[#allocation3 + $0xe8] sm:$0xff] %vm2734_vm12, %v2697_v40  ;;  %v2907_v62 = vpop.f32.mrf.mxu0 }
 0x307   : > { %v3322_v27 = vadd.f32 %v3290_v35, %v3236_v14  ;;  %v3337_v49 = vmax.f32 %v3305_v44, 0.0  ;;  %v3015_v63 = vpack.c.bf16 %v2995_v46, %v2994_v58  ;;  %v2908_v50 = vadd.f32 %v5008_v47, %v2907_v62  ;;  %v3292_v35 = vld [vmem:[#allocation3 + $0x98] sm:$0xff] }
 0x308   : > { %v2795_v21 = vld [vmem:[#allocation3 + $0xe0] sm:$0xff] }
 0x309   : > { %v3354_v17 = vmax.f32 %v3322_v27, 0.0  ;;  %3369 = vst [vmem:[%s5243_s17] sm:$0xff] %v3337_v49  ;;  %3247 = vmatmul.bf16.gmra.mxu3 %v3015_v63  ;;  %v2978_v59 = vmax.f32 %v2908_v50, 0.0 }
 0x30a   : > { %3048 = vst [vmem:[#allocation3 + $0xe0] sm:$0xff] %v5633_v13  ;;  %v3195_v54 = vpop.f32.mrf.mxu1 }
 0x30b   : > { %3386 = vst [vmem:[%s5243_s17 + $0x88] sm:$0xff] %v3354_v17  ;;  %v3196_v34 = vadd.f32 %v5229_v51, %v3195_v54  ;;  %v2440_v11 = vpop.permute.xlu2 %2439 }
 0x30c   : > { %v1795_v15 = vpop.permute.xlu1 %1794  ;;  %3112 = vst.msk [vmem:[#allocation3 + $0xe0] sm:$0xff] %vm5676_vm15, %v3080_v24  ;;  %v3276_v24 = vld [vmem:[#allocation3 + $0x18] sm:$0xff] }
 0x30d   : > { %1879 = vst.msk [vmem:[#allocation3 + $0x60] sm:$0xff] %vm1866_vm11, %v1795_v15  ;;  %v2796_v52 = vld [vmem:[#allocation3 + $0xe8] sm:$0xff]  ;;  %v3306_v3 = vadd.f32 %v3274_v20, %v3196_v34  ;;  %v2247_v42 = vpop.permute.xlu0 %2246 }
 0x30e   : > { %2104 = vst.msk [vmem:[#allocation3 + $0x60] sm:$0xff] %vm2091_vm4, %v2020_v9  ;;  %v2813_v8 = vpack.c.bf16 %v2796_v52, %v2795_v21  ;;  %v2909_v55 = vpop.f32.mrf.mxu0 }
 0x30f   : > { %3049 = vst [vmem:[#allocation3 + $0xe8] sm:$0xff] %v5633_v13  ;;  %v3338_v1 = vmax.f32 %v3306_v3, 0.0  ;;  %v2910_v48 = vadd.f32 %v5008_v47, %v2909_v55 }
 0x310   : > { %2961 = vmatmul.bf16.gmra.mxu2 %v2813_v8  ;;  %3113 = vst.msk [vmem:[#allocation3 + $0xe8] sm:$0xff] %vm5677_vm9, %v3081_v56 }
 0x311   : > { %3370 = vst [vmem:[%s5243_s17 + $0x8] sm:$0xff] %v3338_v1  ;;  %v2979_v41 = vmax.f32 %v2910_v48, 0.0  ;;  %v3082_v1 = vld [vmem:[%s3835_s10 + $0xf0] sm:$0xff] }
 0x312   : > { %2329 = vst.msk [vmem:[#allocation3 + $0x60] sm:$0xff] %vm2316_vm13, %v2245_v26 }
 0x313   : > { %v3007_v28 = vpack.c.bf16 %v2979_v41, %v2978_v59  ;;  %v2663_v32 = vpop.permute.xlu2 %2662 }
 0x314   : > { %v2022_v36 = vpop.permute.xlu1 %2021 }
 0x315   : > { %2105 = vst.msk [vmem:[#allocation3 + $0x68] sm:$0xff] %vm2091_vm4, %v2022_v36  ;;  %3207 = vmatmul.bf16.gmra.mxu1 %v3007_v28  ;;  %v1831_v38 = vpop.permute.xlu0 %1830 }
 0x316   : > { %2330 = vst.msk [vmem:[#allocation3 + $0x68] sm:$0xff] %vm2316_vm13, %v2247_v42 }
 0x317   : > { %2523 = vst.msk [vmem:[#allocation3 + $0x68] sm:$0xff] %vm2509_vm3, %v2440_v11  ;;  %v3083_v11 = vld [vmem:[%s3835_s10 + $0xf8] sm:$0xff] }
 0x318   : > { %1897 = vst.msk [vmem:[#allocation3 + $0xf0] sm:$0xff] %vm1866_vm11, %v1831_v38 }
 0x31b   : > { %v2058_v12 = vpop.permute.xlu2 %2057 }
 0x31c   : > { %v2438_v57 = vpop.permute.xlu1 %2437 }
 0x31d   : > { %2522 = vst.msk [vmem:[#allocation3 + $0x60] sm:$0xff] %vm2509_vm3, %v2438_v57  ;;  %v2665_v5 = vpop.permute.xlu0 %2664 }
 0x31e   : > { %2747 = vst.msk [vmem:[#allocation3 + $0x60] sm:$0xff] %vm2734_vm12, %v2663_v32 }
 0x31f   : > { %2748 = vst.msk [vmem:[#allocation3 + $0x68] sm:$0xff] %vm2734_vm12, %v2665_v5 }
 0x323   : > { %v2474_v30 = vpop.permute.xlu2 %2473 }
 0x324   : > { %v1833_v18 = vpop.permute.xlu1 %1832 }
 0x325   : > { %1898 = vst.msk [vmem:[#allocation3 + $0xf8] sm:$0xff] %vm1866_vm11, %v1833_v18  ;;  %v2281_v37 = vpop.permute.xlu0 %2280  ;;  %v2779_v31 = vld [vmem:[#allocation3 + $0x60] sm:$0xff] }
 0x326   : > { %2123 = vst.msk [vmem:[#allocation3 + $0xf8] sm:$0xff] %vm2091_vm4, %v2058_v12  ;;  %v2780_v10 = vld [vmem:[#allocation3 + $0x68] sm:$0xff]  ;;  %v3066_v18 = vld [vmem:[%s3835_s10 + $0x70] sm:$0xff] }
 0x327   : > { %v2805_v25 = vpack.c.bf16 %v2780_v10, %v2779_v31  ;;  %3032 = vst [vmem:[#allocation3 + $0x60] sm:$0xff] %v5633_v13  ;;  %v3293_v10 = vld [vmem:[#allocation3 + $0xa0] sm:$0xff] }
 0x328   : > { %3033 = vst [vmem:[#allocation3 + $0x68] sm:$0xff] %v5633_v13 }
 0x329   : > { %2921 = vmatmul.bf16.gmra.mxu0 %v2805_v25  ;;  %3096 = vst.msk [vmem:[#allocation3 + $0x60] sm:$0xff] %vm5678_vm1, %v3064_v45  ;;  %v3067_v45 = vld [vmem:[%s3835_s10 + $0x78] sm:$0xff] }
 0x32a   : > { %v2952_v16 = vpop.f32.mrf.mxu2  ;;  %3097 = vst.msk [vmem:[#allocation3 + $0x68] sm:$0xff] %vm5679_vm7, %v3065_v6 }
 0x32b   : > { %v2701_v53 = vpop.permute.xlu2 %2700  ;;  %v2953_v23 = vadd.f32 %v5008_v47, %v2952_v16 }
 0x32c   : > { %v3238_v29 = vpop.f32.mrf.mxu3  ;;  %v2056_v19 = vpop.permute.xlu1 %2055 }
 0x32d   : > { %v3239_v43 = vadd.f32 %v5229_v51, %v3238_v29  ;;  %2122 = vst.msk [vmem:[#allocation3 + $0xf0] sm:$0xff] %vm2091_vm4, %v2056_v19  ;;  %v2476_v40 = vpop.permute.xlu0 %2475  ;;  %v2996_v58 = vmax.f32 %v2953_v23, 0.0  ;;  %v3294_v23 = vld [vmem:[#allocation3 + $0xa8] sm:$0xff] }
 0x32e   : > { %2347 = vst.msk [vmem:[#allocation3 + $0xf0] sm:$0xff] %vm2316_vm13, %v2281_v37 }
 0x32f   : > { %v3323_v0 = vadd.f32 %v3291_v7, %v3239_v43  ;;  %2540 = vst.msk [vmem:[#allocation3 + $0xf0] sm:$0xff] %vm2509_vm3, %v2474_v30 }
 0x331   : > { %v3355_v4 = vmax.f32 %v3323_v0, 0.0 }
 0x332   : > { %v2954_v33 = vpop.f32.mrf.mxu2  ;;  %v3198_v61 = vpop.f32.mrf.mxu1 }
 0x333   : > { %3387 = vst [vmem:[%s5243_s17 + $0x90] sm:$0xff] %v3355_v4  ;;  %v2955_v60 = vadd.f32 %v5008_v47, %v2954_v33  ;;  %v3199_v26 = vadd.f32 %v5229_v51, %v3198_v61  ;;  %v2024_v63 = vpop.permute.xlu2 %2023 }
 0x334   : > { %v3240_v22 = vpop.f32.mrf.mxu3  ;;  %v2283_v39 = vpop.permute.xlu1 %2282 }
 0x335   : > { %v2997_v46 = vmax.f32 %v2955_v60, 0.0  ;;  %v3241_v14 = vadd.f32 %v5229_v51, %v3240_v22  ;;  %2348 = vst.msk [vmem:[#allocation3 + $0xf8] sm:$0xff] %vm2316_vm13, %v2283_v39  ;;  %v3307_v44 = vadd.f32 %v3275_v2, %v3199_v26  ;;  %v1799_v9 = vpop.permute.xlu0 %1798  ;;  %v5332_v39 = vld [vmem:[%s5424_s2] ss:$0 sm:$0xff] }
 0x336   : > { %2541 = vst.msk [vmem:[#allocation3 + $0xf8] sm:$0xff] %vm2509_vm3, %v2476_v40  ;;  %v3277_v40 = vld [vmem:[#allocation3 + $0x20] sm:$0xff] }
 0x337   : > { %v3324_v62 = vadd.f32 %v3292_v35, %v3241_v14  ;;  %v3339_v27 = vmax.f32 %v3307_v44, 0.0  ;;  %v3016_v49 = vpack.c.bf16 %v2997_v46, %v2996_v58  ;;  %2766 = vst.msk [vmem:[#allocation3 + $0xf8] sm:$0xff] %vm2734_vm12, %v2701_v53  ;;  %v3278_v35 = vld [vmem:[#allocation3 + $0x28] sm:$0xff] }
 0x338   : > { %1881 = vst.msk [vmem:[#allocation3 + $0x70] sm:$0xff] %vm1866_vm11, %v1799_v9 }
 0x339   : > { %v3356_v17 = vmax.f32 %v3324_v62, 0.0  ;;  %3371 = vst [vmem:[%s5243_s17 + $0x10] sm:$0xff] %v3339_v27  ;;  %3252 = vmatmul.bf16.gmra.mxu3 %v3016_v49 }
 0x33a   : > { %v3200_v21 = vpop.f32.mrf.mxu1  ;;  %2106 = vst.msk [vmem:[#allocation3 + $0x70] sm:$0xff] %vm2091_vm4, %v2024_v63 }
 0x33b   : > { %3388 = vst [vmem:[%s5243_s17 + $0x98] sm:$0xff] %v3356_v17  ;;  %v3201_v54 = vadd.f32 %v5229_v51, %v3200_v21  ;;  %v2251_v56 = vpop.permute.xlu2 %2250 }
 0x33c   : > { %v2699_v20 = vpop.permute.xlu1 %2698 }
 0x33d   : > { %2765 = vst.msk [vmem:[#allocation3 + $0xf0] sm:$0xff] %vm2734_vm12, %v2699_v20  ;;  %v3308_v34 = vadd.f32 %v3276_v24, %v3201_v54  ;;  %v2026_v52 = vpop.permute.xlu0 %2025 }
 0x33e   : > { %v2798_v15 = vld [vmem:[#allocation3 + $0xf8] sm:$0xff] }
 0x33f   : > { %v3340_v50 = vmax.f32 %v3308_v34, 0.0  ;;  %3051 = vst [vmem:[#allocation3 + $0xf8] sm:$0xff] %v5633_v13  ;;  %v3295_v34 = vld [vmem:[#allocation3 + $0xb0] sm:$0xff] }
 0x340   : > { %3115 = vst.msk [vmem:[#allocation3 + $0xf8] sm:$0xff] %vm5680_vm2, %v3083_v11 }
 0x341   : > { %3372 = vst [vmem:[%s5243_s17 + $0x18] sm:$0xff] %v3340_v50 }
 0x343   : > { %v2667_v41 = vpop.permute.xlu2 %2666 }
 0x344   : > { %v1801_v3 = vpop.permute.xlu1 %1800  ;;  %v2912_v42 = vpop.f32.mrf.mxu0  ;;  %v2797_v8 = vld [vmem:[#allocation3 + $0xf0] sm:$0xff] }
 0x345   : > { %1882 = vst.msk [vmem:[#allocation3 + $0x78] sm:$0xff] %vm1866_vm11, %v1801_v3  ;;  %v2814_v55 = vpack.c.bf16 %v2798_v15, %v2797_v8  ;;  %v2442_v48 = vpop.permute.xlu0 %2441  ;;  %v2913_v59 = vadd.f32 %v5008_v47, %v2912_v42  ;;  %vm5682_vm11 = vmmov %vm5678_vm1 }
 0x346   : > { %2107 = vst.msk [vmem:[#allocation3 + $0x78] sm:$0xff] %vm2091_vm4, %v2026_v52  ;;  %vm5683_vm4 = vmmov %vm5678_vm1 }
 0x347   : > { %2966 = vmatmul.bf16.gmra.mxu2 %v2814_v55  ;;  %3050 = vst [vmem:[#allocation3 + $0xf0] sm:$0xff] %v5633_v13  ;;  %v2980_v38 = vmax.f32 %v2913_v59, 0.0  ;;  %v3296_v55 = vld [vmem:[#allocation3 + $0xb8] sm:$0xff] }
 0x348   : > { %3114 = vst.msk [vmem:[#allocation3 + $0xf0] sm:$0xff] %vm5681_vm5, %v3082_v1 }
 0x349   : > { %2332 = vst.msk [vmem:[#allocation3 + $0x78] sm:$0xff] %vm2316_vm13, %v2251_v56  ;;  %v3279_v56 = vld [vmem:[#allocation3 + $0x30] sm:$0xff] }
 0x34c   : > { %v2249_v28 = vpop.permute.xlu1 %2248  ;;  %v2914_v32 = vpop.f32.mrf.mxu0 }
 0x34d   : > { %2331 = vst.msk [vmem:[#allocation3 + $0x70] sm:$0xff] %vm2316_vm13, %v2249_v28  ;;  %v2915_v36 = vadd.f32 %v5008_v47, %v2914_v32  ;;  %v2669_v5 = vpop.permute.xlu0 %2668 }
 0x34e   : > { %2524 = vst.msk [vmem:[#allocation3 + $0x70] sm:$0xff] %vm2509_vm3, %v2442_v48 }
 0x34f   : > { %v2981_v12 = vmax.f32 %v2915_v36, 0.0  ;;  %2749 = vst.msk [vmem:[#allocation3 + $0x70] sm:$0xff] %vm2734_vm12, %v2667_v41 }
 0x351   : > { %v3008_v57 = vpack.c.bf16 %v2981_v12, %v2980_v38  ;;  %v3280_v38 = vld [vmem:[#allocation3 + $0x38] sm:$0xff] }
 0x353   : > { %3212 = vmatmul.bf16.gmra.mxu1 %v3008_v57 }
 0x354   : > { %v2444_v30 = vpop.permute.xlu1 %2443 }
 0x355   : > { %2525 = vst.msk [vmem:[#allocation3 + $0x78] sm:$0xff] %vm2509_vm3, %v2444_v30 }
 0x356   : > { %2750 = vst.msk [vmem:[#allocation3 + $0x78] sm:$0xff] %vm2734_vm12, %v2669_v5  ;;  %v2781_v37 = vld [vmem:[#allocation3 + $0x70] sm:$0xff] }
 0x357   : > { %3034 = vst [vmem:[#allocation3 + $0x70] sm:$0xff] %v5633_v13 }
 0x358   : > { %3098 = vst.msk [vmem:[#allocation3 + $0x70] sm:$0xff] %vm5682_vm11, %v3066_v18 }
 0x35c   : > { %v3243_v31 = vpop.f32.mrf.mxu3 }
 0x35d   : > { %v3244_v25 = vadd.f32 %v5229_v51, %v3243_v31  ;;  %v2782_v6 = vld [vmem:[#allocation3 + $0x78] sm:$0xff] }
 0x35e   : > { %v2806_v16 = vpack.c.bf16 %v2782_v6, %v2781_v37  ;;  %3035 = vst [vmem:[#allocation3 + $0x78] sm:$0xff] %v5633_v13 }
 0x35f   : > { %v3325_v29 = vadd.f32 %v3293_v10, %v3244_v25  ;;  %3099 = vst.msk [vmem:[#allocation3 + $0x78] sm:$0xff] %vm5683_vm4, %v3067_v45 }
 0x360   : > { %2926 = vmatmul.bf16.gmra.mxu0 %v2806_v16 }
 0x361   : > { %v3357_v7 = vmax.f32 %v3325_v29, 0.0 }
 0x362   : > { %v2957_v19 = vpop.f32.mrf.mxu2  ;;  %v3203_v43 = vpop.f32.mrf.mxu1 }
 0x363   : > { %3389 = vst [vmem:[%s5243_s17 + $0xa0] sm:$0xff] %v3357_v7  ;;  %v3204_v53 = vadd.f32 %v5229_v51, %v3203_v43  ;;  %v2958_v2 = vadd.f32 %v5008_v47, %v2957_v19 }
 0x364   : > { %v3245_v0 = vpop.f32.mrf.mxu3 }
 0x365   : > { %v3246_v4 = vadd.f32 %v5229_v51, %v3245_v0  ;;  %v3309_v33 = vadd.f32 %v3277_v40, %v3204_v53  ;;  %v2998_v14 = vmax.f32 %v2958_v2, 0.0  ;;  %v3297_v40 = vld [vmem:[#allocation3 + $0xc0] sm:$0xff] }
 0x367   : > { %v3326_v61 = vadd.f32 %v3294_v23, %v3246_v4  ;;  %v3341_v13 = vmax.f32 %v3309_v33, 0.0  ;;  %v3298_v33 = vld [vmem:[#allocation3 + $0xc8] sm:$0xff] }
 0x369   : > { %v3358_v60 = vmax.f32 %v3326_v61, 0.0  ;;  %3373 = vst [vmem:[%s5243_s17 + $0x20] sm:$0xff] %v3341_v13 }
 0x36a   : > { %v2959_v26 = vpop.f32.mrf.mxu2  ;;  %v3205_v22 = vpop.f32.mrf.mxu1 }
 0x36b   : > { %3390 = vst [vmem:[%s5243_s17 + $0xa8] sm:$0xff] %v3358_v60  ;;  %v2960_v58 = vadd.f32 %v5332_v39, %v2959_v26  ;;  %v3206_v46 = vadd.f32 %v5229_v51, %v3205_v22  ;;  %v3281_v22 = vld [vmem:[#allocation3 + $0x40] sm:$0xff] }
 0x36d   : > { %v2999_v44 = vmax.f32 %v2960_v58, 0.0  ;;  %v3310_v9 = vadd.f32 %v3278_v35, %v3206_v46 }
 0x36f   : > { %v3342_v62 = vmax.f32 %v3310_v9, 0.0  ;;  %v3017_v47 = vpack.c.bf16 %v2999_v44, %v2998_v14 }
 0x371   : > { %3374 = vst [vmem:[%s5243_s17 + $0x28] sm:$0xff] %v3342_v62  ;;  %3257 = vmatmul.bf16.gmra.mxu3 %v3017_v47 }
 0x37c   : > { %v2917_v27 = vpop.f32.mrf.mxu0 }
 0x37d   : > { %v2918_v49 = vadd.f32 %v5332_v39, %v2917_v27 }
 0x37f   : > { %v2982_v21 = vmax.f32 %v2918_v49, 0.0 }
 0x384   : > { %v2919_v63 = vpop.f32.mrf.mxu0 }
 0x385   : > { %v2920_v17 = vadd.f32 %v5332_v39, %v2919_v63  ;;  %v3282_v63 = vld [vmem:[#allocation3 + $0x48] sm:$0xff] }
 0x387   : > { %v2983_v24 = vmax.f32 %v2920_v17, 0.0 }
 0x389   : > { %v3009_v54 = vpack.c.bf16 %v2983_v24, %v2982_v21 }
 0x38b   : > { %3217 = vmatmul.bf16.gmra.mxu1 %v3009_v54 }
 0x38c   : > { %v3248_v20 = vpop.f32.mrf.mxu3 }
 0x38d   : > { %v3249_v11 = vadd.f32 %v5229_v51, %v3248_v20 }
 0x38f   : > { %v3327_v15 = vadd.f32 %v3295_v34, %v3249_v11 }
 0x391   : > { %v3359_v50 = vmax.f32 %v3327_v15, 0.0 }
 0x392   : > { %v3208_v52 = vpop.f32.mrf.mxu1 }
 0x393   : > { %3391 = vst [vmem:[%s5243_s17 + $0xb0] sm:$0xff] %v3359_v50  ;;  %v2962_v3 = vpop.f32.mrf.mxu2  ;;  %v3209_v42 = vadd.f32 %v5229_v51, %v3208_v52 }
 0x394   : > { %v3250_v8 = vpop.f32.mrf.mxu3  ;;  %v2963_v32 = vadd.f32 %v5332_v39, %v2962_v3  ;;  %v3299_v3 = vld [vmem:[#allocation3 + $0xd0] sm:$0xff] }
 0x395   : > { %v3251_v1 = vadd.f32 %v5229_v51, %v3250_v8  ;;  %v3311_v48 = vadd.f32 %v3279_v56, %v3209_v42 }
 0x396   : > { %v3000_v18 = vmax.f32 %v2963_v32, 0.0  ;;  %v3283_v32 = vld [vmem:[#allocation3 + $0x50] sm:$0xff] }
 0x397   : > { %v3328_v59 = vadd.f32 %v3296_v55, %v3251_v1  ;;  %v3343_v41 = vmax.f32 %v3311_v48, 0.0  ;;  %v3300_v48 = vld [vmem:[#allocation3 + $0xd8] sm:$0xff] }
 0x399   : > { %v3360_v28 = vmax.f32 %v3328_v59, 0.0  ;;  %3375 = vst [vmem:[%s5243_s17 + $0x30] sm:$0xff] %v3343_v41 }
 0x39a   : > { %v3210_v36 = vpop.f32.mrf.mxu1 }
 0x39b   : > { %3392 = vst [vmem:[%s5243_s17 + $0xb8] sm:$0xff] %v3360_v28  ;;  %v2964_v12 = vpop.f32.mrf.mxu2  ;;  %v3211_v57 = vadd.f32 %v5229_v51, %v3210_v36 }
 0x39c   : > { %v2965_v5 = vadd.f32 %v5332_v39, %v2964_v12 }
 0x39d   : > { %v3312_v30 = vadd.f32 %v3280_v38, %v3211_v57 }
 0x39e   : > { %v3001_v37 = vmax.f32 %v2965_v5, 0.0  ;;  %v3284_v5 = vld [vmem:[#allocation3 + $0x58] sm:$0xff] }
 0x39f   : > { %v3344_v31 = vmax.f32 %v3312_v30, 0.0 }
 0x3a0   : > { %v3018_v10 = vpack.c.bf16 %v3001_v37, %v3000_v18 }
 0x3a1   : > { %3376 = vst [vmem:[%s5243_s17 + $0x38] sm:$0xff] %v3344_v31 }
 0x3a2   : > { %3262 = vmatmul.bf16.gmra.mxu3 %v3018_v10  ;;  %v3301_v10 = vld [vmem:[#allocation3 + $0xe0] sm:$0xff] }
 0x3a6   : > { %v2922_v45 = vpop.f32.mrf.mxu0 }
 0x3a7   : > { %v2923_v25 = vadd.f32 %v5332_v39, %v2922_v45 }
 0x3a9   : > { %v2984_v29 = vmax.f32 %v2923_v25, 0.0 }
 0x3ae   : > { %v2924_v6 = vpop.f32.mrf.mxu0 }
 0x3af   : > { %v2925_v16 = vadd.f32 %v5332_v39, %v2924_v6 }
 0x3b1   : > { %v2985_v7 = vmax.f32 %v2925_v16, 0.0 }
 0x3b3   : > { %v3010_v19 = vpack.c.bf16 %v2985_v7, %v2984_v29  ;;  %v3302_v29 = vld [vmem:[#allocation3 + $0xe8] sm:$0xff] }
 0x3b5   : > { %3222 = vmatmul.bf16.gmra.mxu1 %v3010_v19 }
 0x3bc   : > { %v3253_v43 = vpop.f32.mrf.mxu3 }
 0x3bd   : > { %v3254_v53 = vadd.f32 %v5229_v51, %v3253_v43 }
 0x3bf   : > { %v3329_v0 = vadd.f32 %v3297_v40, %v3254_v53  ;;  %v3285_v53 = vld [vmem:[#allocation3 + $0x60] sm:$0xff] }
 0x3c1   : > { %v3361_v23 = vmax.f32 %v3329_v0, 0.0 }
 0x3c3   : > { %3393 = vst [vmem:[%s5243_s17 + $0xc0] sm:$0xff] %v3361_v23 }
 0x3c4   : > { %v3255_v4 = vpop.f32.mrf.mxu3 }
 0x3c5   : > { %v3256_v61 = vadd.f32 %v5229_v51, %v3255_v4 }
 0x3c7   : > { %v3330_v13 = vadd.f32 %v3298_v33, %v3256_v61  ;;  %v3286_v61 = vld [vmem:[#allocation3 + $0x68] sm:$0xff] }
 0x3c9   : > { %v3362_v2 = vmax.f32 %v3330_v13, 0.0 }
 0x3ca   : > { %v2967_v60 = vpop.f32.mrf.mxu2 }
 0x3cb   : > { %3394 = vst [vmem:[%s5243_s17 + $0xc8] sm:$0xff] %v3362_v2  ;;  %v2968_v35 = vadd.f32 %v5332_v39, %v2967_v60 }
 0x3cd   : > { %v3002_v9 = vmax.f32 %v2968_v35, 0.0 }
 0x3d0   : > { %v3213_v26 = vpop.f32.mrf.mxu1 }
 0x3d1   : > { %v3214_v58 = vadd.f32 %v5229_v51, %v3213_v26 }
 0x3d2   : > { %v2969_v46 = vpop.f32.mrf.mxu2 }
 0x3d3   : > { %v3313_v14 = vadd.f32 %v3281_v22, %v3214_v58  ;;  %v2970_v44 = vadd.f32 %v5332_v39, %v2969_v46  ;;  %v3303_v22 = vld [vmem:[#allocation3 + $0xf0] sm:$0xff] }
 0x3d5   : > { %v3345_v62 = vmax.f32 %v3313_v14, 0.0  ;;  %v3003_v47 = vmax.f32 %v2970_v44, 0.0  ;;  %v3304_v44 = vld [vmem:[#allocation3 + $0xf8] sm:$0xff] }
 0x3d7   : > { %3377 = vst [vmem:[%s5243_s17 + $0x40] sm:$0xff] %v3345_v62  ;;  %v3019_v27 = vpack.c.bf16 %v3003_v47, %v3002_v9 }
 0x3d8   : > { %v3215_v49 = vpop.f32.mrf.mxu1 }
 0x3d9   : > { %v3216_v17 = vadd.f32 %v5229_v51, %v3215_v49  ;;  %3267 = vmatmul.bf16.gmra.mxu3 %v3019_v27  ;;  %v3287_v49 = vld [vmem:[#allocation3 + $0x70] sm:$0xff] }
 0x3db   : > { %v3314_v21 = vadd.f32 %v3282_v63, %v3216_v17 }
 0x3dd   : > { %v3346_v24 = vmax.f32 %v3314_v21, 0.0  ;;  %v2927_v54 = vpop.f32.mrf.mxu0 }
 0x3de   : > { %v2928_v20 = vadd.f32 %v5332_v39, %v2927_v54  ;;  %v3288_v54 = vld [vmem:[#allocation3 + $0x78] sm:$0xff] }
 0x3df   : > { %3378 = vst [vmem:[%s5243_s17 + $0x48] sm:$0xff] %v3346_v24 }
 0x3e0   : > { %v2986_v15 = vmax.f32 %v2928_v20, 0.0 }
 0x3e5   : > { %v2929_v34 = vpop.f32.mrf.mxu0 }
 0x3e6   : > { %v2930_v11 = vadd.f32 %v5332_v39, %v2929_v34 }
 0x3e8   : > { %v2987_v50 = vmax.f32 %v2930_v11, 0.0 }
 0x3ea   : > { %v3011_v52 = vpack.c.bf16 %v2987_v50, %v2986_v15 }
 0x3ec   : > { %3227 = vmatmul.bf16.gmra.mxu1 %v3011_v52 }
 0x3f4   : > { %v3258_v56 = vpop.f32.mrf.mxu3 }
 0x3f5   : > { %v3259_v42 = vadd.f32 %v5229_v51, %v3258_v56 }
 0x3f7   : > { %v3331_v8 = vadd.f32 %v3299_v3, %v3259_v42 }
 0x3f9   : > { %v3363_v55 = vmax.f32 %v3331_v8, 0.0 }
 0x3fb   : > { %3395 = vst [vmem:[%s5243_s17 + $0xd0] sm:$0xff] %v3363_v55 }
 0x3fc   : > { %v3260_v1 = vpop.f32.mrf.mxu3 }
 0x3fd   : > { %v3261_v59 = vadd.f32 %v5229_v51, %v3260_v1 }
 0x3ff   : > { %v3332_v41 = vadd.f32 %v3300_v48, %v3261_v59 }
 0x401   : > { %v3364_v39 = vmax.f32 %v3332_v41, 0.0 }
 0x403   : > { %3396 = vst [vmem:[%s5243_s17 + $0xd8] sm:$0xff] %v3364_v39 }
 0x408   : > { %v3218_v28 = vpop.f32.mrf.mxu1 }
 0x409   : > { %v3219_v36 = vadd.f32 %v5229_v51, %v3218_v28 }
 0x40b   : > { %v3315_v38 = vadd.f32 %v3283_v32, %v3219_v36 }
 0x40d   : > { %v3347_v12 = vmax.f32 %v3315_v38, 0.0 }
 0x40f   : > { %3379 = vst [vmem:[%s5243_s17 + $0x50] sm:$0xff] %v3347_v12 }
 0x410   : > { %v3220_v57 = vpop.f32.mrf.mxu1 }
 0x411   : > { %v3221_v30 = vadd.f32 %v5229_v51, %v3220_v57 }
 0x413   : > { %v3316_v18 = vadd.f32 %v3284_v5, %v3221_v30 }
 0x415   : > { %v3348_v37 = vmax.f32 %v3316_v18, 0.0 }
 0x417   : > { %3380 = vst [vmem:[%s5243_s17 + $0x58] sm:$0xff] %v3348_v37 }
 0x425   : > { %v3263_v31 = vpop.f32.mrf.mxu3 }
 0x426   : > { %v3264_v45 = vadd.f32 %v5229_v51, %v3263_v31 }
 0x428   : > { %v3333_v25 = vadd.f32 %v3301_v10, %v3264_v45 }
 0x42a   : > { %v3365_v6 = vmax.f32 %v3333_v25, 0.0 }
 0x42c   : > { %3397 = vst [vmem:[%s5243_s17 + $0xe0] sm:$0xff] %v3365_v6 }
 0x42d   : > { %v3265_v16 = vpop.f32.mrf.mxu3 }
 0x42e   : > { %v3266_v7 = vadd.f32 %v5229_v51, %v3265_v16 }
 0x430   : > { %v3334_v19 = vadd.f32 %v3302_v29, %v3266_v7 }
 0x432   : > { %v3366_v43 = vmax.f32 %v3334_v19, 0.0  ;;  %v3223_v40 = vpop.f32.mrf.mxu1 }
 0x433   : > { %v3224_v0 = vadd.f32 %v5229_v51, %v3223_v40 }
 0x434   : > { %3398 = vst [vmem:[%s5243_s17 + $0xe8] sm:$0xff] %v3366_v43 }
 0x435   : > { %v3317_v23 = vadd.f32 %v3285_v53, %v3224_v0 }
 0x437   : > { %v3349_v4 = vmax.f32 %v3317_v23, 0.0 }
 0x439   : > { %3381 = vst [vmem:[%s5243_s17 + $0x60] sm:$0xff] %v3349_v4 }
 0x43a   : > { %v3225_v33 = vpop.f32.mrf.mxu1 }
 0x43b   : > { %v3226_v13 = vadd.f32 %v5229_v51, %v3225_v33 }
 0x43d   : > { %v3318_v2 = vadd.f32 %v3286_v61, %v3226_v13 }
 0x43f   : > { %v3350_v60 = vmax.f32 %v3318_v2, 0.0 }
 0x441   : > { %3382 = vst [vmem:[%s5243_s17 + $0x68] sm:$0xff] %v3350_v60 }
 0x45c   : > { %v3268_v26 = vpop.f32.mrf.mxu3 }
 0x45d   : > { %v3269_v35 = vadd.f32 %v5229_v51, %v3268_v26 }
 0x45f   : > { %v3335_v58 = vadd.f32 %v3303_v22, %v3269_v35 }
 0x461   : > { %v3367_v46 = vmax.f32 %v3335_v58, 0.0 }
 0x463   : > { %3399 = vst [vmem:[%s5243_s17 + $0xf0] sm:$0xff] %v3367_v46 }
 0x464   : > { %v3270_v14 = vpop.f32.mrf.mxu3 }
 0x465   : > { %v3271_v9 = vadd.f32 %v5229_v51, %v3270_v14 }
 0x467   : > { %v3336_v62 = vadd.f32 %v3304_v44, %v3271_v9 }
 0x469   : > { %v3368_v47 = vmax.f32 %v3336_v62, 0.0  ;;  %v3228_v27 = vpop.f32.mrf.mxu1 }
 0x46a   : > { %v3229_v63 = vadd.f32 %v5229_v51, %v3228_v27 }
 0x46b   : > { %3400 = vst [vmem:[%s5243_s17 + $0xf8] sm:$0xff] %v3368_v47 }
 0x46c   : > { %v3319_v17 = vadd.f32 %v3287_v49, %v3229_v63 }
 0x46e   : > { %v3351_v21 = vmax.f32 %v3319_v17, 0.0 }
 0x470   : > { %3383 = vst [vmem:[%s5243_s17 + $0x70] sm:$0xff] %v3351_v21 }
 0x471   : > { %v3230_v24 = vpop.f32.mrf.mxu1 }
 0x472   : > { %v3231_v20 = vadd.f32 %v5229_v51, %v3230_v24 }
 0x474   : > { %v3320_v34 = vadd.f32 %v3288_v54, %v3231_v20 }
 0x476   : > { %v3352_v11 = vmax.f32 %v3320_v34, 0.0 }
 0x478   : > { %3384 = vst [vmem:[%s5243_s17 + $0x78] sm:$0xff] %v3352_v11 }
 0x479   : > { %3668 = shalt.err (!%p3665_p3)
}
 0x47a   : > { %s3714_s15 = smov 128  }
 0x47b   : > { %3589 = dma.vmem_to_hbm [thread:$0]  (%p3783_p5), %s3415_s30, 4096, %s3417_s6, %s3402_s22, %s3714_s15, %s3714_s15, %s3707_s11  }
 0x47c PF: > { %p3595_p4 = scmp.ge.s32.totalorder %s3703_s21, 2  ;;  %s3431_s17 = sand.u32 1, %s3691_s18  }
 0x47d   : > { %s3432_s12 = scalar_lea.sflag [#allocation5], %s3431_s17 }
 0x47e   : > { %p3592_p7 = pnand %p3595_p4, %p3787_p6 }
 0x480   : > { %p3593_p8 = pneg %p3592_p7 }
 0x482   : > { %3686 = dma.done.wait (%p3593_p8), %s3432_s12, 4096  }
 0x483   : > { %3688 = vsyncadd (%p3593_p8), %s3432_s12, 4294963200  ;;  %p15_p9 = scmp.ge.s32.totalorder %s3770_s24, 4   ;;  %s5684_s18 = smov %s3695_s19 }
 0x484   : > { %s5685_s19 = smov %s3699_s20  ;;  %s5686_s20 = smov %s3781_s27 }
 0x485   : > { %s5687_s21 = smov %s3770_s24  ;;  %17 = sbr.rel (!%p15_p9) target bundleno = 3 (0x3), region = 75 }
 0x48a   :  { %3438 = vsyncpa [#allocation5], 1 }
 0x48b   :  { %3440 = vsyncpa [#allocation5 + $0x1], 1 }

</bundles_post_ra>
